<compile_context>
chip_gen: v5e
topology: v5e:2x2
jax: 0.10.0
libtpu: 0.0.40
codegen_flags: <defaults>
</compile_context>

<pallas_src>
import jax
import jax.numpy as jnp
from jax.experimental import pallas as pl
from jax.experimental.pallas import tpu as pltpu

# ----------------------------- config ---------------------------------------
B = 2          # batch
C = 4          # input channels
IMG = 16       # image size
PS = 4         # patch size
E = 32         # embed dim
HEADS = 4      # attention heads
FWD = 2        # forward_mul
LAYERS = 2     # encoder layers
NCLS = 10      # classes

P = (IMG // PS) ** 2          # patches per image
S = P + 1                     # tokens per image (cls + patches)
K = C * PS * PS               # flattened patch feature size
HD = E // HEADS               # head dim
F = FWD * E                   # MLP hidden dim
NCLS_PAD = 128                # lane-dense classifier output width
LN_EPS = 1e-5


# --------------------------- in-kernel helpers --------------------------------
def _layernorm(x, w, b):
    mu = jnp.mean(x, axis=-1, keepdims=True)
    var = jnp.mean((x - mu) ** 2, axis=-1, keepdims=True)
    return (x - mu) * jax.lax.rsqrt(var + LN_EPS) * w + b


def _erf(x):
    # Abramowitz & Stegun 7.1.26 rational approximation, |error| < 1.5e-7.
    # Uses only mul/add/div/exp/select -> guaranteed Mosaic lowering.
    a1, a2, a3, a4, a5 = (0.254829592, -0.284496736, 1.421413741,
                          -1.453152027, 1.061405429)
    p = 0.3275911
    ax = jnp.abs(x)
    t = 1.0 / (1.0 + p * ax)
    poly = ((((a5 * t + a4) * t + a3) * t + a2) * t + a1) * t
    y = 1.0 - poly * jnp.exp(-ax * ax)
    return jnp.where(x >= 0.0, y, -y)


def _gelu_exact(x):
    # nn.GELU() default (erf form): 0.5 * x * (1 + erf(x / sqrt(2)))
    return 0.5 * x * (1.0 + _erf(x * (1.0 / 2.0 ** 0.5)))


# ----------------------------- fused ViT kernel --------------------------------
def vit_kernel(tok_ref, add_ref, wp_ref,
               ln1w_ref, ln1b_ref, wqkv_ref, bqkv_ref, wo_ref, bo_ref,
               ln2w_ref, ln2b_ref, w1_ref, b1_ref, w2_ref, b2_ref,
               lnfw_ref, lnfb_ref, cw1_ref, cb1_ref, cw2_ref, cb2_ref,
               o_ref):
    bf = jnp.bfloat16

    # ---- patch embedding: [cls(zero row), patches] @ Wp + [cls, bias+pos] ----
    x = jnp.dot(tok_ref[0].astype(bf), wp_ref[...].astype(bf),
                preferred_element_type=jnp.float32) + add_ref[0]        # (S, E)
    # TODO(synk): nn.Dropout(p=0.0) layers are identities at inference; omitted.

    scale = 1.0 / float(HD) ** 0.5

    # ---- transformer encoder layers (static Python loop, stacked weights) ----
    for l in range(LAYERS):
        # --- multi-head self-attention (fused QKV, per-head lane views) ---
        h = _layernorm(x, ln1w_ref[l], ln1b_ref[l])                     # (S, E)
        qkv = jnp.dot(h.astype(bf), wqkv_ref[l].astype(bf),
                      preferred_element_type=jnp.float32) + bqkv_ref[l]  # (S, 3E)

        heads = []
        for hh in range(HEADS):
            qh = qkv[:, hh * HD:(hh + 1) * HD]                          # (S, HD)
            kh = qkv[:, E + hh * HD:E + (hh + 1) * HD]
            vh = qkv[:, 2 * E + hh * HD:2 * E + (hh + 1) * HD]
            sc = jnp.einsum('qd,kd->qk', qh, kh,
                            preferred_element_type=jnp.float32) * scale  # (S, S)
            sc = sc - jnp.max(sc, axis=-1, keepdims=True)
            pr = jnp.exp(sc)
            pr = pr * pl.reciprocal(jnp.sum(pr, axis=-1, keepdims=True),
                                    approx=True)
            heads.append(jnp.dot(pr, vh, preferred_element_type=jnp.float32))
        # concat heads -> ONE dense (S,E)@(E,E) out-projection (head reduction
        # folded into the contraction; no (H,S,E) intermediate).
        oh = jnp.concatenate(heads, axis=-1)                            # (S, E)
        attn = jnp.dot(oh.astype(bf), wo_ref[l].astype(bf),
                       preferred_element_type=jnp.float32) + bo_ref[l]
        x = x + attn

        # --- MLP branch ---
        h2 = _layernorm(x, ln2w_ref[l], ln2b_ref[l])
        fm = jnp.dot(h2.astype(bf), w1_ref[l].astype(bf),
                     preferred_element_type=jnp.float32) + b1_ref[l]
        fm = _gelu_exact(fm)
        fm = jnp.dot(fm.astype(bf), w2_ref[l].astype(bf),
                     preferred_element_type=jnp.float32) + b2_ref[l]
        x = x + fm

    # ---- final LayerNorm + classifier head on the cls row only -------------
    cls_row = x[0:1, :]                                                 # (1, E)
    y = _layernorm(cls_row, lnfw_ref[...], lnfb_ref[...])
    hc = jnp.tanh(jnp.dot(y.astype(bf), cw1_ref[...].astype(bf),
                          preferred_element_type=jnp.float32) + cb1_ref[...])
    o_ref[0] = jnp.dot(hc.astype(bf), cw2_ref[...].astype(bf),
                       preferred_element_type=jnp.float32) + cb2_ref[...]


def vit_pallas(tok_in, add_term, prm):
    Bn = tok_in.shape[0]
    vm = pl.BlockSpec(memory_space=pltpu.MemorySpace.VMEM)   # whole array in VMEM
    args = (tok_in, add_term,
            prm["w_patch"],
            prm["ln1w"], prm["ln1b"], prm["wqkv"], prm["bqkv"],
            prm["wo"], prm["bo"],
            prm["ln2w"], prm["ln2b"], prm["w1"], prm["b1"], prm["w2"], prm["b2"],
            prm["ln_f_w"], prm["ln_f_b"], prm["c_w1"], prm["c_b1"],
            prm["c_w2p"], prm["c_b2p"])
    in_specs = [pl.BlockSpec((1, S, K), lambda b: (b, 0, 0)),
                pl.BlockSpec((1, S, E), lambda b: (b, 0, 0))] + [vm] * 19
    return pl.pallas_call(
        vit_kernel,
        grid=(Bn,),
        in_specs=in_specs,
        out_specs=pl.BlockSpec((1, 1, NCLS_PAD), lambda b: (b, 0, 0)),
        out_shape=jax.ShapeDtypeStruct((Bn, 1, NCLS_PAD), jnp.float32),
        compiler_params=pltpu.CompilerParams(
            dimension_semantics=("parallel",)),
    )(*args)


# ------------------------------ parameters -----------------------------------
def init_params(key):
    def tn(k, shape, std=0.02):
        # trunc_normal_(std=0.02, a=-2, b=2): bounds are ±100σ, so a plain
        # normal draw is a faithful deterministic stand-in.
        return (std * jax.random.normal(k, shape)).astype(jnp.float32)

    keys = iter(jax.random.split(key, 8 + 8 * LAYERS))
    params = {
        # Conv2d(C, E, kernel=PS, stride=PS) as a (K, E) matmul, (c,kh,kw) order
        "w_patch": tn(next(keys), (E, C, PS, PS)).reshape(E, K).T,   # (K, E)
        "b_patch": jnp.zeros((1, E), jnp.float32),
        "pos": tn(next(keys), (P, E)),
        "cls": tn(next(keys), (1, E)),
        "ln_f_w": jnp.ones((1, E), jnp.float32),
        "ln_f_b": jnp.zeros((1, E), jnp.float32),
        "c_w1": tn(next(keys), (E, E)),
        "c_b1": jnp.zeros((1, E), jnp.float32),
    }
    # classifier output weights zero-padded to 128 lanes (padded logits == 0)
    c_w2 = tn(next(keys), (E, NCLS))
    params["c_w2p"] = jnp.pad(c_w2, ((0, 0), (0, NCLS_PAD - NCLS)))
    params["c_b2p"] = jnp.zeros((1, NCLS_PAD), jnp.float32)

    names = ("ln1w", "ln1b", "wqkv", "bqkv", "wo", "bo",
             "ln2w", "ln2b", "w1", "b1", "w2", "b2")
    per_layer = {n: [] for n in names}
    for _ in range(LAYERS):
        per_layer["ln1w"].append(jnp.ones((1, E), jnp.float32))
        per_layer["ln1b"].append(jnp.zeros((1, E), jnp.float32))
        # fused QKV weight: (in, out) convention, outputs stacked [Q | K | V];
        # within each, head h owns output columns h*HD:(h+1)*HD.
        wq = tn(next(keys), (E, E))
        wk = tn(next(keys), (E, E))
        wv = tn(next(keys), (E, E))
        per_layer["wqkv"].append(jnp.concatenate([wq, wk, wv], axis=1))  # (E,3E)
        per_layer["bqkv"].append(jnp.zeros((1, 3 * E), jnp.float32))
        per_layer["wo"].append(tn(next(keys), (E, E)))                   # (E, E)
        per_layer["bo"].append(jnp.zeros((1, E), jnp.float32))
        per_layer["ln2w"].append(jnp.ones((1, E), jnp.float32))
        per_layer["ln2b"].append(jnp.zeros((1, E), jnp.float32))
        per_layer["w1"].append(tn(next(keys), (E, F)))
        per_layer["b1"].append(jnp.zeros((1, F), jnp.float32))
        per_layer["w2"].append(tn(next(keys), (F, E)))
        per_layer["b2"].append(jnp.zeros((1, E), jnp.float32))
    for name, lst in per_layer.items():
        params[name] = jnp.stack(lst, axis=0)       # leading LAYERS axis
    return params


# ------------------------------ forward --------------------------------------
@jax.jit
def vit_forward(x_nchw, params):
    Bn = x_nchw.shape[0]
    Hp = Wp = IMG // PS
    # stride=kernel Conv2d == matmul over flattened (c, kh, kw) patch features
    patches = (x_nchw.reshape(Bn, C, Hp, PS, Wp, PS)
               .transpose(0, 2, 4, 1, 3, 5)
               .reshape(Bn, P, K)).astype(jnp.float32)

    # per-image token slabs for the fused kernel:
    #   tok_in : zero row (cls slot) followed by the P patch rows     (B, S, K)
    #   add    : cls token for the cls row, conv-bias + pos-emb else  (B, S, E)
    tok_in = jnp.concatenate(
        [jnp.zeros((Bn, 1, K), jnp.float32), patches], axis=1)
    add_term = jnp.concatenate(
        [jnp.broadcast_to(params["cls"][None, :, :], (Bn, 1, E)),
         jnp.broadcast_to((params["b_patch"] + params["pos"])[None, :, :],
                          (Bn, P, E))],
        axis=1)

    out = vit_pallas(tok_in, add_term, params)            # (Bn, 1, NCLS_PAD)
    return out.reshape(Bn, NCLS_PAD)[:, :NCLS]            # real classes only


# -------------------------------- main ----------------------------------------
if __name__ == "__main__":
    key = jax.random.PRNGKey(0)
    k_x, k_p = jax.random.split(key)
    x = jax.random.normal(k_x, (B, C, IMG, IMG), dtype=jnp.float32)  # NCHW
    params = init_params(k_p)

    logits = vit_forward(x, params)
    jax.block_until_ready(logits)
    assert logits.shape == (B, NCLS)
    print("KERNEL_OK")
</pallas_src>

<mosaic_0001>
module attributes {stable_mosaic.version = 11 : i64} {
  func.func @vit_kernel(%arg0: i32, %arg1: memref<1x17x64xf32, #tpu.memory_space<vmem>>, %arg2: memref<1x17x32xf32, #tpu.memory_space<vmem>>, %arg3: memref<64x32xf32, #tpu.memory_space<vmem>>, %arg4: memref<2x1x32xf32, #tpu.memory_space<vmem>>, %arg5: memref<2x1x32xf32, #tpu.memory_space<vmem>>, %arg6: memref<2x32x96xf32, #tpu.memory_space<vmem>>, %arg7: memref<2x1x96xf32, #tpu.memory_space<vmem>>, %arg8: memref<2x32x32xf32, #tpu.memory_space<vmem>>, %arg9: memref<2x1x32xf32, #tpu.memory_space<vmem>>, %arg10: memref<2x1x32xf32, #tpu.memory_space<vmem>>, %arg11: memref<2x1x32xf32, #tpu.memory_space<vmem>>, %arg12: memref<2x32x64xf32, #tpu.memory_space<vmem>>, %arg13: memref<2x1x64xf32, #tpu.memory_space<vmem>>, %arg14: memref<2x64x32xf32, #tpu.memory_space<vmem>>, %arg15: memref<2x1x32xf32, #tpu.memory_space<vmem>>, %arg16: memref<1x32xf32, #tpu.memory_space<vmem>>, %arg17: memref<1x32xf32, #tpu.memory_space<vmem>>, %arg18: memref<32x32xf32, #tpu.memory_space<vmem>>, %arg19: memref<1x32xf32, #tpu.memory_space<vmem>>, %arg20: memref<32x128xf32, #tpu.memory_space<vmem>>, %arg21: memref<1x128xf32, #tpu.memory_space<vmem>>, %arg22: memref<1x1x128xf32, #tpu.memory_space<vmem>>) attributes {dimension_semantics = [#tpu.dimension_semantics<parallel>], iteration_bounds = array<i64: 2>, scalar_prefetch = 0 : i64, scratch_operands = 0 : i64, tpu.core_type = #tpu.core_type<tc>, window_params = [{transform_indices = @transform_0, window_bounds = array<i64: 1, 17, 64>}, {transform_indices = @transform_1, window_bounds = array<i64: 1, 17, 32>}, {pipeline_mode = #tpu.pipeline_mode<synchronous>, transform_indices = @transform_2, window_bounds = array<i64: 64, 32>}, {pipeline_mode = #tpu.pipeline_mode<synchronous>, transform_indices = @transform_3, window_bounds = array<i64: 2, 1, 32>}, {pipeline_mode = #tpu.pipeline_mode<synchronous>, transform_indices = @transform_4, window_bounds = array<i64: 2, 1, 32>}, {pipeline_mode = #tpu.pipeline_mode<synchronous>, transform_indices = @transform_5, window_bounds = array<i64: 2, 32, 96>}, {pipeline_mode = #tpu.pipeline_mode<synchronous>, transform_indices = @transform_6, window_bounds = array<i64: 2, 1, 96>}, {pipeline_mode = #tpu.pipeline_mode<synchronous>, transform_indices = @transform_7, window_bounds = array<i64: 2, 32, 32>}, {pipeline_mode = #tpu.pipeline_mode<synchronous>, transform_indices = @transform_8, window_bounds = array<i64: 2, 1, 32>}, {pipeline_mode = #tpu.pipeline_mode<synchronous>, transform_indices = @transform_9, window_bounds = array<i64: 2, 1, 32>}, {pipeline_mode = #tpu.pipeline_mode<synchronous>, transform_indices = @transform_10, window_bounds = array<i64: 2, 1, 32>}, {pipeline_mode = #tpu.pipeline_mode<synchronous>, transform_indices = @transform_11, window_bounds = array<i64: 2, 32, 64>}, {pipeline_mode = #tpu.pipeline_mode<synchronous>, transform_indices = @transform_12, window_bounds = array<i64: 2, 1, 64>}, {pipeline_mode = #tpu.pipeline_mode<synchronous>, transform_indices = @transform_13, window_bounds = array<i64: 2, 64, 32>}, {pipeline_mode = #tpu.pipeline_mode<synchronous>, transform_indices = @transform_14, window_bounds = array<i64: 2, 1, 32>}, {pipeline_mode = #tpu.pipeline_mode<synchronous>, transform_indices = @transform_15, window_bounds = array<i64: 1, 32>}, {pipeline_mode = #tpu.pipeline_mode<synchronous>, transform_indices = @transform_16, window_bounds = array<i64: 1, 32>}, {pipeline_mode = #tpu.pipeline_mode<synchronous>, transform_indices = @transform_17, window_bounds = array<i64: 32, 32>}, {pipeline_mode = #tpu.pipeline_mode<synchronous>, transform_indices = @transform_18, window_bounds = array<i64: 1, 32>}, {pipeline_mode = #tpu.pipeline_mode<synchronous>, transform_indices = @transform_19, window_bounds = array<i64: 32, 128>}, {pipeline_mode = #tpu.pipeline_mode<synchronous>, transform_indices = @transform_20, window_bounds = array<i64: 1, 128>}, {transform_indices = @transform_21, window_bounds = array<i64: 1, 1, 128>}]} {
    %c0 = arith.constant 0 : index
    %c0_0 = arith.constant 0 : index
    %c0_1 = arith.constant 0 : index
    %0 = vector.load %arg1[%c0, %c0_0, %c0_1] : memref<1x17x64xf32, #tpu.memory_space<vmem>>, vector<1x17x64xf32>
    %1 = vector.shape_cast %0 : vector<1x17x64xf32> to vector<17x64xf32>
    %2 = arith.truncf %1 : vector<17x64xf32> to vector<17x64xbf16>
    %c0_2 = arith.constant 0 : index
    %c0_3 = arith.constant 0 : index
    %3 = vector.load %arg3[%c0_2, %c0_3] : memref<64x32xf32, #tpu.memory_space<vmem>>, vector<64x32xf32>
    %4 = arith.truncf %3 : vector<64x32xf32> to vector<64x32xbf16>
    %cst = arith.constant dense<0.000000e+00> : vector<17x32xf32>
    %5 = tpu.matmul %2, %4, %cst {dimension_numbers = #tpu.dot_dimension_numbers<[1], [0], [0], [1], [0, 0, 1, 1], [], []>} : vector<17x64xbf16>, vector<64x32xbf16>, vector<17x32xf32> -> vector<17x32xf32>
    %c0_4 = arith.constant 0 : index
    %c0_5 = arith.constant 0 : index
    %c0_6 = arith.constant 0 : index
    %6 = vector.load %arg2[%c0_4, %c0_5, %c0_6] : memref<1x17x32xf32, #tpu.memory_space<vmem>>, vector<1x17x32xf32>
    %7 = vector.shape_cast %6 : vector<1x17x32xf32> to vector<17x32xf32>
    %8 = arith.addf %5, %7 : vector<17x32xf32>
    %c0_7 = arith.constant 0 : index
    %c0_8 = arith.constant 0 : index
    %c0_9 = arith.constant 0 : index
    %9 = vector.load %arg4[%c0_7, %c0_8, %c0_9] : memref<2x1x32xf32, #tpu.memory_space<vmem>>, vector<1x1x32xf32>
    %10 = vector.shape_cast %9 : vector<1x1x32xf32> to vector<1x32xf32>
    %c0_10 = arith.constant 0 : index
    %c0_11 = arith.constant 0 : index
    %c0_12 = arith.constant 0 : index
    %11 = vector.load %arg5[%c0_10, %c0_11, %c0_12] : memref<2x1x32xf32, #tpu.memory_space<vmem>>, vector<1x1x32xf32>
    %12 = vector.shape_cast %11 : vector<1x1x32xf32> to vector<1x32xf32>
    %cst_13 = arith.constant dense<0.000000e+00> : vector<17xf32>
    %13 = vector.multi_reduction <add>, %8, %cst_13 [1] : vector<17x32xf32> to vector<17xf32>
    %14 = vector.shape_cast %13 : vector<17xf32> to vector<17x1xf32>
    %cst_14 = arith.constant 3.200000e+01 : f32
    %15 = vector.broadcast %cst_14 : f32 to vector<17x1xf32>
    %16 = arith.divf %14, %15 : vector<17x1xf32>
    %17 = vector.broadcast %16 : vector<17x1xf32> to vector<17x32xf32>
    %18 = arith.subf %8, %17 : vector<17x32xf32>
    %19 = arith.mulf %18, %18 : vector<17x32xf32>
    %cst_15 = arith.constant dense<0.000000e+00> : vector<17xf32>
    %20 = vector.multi_reduction <add>, %19, %cst_15 [1] : vector<17x32xf32> to vector<17xf32>
    %21 = vector.shape_cast %20 : vector<17xf32> to vector<17x1xf32>
    %cst_16 = arith.constant 3.200000e+01 : f32
    %22 = vector.broadcast %cst_16 : f32 to vector<17x1xf32>
    %23 = arith.divf %21, %22 : vector<17x1xf32>
    %24 = vector.broadcast %16 : vector<17x1xf32> to vector<17x32xf32>
    %25 = arith.subf %8, %24 : vector<17x32xf32>
    %cst_17 = arith.constant 9.99999974E-6 : f32
    %26 = vector.broadcast %cst_17 : f32 to vector<17x1xf32>
    %27 = arith.addf %23, %26 : vector<17x1xf32>
    %28 = math.rsqrt %27 : vector<17x1xf32>
    %29 = vector.broadcast %28 : vector<17x1xf32> to vector<17x32xf32>
    %30 = arith.mulf %25, %29 : vector<17x32xf32>
    %31 = vector.broadcast %10 : vector<1x32xf32> to vector<17x32xf32>
    %32 = arith.mulf %30, %31 : vector<17x32xf32>
    %33 = vector.broadcast %12 : vector<1x32xf32> to vector<17x32xf32>
    %34 = arith.addf %32, %33 : vector<17x32xf32>
    %35 = arith.truncf %34 : vector<17x32xf32> to vector<17x32xbf16>
    %c0_18 = arith.constant 0 : index
    %c0_19 = arith.constant 0 : index
    %c0_20 = arith.constant 0 : index
    %36 = vector.load %arg6[%c0_18, %c0_19, %c0_20] : memref<2x32x96xf32, #tpu.memory_space<vmem>>, vector<1x32x96xf32>
    %37 = vector.shape_cast %36 : vector<1x32x96xf32> to vector<32x96xf32>
    %38 = arith.truncf %37 : vector<32x96xf32> to vector<32x96xbf16>
    %cst_21 = arith.constant dense<0.000000e+00> : vector<17x96xf32>
    %39 = tpu.matmul %35, %38, %cst_21 {dimension_numbers = #tpu.dot_dimension_numbers<[1], [0], [0], [1], [0, 0, 1, 1], [], []>} : vector<17x32xbf16>, vector<32x96xbf16>, vector<17x96xf32> -> vector<17x96xf32>
    %c0_22 = arith.constant 0 : index
    %c0_23 = arith.constant 0 : index
    %c0_24 = arith.constant 0 : index
    %40 = vector.load %arg7[%c0_22, %c0_23, %c0_24] : memref<2x1x96xf32, #tpu.memory_space<vmem>>, vector<1x1x96xf32>
    %41 = vector.shape_cast %40 : vector<1x1x96xf32> to vector<1x96xf32>
    %42 = vector.broadcast %41 : vector<1x96xf32> to vector<17x96xf32>
    %43 = arith.addf %39, %42 : vector<17x96xf32>
    %44 = vector.extract_strided_slice %43 {offsets = [0, 0], sizes = [17, 8], strides = [1, 1]} : vector<17x96xf32> to vector<17x8xf32>
    %45 = vector.extract_strided_slice %43 {offsets = [0, 32], sizes = [17, 8], strides = [1, 1]} : vector<17x96xf32> to vector<17x8xf32>
    %46 = vector.extract_strided_slice %43 {offsets = [0, 64], sizes = [17, 8], strides = [1, 1]} : vector<17x96xf32> to vector<17x8xf32>
    "tpu.trace_start"() <{level = 10 : i32, message = "qd,kd->qk"}> : () -> ()
    %cst_25 = arith.constant dense<0.000000e+00> : vector<17x17xf32>
    %47 = tpu.matmul %44, %45, %cst_25 {dimension_numbers = #tpu.dot_dimension_numbers<[1], [1], [0], [0], [0, 0, 1, 0], [], []>} : vector<17x8xf32>, vector<17x8xf32>, vector<17x17xf32> -> vector<17x17xf32>
    "tpu.trace_stop"() : () -> ()
    %cst_26 = arith.constant 0.353553385 : f32
    %48 = vector.broadcast %cst_26 : f32 to vector<17x17xf32>
    %49 = arith.mulf %47, %48 : vector<17x17xf32>
    %cst_27 = arith.constant dense<0xFF800000> : vector<17xf32>
    %50 = vector.multi_reduction <maximumf>, %49, %cst_27 [1] : vector<17x17xf32> to vector<17xf32>
    %51 = vector.shape_cast %50 : vector<17xf32> to vector<17x1xf32>
    %52 = vector.broadcast %51 : vector<17x1xf32> to vector<17x17xf32>
    %53 = arith.subf %49, %52 : vector<17x17xf32>
    %54 = math.exp %53 : vector<17x17xf32>
    %cst_28 = arith.constant dense<0.000000e+00> : vector<17xf32>
    %55 = vector.multi_reduction <add>, %54, %cst_28 [1] : vector<17x17xf32> to vector<17xf32>
    %56 = vector.shape_cast %55 : vector<17xf32> to vector<17x1xf32>
    %57 = tpu.reciprocal %56 {approx = true} : vector<17x1xf32> -> vector<17x1xf32>
    %58 = vector.broadcast %57 : vector<17x1xf32> to vector<17x17xf32>
    %59 = arith.mulf %54, %58 : vector<17x17xf32>
    %cst_29 = arith.constant dense<0.000000e+00> : vector<17x8xf32>
    %60 = tpu.matmul %59, %46, %cst_29 {dimension_numbers = #tpu.dot_dimension_numbers<[1], [0], [0], [1], [0, 0, 1, 1], [], []>} : vector<17x17xf32>, vector<17x8xf32>, vector<17x8xf32> -> vector<17x8xf32>
    %61 = vector.extract_strided_slice %43 {offsets = [0, 8], sizes = [17, 8], strides = [1, 1]} : vector<17x96xf32> to vector<17x8xf32>
    %62 = vector.extract_strided_slice %43 {offsets = [0, 40], sizes = [17, 8], strides = [1, 1]} : vector<17x96xf32> to vector<17x8xf32>
    %63 = vector.extract_strided_slice %43 {offsets = [0, 72], sizes = [17, 8], strides = [1, 1]} : vector<17x96xf32> to vector<17x8xf32>
    "tpu.trace_start"() <{level = 10 : i32, message = "qd,kd->qk"}> : () -> ()
    %cst_30 = arith.constant dense<0.000000e+00> : vector<17x17xf32>
    %64 = tpu.matmul %61, %62, %cst_30 {dimension_numbers = #tpu.dot_dimension_numbers<[1], [1], [0], [0], [0, 0, 1, 0], [], []>} : vector<17x8xf32>, vector<17x8xf32>, vector<17x17xf32> -> vector<17x17xf32>
    "tpu.trace_stop"() : () -> ()
    %cst_31 = arith.constant 0.353553385 : f32
    %65 = vector.broadcast %cst_31 : f32 to vector<17x17xf32>
    %66 = arith.mulf %64, %65 : vector<17x17xf32>
    %cst_32 = arith.constant dense<0xFF800000> : vector<17xf32>
    %67 = vector.multi_reduction <maximumf>, %66, %cst_32 [1] : vector<17x17xf32> to vector<17xf32>
    %68 = vector.shape_cast %67 : vector<17xf32> to vector<17x1xf32>
    %69 = vector.broadcast %68 : vector<17x1xf32> to vector<17x17xf32>
    %70 = arith.subf %66, %69 : vector<17x17xf32>
    %71 = math.exp %70 : vector<17x17xf32>
    %cst_33 = arith.constant dense<0.000000e+00> : vector<17xf32>
    %72 = vector.multi_reduction <add>, %71, %cst_33 [1] : vector<17x17xf32> to vector<17xf32>
    %73 = vector.shape_cast %72 : vector<17xf32> to vector<17x1xf32>
    %74 = tpu.reciprocal %73 {approx = true} : vector<17x1xf32> -> vector<17x1xf32>
    %75 = vector.broadcast %74 : vector<17x1xf32> to vector<17x17xf32>
    %76 = arith.mulf %71, %75 : vector<17x17xf32>
    %cst_34 = arith.constant dense<0.000000e+00> : vector<17x8xf32>
    %77 = tpu.matmul %76, %63, %cst_34 {dimension_numbers = #tpu.dot_dimension_numbers<[1], [0], [0], [1], [0, 0, 1, 1], [], []>} : vector<17x17xf32>, vector<17x8xf32>, vector<17x8xf32> -> vector<17x8xf32>
    %78 = vector.extract_strided_slice %43 {offsets = [0, 16], sizes = [17, 8], strides = [1, 1]} : vector<17x96xf32> to vector<17x8xf32>
    %79 = vector.extract_strided_slice %43 {offsets = [0, 48], sizes = [17, 8], strides = [1, 1]} : vector<17x96xf32> to vector<17x8xf32>
    %80 = vector.extract_strided_slice %43 {offsets = [0, 80], sizes = [17, 8], strides = [1, 1]} : vector<17x96xf32> to vector<17x8xf32>
    "tpu.trace_start"() <{level = 10 : i32, message = "qd,kd->qk"}> : () -> ()
    %cst_35 = arith.constant dense<0.000000e+00> : vector<17x17xf32>
    %81 = tpu.matmul %78, %79, %cst_35 {dimension_numbers = #tpu.dot_dimension_numbers<[1], [1], [0], [0], [0, 0, 1, 0], [], []>} : vector<17x8xf32>, vector<17x8xf32>, vector<17x17xf32> -> vector<17x17xf32>
    "tpu.trace_stop"() : () -> ()
    %cst_36 = arith.constant 0.353553385 : f32
    %82 = vector.broadcast %cst_36 : f32 to vector<17x17xf32>
    %83 = arith.mulf %81, %82 : vector<17x17xf32>
    %cst_37 = arith.constant dense<0xFF800000> : vector<17xf32>
    %84 = vector.multi_reduction <maximumf>, %83, %cst_37 [1] : vector<17x17xf32> to vector<17xf32>
    %85 = vector.shape_cast %84 : vector<17xf32> to vector<17x1xf32>
    %86 = vector.broadcast %85 : vector<17x1xf32> to vector<17x17xf32>
    %87 = arith.subf %83, %86 : vector<17x17xf32>
    %88 = math.exp %87 : vector<17x17xf32>
    %cst_38 = arith.constant dense<0.000000e+00> : vector<17xf32>
    %89 = vector.multi_reduction <add>, %88, %cst_38 [1] : vector<17x17xf32> to vector<17xf32>
    %90 = vector.shape_cast %89 : vector<17xf32> to vector<17x1xf32>
    %91 = tpu.reciprocal %90 {approx = true} : vector<17x1xf32> -> vector<17x1xf32>
    %92 = vector.broadcast %91 : vector<17x1xf32> to vector<17x17xf32>
    %93 = arith.mulf %88, %92 : vector<17x17xf32>
    %cst_39 = arith.constant dense<0.000000e+00> : vector<17x8xf32>
    %94 = tpu.matmul %93, %80, %cst_39 {dimension_numbers = #tpu.dot_dimension_numbers<[1], [0], [0], [1], [0, 0, 1, 1], [], []>} : vector<17x17xf32>, vector<17x8xf32>, vector<17x8xf32> -> vector<17x8xf32>
    %95 = vector.extract_strided_slice %43 {offsets = [0, 24], sizes = [17, 8], strides = [1, 1]} : vector<17x96xf32> to vector<17x8xf32>
    %96 = vector.extract_strided_slice %43 {offsets = [0, 56], sizes = [17, 8], strides = [1, 1]} : vector<17x96xf32> to vector<17x8xf32>
    %97 = vector.extract_strided_slice %43 {offsets = [0, 88], sizes = [17, 8], strides = [1, 1]} : vector<17x96xf32> to vector<17x8xf32>
    "tpu.trace_start"() <{level = 10 : i32, message = "qd,kd->qk"}> : () -> ()
    %cst_40 = arith.constant dense<0.000000e+00> : vector<17x17xf32>
    %98 = tpu.matmul %95, %96, %cst_40 {dimension_numbers = #tpu.dot_dimension_numbers<[1], [1], [0], [0], [0, 0, 1, 0], [], []>} : vector<17x8xf32>, vector<17x8xf32>, vector<17x17xf32> -> vector<17x17xf32>
    "tpu.trace_stop"() : () -> ()
    %cst_41 = arith.constant 0.353553385 : f32
    %99 = vector.broadcast %cst_41 : f32 to vector<17x17xf32>
    %100 = arith.mulf %98, %99 : vector<17x17xf32>
    %cst_42 = arith.constant dense<0xFF800000> : vector<17xf32>
    %101 = vector.multi_reduction <maximumf>, %100, %cst_42 [1] : vector<17x17xf32> to vector<17xf32>
    %102 = vector.shape_cast %101 : vector<17xf32> to vector<17x1xf32>
    %103 = vector.broadcast %102 : vector<17x1xf32> to vector<17x17xf32>
    %104 = arith.subf %100, %103 : vector<17x17xf32>
    %105 = math.exp %104 : vector<17x17xf32>
    %cst_43 = arith.constant dense<0.000000e+00> : vector<17xf32>
    %106 = vector.multi_reduction <add>, %105, %cst_43 [1] : vector<17x17xf32> to vector<17xf32>
    %107 = vector.shape_cast %106 : vector<17xf32> to vector<17x1xf32>
    %108 = tpu.reciprocal %107 {approx = true} : vector<17x1xf32> -> vector<17x1xf32>
    %109 = vector.broadcast %108 : vector<17x1xf32> to vector<17x17xf32>
    %110 = arith.mulf %105, %109 : vector<17x17xf32>
    %cst_44 = arith.constant dense<0.000000e+00> : vector<17x8xf32>
    %111 = tpu.matmul %110, %97, %cst_44 {dimension_numbers = #tpu.dot_dimension_numbers<[1], [0], [0], [1], [0, 0, 1, 1], [], []>} : vector<17x17xf32>, vector<17x8xf32>, vector<17x8xf32> -> vector<17x8xf32>
    %112 = tpu.concatenate %60, %77, %94, %111 in 1 : vector<17x8xf32>, vector<17x8xf32>, vector<17x8xf32>, vector<17x8xf32> -> vector<17x32xf32>
    %113 = arith.truncf %112 : vector<17x32xf32> to vector<17x32xbf16>
    %c0_45 = arith.constant 0 : index
    %c0_46 = arith.constant 0 : index
    %c0_47 = arith.constant 0 : index
    %114 = vector.load %arg8[%c0_45, %c0_46, %c0_47] : memref<2x32x32xf32, #tpu.memory_space<vmem>>, vector<1x32x32xf32>
    %115 = vector.shape_cast %114 : vector<1x32x32xf32> to vector<32x32xf32>
    %116 = arith.truncf %115 : vector<32x32xf32> to vector<32x32xbf16>
    %cst_48 = arith.constant dense<0.000000e+00> : vector<17x32xf32>
    %117 = tpu.matmul %113, %116, %cst_48 {dimension_numbers = #tpu.dot_dimension_numbers<[1], [0], [0], [1], [0, 0, 1, 1], [], []>} : vector<17x32xbf16>, vector<32x32xbf16>, vector<17x32xf32> -> vector<17x32xf32>
    %c0_49 = arith.constant 0 : index
    %c0_50 = arith.constant 0 : index
    %c0_51 = arith.constant 0 : index
    %118 = vector.load %arg9[%c0_49, %c0_50, %c0_51] : memref<2x1x32xf32, #tpu.memory_space<vmem>>, vector<1x1x32xf32>
    %119 = vector.shape_cast %118 : vector<1x1x32xf32> to vector<1x32xf32>
    %120 = vector.broadcast %119 : vector<1x32xf32> to vector<17x32xf32>
    %121 = arith.addf %117, %120 : vector<17x32xf32>
    %122 = arith.addf %8, %121 : vector<17x32xf32>
    %c0_52 = arith.constant 0 : index
    %c0_53 = arith.constant 0 : index
    %c0_54 = arith.constant 0 : index
    %123 = vector.load %arg10[%c0_52, %c0_53, %c0_54] : memref<2x1x32xf32, #tpu.memory_space<vmem>>, vector<1x1x32xf32>
    %124 = vector.shape_cast %123 : vector<1x1x32xf32> to vector<1x32xf32>
    %c0_55 = arith.constant 0 : index
    %c0_56 = arith.constant 0 : index
    %c0_57 = arith.constant 0 : index
    %125 = vector.load %arg11[%c0_55, %c0_56, %c0_57] : memref<2x1x32xf32, #tpu.memory_space<vmem>>, vector<1x1x32xf32>
    %126 = vector.shape_cast %125 : vector<1x1x32xf32> to vector<1x32xf32>
    %cst_58 = arith.constant dense<0.000000e+00> : vector<17xf32>
    %127 = vector.multi_reduction <add>, %122, %cst_58 [1] : vector<17x32xf32> to vector<17xf32>
    %128 = vector.shape_cast %127 : vector<17xf32> to vector<17x1xf32>
    %cst_59 = arith.constant 3.200000e+01 : f32
    %129 = vector.broadcast %cst_59 : f32 to vector<17x1xf32>
    %130 = arith.divf %128, %129 : vector<17x1xf32>
    %131 = vector.broadcast %130 : vector<17x1xf32> to vector<17x32xf32>
    %132 = arith.subf %122, %131 : vector<17x32xf32>
    %133 = arith.mulf %132, %132 : vector<17x32xf32>
    %cst_60 = arith.constant dense<0.000000e+00> : vector<17xf32>
    %134 = vector.multi_reduction <add>, %133, %cst_60 [1] : vector<17x32xf32> to vector<17xf32>
    %135 = vector.shape_cast %134 : vector<17xf32> to vector<17x1xf32>
    %cst_61 = arith.constant 3.200000e+01 : f32
    %136 = vector.broadcast %cst_61 : f32 to vector<17x1xf32>
    %137 = arith.divf %135, %136 : vector<17x1xf32>
    %138 = vector.broadcast %130 : vector<17x1xf32> to vector<17x32xf32>
    %139 = arith.subf %122, %138 : vector<17x32xf32>
    %cst_62 = arith.constant 9.99999974E-6 : f32
    %140 = vector.broadcast %cst_62 : f32 to vector<17x1xf32>
    %141 = arith.addf %137, %140 : vector<17x1xf32>
    %142 = math.rsqrt %141 : vector<17x1xf32>
    %143 = vector.broadcast %142 : vector<17x1xf32> to vector<17x32xf32>
    %144 = arith.mulf %139, %143 : vector<17x32xf32>
    %145 = vector.broadcast %124 : vector<1x32xf32> to vector<17x32xf32>
    %146 = arith.mulf %144, %145 : vector<17x32xf32>
    %147 = vector.broadcast %126 : vector<1x32xf32> to vector<17x32xf32>
    %148 = arith.addf %146, %147 : vector<17x32xf32>
    %149 = arith.truncf %148 : vector<17x32xf32> to vector<17x32xbf16>
    %c0_63 = arith.constant 0 : index
    %c0_64 = arith.constant 0 : index
    %c0_65 = arith.constant 0 : index
    %150 = vector.load %arg12[%c0_63, %c0_64, %c0_65] : memref<2x32x64xf32, #tpu.memory_space<vmem>>, vector<1x32x64xf32>
    %151 = vector.shape_cast %150 : vector<1x32x64xf32> to vector<32x64xf32>
    %152 = arith.truncf %151 : vector<32x64xf32> to vector<32x64xbf16>
    %cst_66 = arith.constant dense<0.000000e+00> : vector<17x64xf32>
    %153 = tpu.matmul %149, %152, %cst_66 {dimension_numbers = #tpu.dot_dimension_numbers<[1], [0], [0], [1], [0, 0, 1, 1], [], []>} : vector<17x32xbf16>, vector<32x64xbf16>, vector<17x64xf32> -> vector<17x64xf32>
    %c0_67 = arith.constant 0 : index
    %c0_68 = arith.constant 0 : index
    %c0_69 = arith.constant 0 : index
    %154 = vector.load %arg13[%c0_67, %c0_68, %c0_69] : memref<2x1x64xf32, #tpu.memory_space<vmem>>, vector<1x1x64xf32>
    %155 = vector.shape_cast %154 : vector<1x1x64xf32> to vector<1x64xf32>
    %156 = vector.broadcast %155 : vector<1x64xf32> to vector<17x64xf32>
    %157 = arith.addf %153, %156 : vector<17x64xf32>
    %cst_70 = arith.constant 5.000000e-01 : f32
    %158 = vector.broadcast %cst_70 : f32 to vector<17x64xf32>
    %159 = arith.mulf %158, %157 : vector<17x64xf32>
    %cst_71 = arith.constant 0.707106769 : f32
    %160 = vector.broadcast %cst_71 : f32 to vector<17x64xf32>
    %161 = arith.mulf %157, %160 : vector<17x64xf32>
    %162 = math.absf %161 : vector<17x64xf32>
    %cst_72 = arith.constant 0.327591091 : f32
    %163 = vector.broadcast %cst_72 : f32 to vector<17x64xf32>
    %164 = arith.mulf %163, %162 : vector<17x64xf32>
    %cst_73 = arith.constant 1.000000e+00 : f32
    %165 = vector.broadcast %cst_73 : f32 to vector<17x64xf32>
    %166 = arith.addf %165, %164 : vector<17x64xf32>
    %cst_74 = arith.constant 1.000000e+00 : f32
    %167 = vector.broadcast %cst_74 : f32 to vector<17x64xf32>
    %168 = arith.divf %167, %166 : vector<17x64xf32>
    %cst_75 = arith.constant 1.06140542 : f32
    %169 = vector.broadcast %cst_75 : f32 to vector<17x64xf32>
    %170 = arith.mulf %169, %168 : vector<17x64xf32>
    %cst_76 = arith.constant -1.45315206 : f32
    %171 = vector.broadcast %cst_76 : f32 to vector<17x64xf32>
    %172 = arith.addf %170, %171 : vector<17x64xf32>
    %173 = arith.mulf %172, %168 : vector<17x64xf32>
    %cst_77 = arith.constant 1.42141378 : f32
    %174 = vector.broadcast %cst_77 : f32 to vector<17x64xf32>
    %175 = arith.addf %173, %174 : vector<17x64xf32>
    %176 = arith.mulf %175, %168 : vector<17x64xf32>
    %cst_78 = arith.constant -0.284496725 : f32
    %177 = vector.broadcast %cst_78 : f32 to vector<17x64xf32>
    %178 = arith.addf %176, %177 : vector<17x64xf32>
    %179 = arith.mulf %178, %168 : vector<17x64xf32>
    %cst_79 = arith.constant 0.254829586 : f32
    %180 = vector.broadcast %cst_79 : f32 to vector<17x64xf32>
    %181 = arith.addf %179, %180 : vector<17x64xf32>
    %182 = arith.mulf %181, %168 : vector<17x64xf32>
    %cst_80 = arith.constant 0.000000e+00 : f32
    %183 = vector.broadcast %cst_80 : f32 to vector<17x64xf32>
    %184 = arith.subf %183, %162 : vector<17x64xf32>
    %185 = arith.mulf %184, %162 : vector<17x64xf32>
    %186 = math.exp %185 : vector<17x64xf32>
    %187 = arith.mulf %182, %186 : vector<17x64xf32>
    %cst_81 = arith.constant 1.000000e+00 : f32
    %188 = vector.broadcast %cst_81 : f32 to vector<17x64xf32>
    %189 = arith.subf %188, %187 : vector<17x64xf32>
    %cst_82 = arith.constant 0.000000e+00 : f32
    %190 = vector.broadcast %cst_82 : f32 to vector<17x64xf32>
    %191 = arith.cmpf oge, %161, %190 : vector<17x64xf32>
    %cst_83 = arith.constant 0.000000e+00 : f32
    %192 = vector.broadcast %cst_83 : f32 to vector<17x64xf32>
    %193 = arith.subf %192, %189 : vector<17x64xf32>
    %194 = arith.select %191, %189, %193 : vector<17x64xi1>, vector<17x64xf32>
    %cst_84 = arith.constant 1.000000e+00 : f32
    %195 = vector.broadcast %cst_84 : f32 to vector<17x64xf32>
    %196 = arith.addf %195, %194 : vector<17x64xf32>
    %197 = arith.mulf %159, %196 : vector<17x64xf32>
    %198 = arith.truncf %197 : vector<17x64xf32> to vector<17x64xbf16>
    %c0_85 = arith.constant 0 : index
    %c0_86 = arith.constant 0 : index
    %c0_87 = arith.constant 0 : index
    %199 = vector.load %arg14[%c0_85, %c0_86, %c0_87] : memref<2x64x32xf32, #tpu.memory_space<vmem>>, vector<1x64x32xf32>
    %200 = vector.shape_cast %199 : vector<1x64x32xf32> to vector<64x32xf32>
    %201 = arith.truncf %200 : vector<64x32xf32> to vector<64x32xbf16>
    %cst_88 = arith.constant dense<0.000000e+00> : vector<17x32xf32>
    %202 = tpu.matmul %198, %201, %cst_88 {dimension_numbers = #tpu.dot_dimension_numbers<[1], [0], [0], [1], [0, 0, 1, 1], [], []>} : vector<17x64xbf16>, vector<64x32xbf16>, vector<17x32xf32> -> vector<17x32xf32>
    %c0_89 = arith.constant 0 : index
    %c0_90 = arith.constant 0 : index
    %c0_91 = arith.constant 0 : index
    %203 = vector.load %arg15[%c0_89, %c0_90, %c0_91] : memref<2x1x32xf32, #tpu.memory_space<vmem>>, vector<1x1x32xf32>
    %204 = vector.shape_cast %203 : vector<1x1x32xf32> to vector<1x32xf32>
    %205 = vector.broadcast %204 : vector<1x32xf32> to vector<17x32xf32>
    %206 = arith.addf %202, %205 : vector<17x32xf32>
    %207 = arith.addf %122, %206 : vector<17x32xf32>
    %c1 = arith.constant 1 : index
    %c0_92 = arith.constant 0 : index
    %c0_93 = arith.constant 0 : index
    %208 = vector.load %arg4[%c1, %c0_92, %c0_93] : memref<2x1x32xf32, #tpu.memory_space<vmem>>, vector<1x1x32xf32>
    %209 = vector.shape_cast %208 : vector<1x1x32xf32> to vector<1x32xf32>
    %c1_94 = arith.constant 1 : index
    %c0_95 = arith.constant 0 : index
    %c0_96 = arith.constant 0 : index
    %210 = vector.load %arg5[%c1_94, %c0_95, %c0_96] : memref<2x1x32xf32, #tpu.memory_space<vmem>>, vector<1x1x32xf32>
    %211 = vector.shape_cast %210 : vector<1x1x32xf32> to vector<1x32xf32>
    %cst_97 = arith.constant dense<0.000000e+00> : vector<17xf32>
    %212 = vector.multi_reduction <add>, %207, %cst_97 [1] : vector<17x32xf32> to vector<17xf32>
    %213 = vector.shape_cast %212 : vector<17xf32> to vector<17x1xf32>
    %cst_98 = arith.constant 3.200000e+01 : f32
    %214 = vector.broadcast %cst_98 : f32 to vector<17x1xf32>
    %215 = arith.divf %213, %214 : vector<17x1xf32>
    %216 = vector.broadcast %215 : vector<17x1xf32> to vector<17x32xf32>
    %217 = arith.subf %207, %216 : vector<17x32xf32>
    %218 = arith.mulf %217, %217 : vector<17x32xf32>
    %cst_99 = arith.constant dense<0.000000e+00> : vector<17xf32>
    %219 = vector.multi_reduction <add>, %218, %cst_99 [1] : vector<17x32xf32> to vector<17xf32>
    %220 = vector.shape_cast %219 : vector<17xf32> to vector<17x1xf32>
    %cst_100 = arith.constant 3.200000e+01 : f32
    %221 = vector.broadcast %cst_100 : f32 to vector<17x1xf32>
    %222 = arith.divf %220, %221 : vector<17x1xf32>
    %223 = vector.broadcast %215 : vector<17x1xf32> to vector<17x32xf32>
    %224 = arith.subf %207, %223 : vector<17x32xf32>
    %cst_101 = arith.constant 9.99999974E-6 : f32
    %225 = vector.broadcast %cst_101 : f32 to vector<17x1xf32>
    %226 = arith.addf %222, %225 : vector<17x1xf32>
    %227 = math.rsqrt %226 : vector<17x1xf32>
    %228 = vector.broadcast %227 : vector<17x1xf32> to vector<17x32xf32>
    %229 = arith.mulf %224, %228 : vector<17x32xf32>
    %230 = vector.broadcast %209 : vector<1x32xf32> to vector<17x32xf32>
    %231 = arith.mulf %229, %230 : vector<17x32xf32>
    %232 = vector.broadcast %211 : vector<1x32xf32> to vector<17x32xf32>
    %233 = arith.addf %231, %232 : vector<17x32xf32>
    %234 = arith.truncf %233 : vector<17x32xf32> to vector<17x32xbf16>
    %c1_102 = arith.constant 1 : index
    %c0_103 = arith.constant 0 : index
    %c0_104 = arith.constant 0 : index
    %235 = vector.load %arg6[%c1_102, %c0_103, %c0_104] : memref<2x32x96xf32, #tpu.memory_space<vmem>>, vector<1x32x96xf32>
    %236 = vector.shape_cast %235 : vector<1x32x96xf32> to vector<32x96xf32>
    %237 = arith.truncf %236 : vector<32x96xf32> to vector<32x96xbf16>
    %cst_105 = arith.constant dense<0.000000e+00> : vector<17x96xf32>
    %238 = tpu.matmul %234, %237, %cst_105 {dimension_numbers = #tpu.dot_dimension_numbers<[1], [0], [0], [1], [0, 0, 1, 1], [], []>} : vector<17x32xbf16>, vector<32x96xbf16>, vector<17x96xf32> -> vector<17x96xf32>
    %c1_106 = arith.constant 1 : index
    %c0_107 = arith.constant 0 : index
    %c0_108 = arith.constant 0 : index
    %239 = vector.load %arg7[%c1_106, %c0_107, %c0_108] : memref<2x1x96xf32, #tpu.memory_space<vmem>>, vector<1x1x96xf32>
    %240 = vector.shape_cast %239 : vector<1x1x96xf32> to vector<1x96xf32>
    %241 = vector.broadcast %240 : vector<1x96xf32> to vector<17x96xf32>
    %242 = arith.addf %238, %241 : vector<17x96xf32>
    %243 = vector.extract_strided_slice %242 {offsets = [0, 0], sizes = [17, 8], strides = [1, 1]} : vector<17x96xf32> to vector<17x8xf32>
    %244 = vector.extract_strided_slice %242 {offsets = [0, 32], sizes = [17, 8], strides = [1, 1]} : vector<17x96xf32> to vector<17x8xf32>
    %245 = vector.extract_strided_slice %242 {offsets = [0, 64], sizes = [17, 8], strides = [1, 1]} : vector<17x96xf32> to vector<17x8xf32>
    "tpu.trace_start"() <{level = 10 : i32, message = "qd,kd->qk"}> : () -> ()
    %cst_109 = arith.constant dense<0.000000e+00> : vector<17x17xf32>
    %246 = tpu.matmul %243, %244, %cst_109 {dimension_numbers = #tpu.dot_dimension_numbers<[1], [1], [0], [0], [0, 0, 1, 0], [], []>} : vector<17x8xf32>, vector<17x8xf32>, vector<17x17xf32> -> vector<17x17xf32>
    "tpu.trace_stop"() : () -> ()
    %cst_110 = arith.constant 0.353553385 : f32
    %247 = vector.broadcast %cst_110 : f32 to vector<17x17xf32>
    %248 = arith.mulf %246, %247 : vector<17x17xf32>
    %cst_111 = arith.constant dense<0xFF800000> : vector<17xf32>
    %249 = vector.multi_reduction <maximumf>, %248, %cst_111 [1] : vector<17x17xf32> to vector<17xf32>
    %250 = vector.shape_cast %249 : vector<17xf32> to vector<17x1xf32>
    %251 = vector.broadcast %250 : vector<17x1xf32> to vector<17x17xf32>
    %252 = arith.subf %248, %251 : vector<17x17xf32>
    %253 = math.exp %252 : vector<17x17xf32>
    %cst_112 = arith.constant dense<0.000000e+00> : vector<17xf32>
    %254 = vector.multi_reduction <add>, %253, %cst_112 [1] : vector<17x17xf32> to vector<17xf32>
    %255 = vector.shape_cast %254 : vector<17xf32> to vector<17x1xf32>
    %256 = tpu.reciprocal %255 {approx = true} : vector<17x1xf32> -> vector<17x1xf32>
    %257 = vector.broadcast %256 : vector<17x1xf32> to vector<17x17xf32>
    %258 = arith.mulf %253, %257 : vector<17x17xf32>
    %cst_113 = arith.constant dense<0.000000e+00> : vector<17x8xf32>
    %259 = tpu.matmul %258, %245, %cst_113 {dimension_numbers = #tpu.dot_dimension_numbers<[1], [0], [0], [1], [0, 0, 1, 1], [], []>} : vector<17x17xf32>, vector<17x8xf32>, vector<17x8xf32> -> vector<17x8xf32>
    %260 = vector.extract_strided_slice %242 {offsets = [0, 8], sizes = [17, 8], strides = [1, 1]} : vector<17x96xf32> to vector<17x8xf32>
    %261 = vector.extract_strided_slice %242 {offsets = [0, 40], sizes = [17, 8], strides = [1, 1]} : vector<17x96xf32> to vector<17x8xf32>
    %262 = vector.extract_strided_slice %242 {offsets = [0, 72], sizes = [17, 8], strides = [1, 1]} : vector<17x96xf32> to vector<17x8xf32>
    "tpu.trace_start"() <{level = 10 : i32, message = "qd,kd->qk"}> : () -> ()
    %cst_114 = arith.constant dense<0.000000e+00> : vector<17x17xf32>
    %263 = tpu.matmul %260, %261, %cst_114 {dimension_numbers = #tpu.dot_dimension_numbers<[1], [1], [0], [0], [0, 0, 1, 0], [], []>} : vector<17x8xf32>, vector<17x8xf32>, vector<17x17xf32> -> vector<17x17xf32>
    "tpu.trace_stop"() : () -> ()
    %cst_115 = arith.constant 0.353553385 : f32
    %264 = vector.broadcast %cst_115 : f32 to vector<17x17xf32>
    %265 = arith.mulf %263, %264 : vector<17x17xf32>
    %cst_116 = arith.constant dense<0xFF800000> : vector<17xf32>
    %266 = vector.multi_reduction <maximumf>, %265, %cst_116 [1] : vector<17x17xf32> to vector<17xf32>
    %267 = vector.shape_cast %266 : vector<17xf32> to vector<17x1xf32>
    %268 = vector.broadcast %267 : vector<17x1xf32> to vector<17x17xf32>
    %269 = arith.subf %265, %268 : vector<17x17xf32>
    %270 = math.exp %269 : vector<17x17xf32>
    %cst_117 = arith.constant dense<0.000000e+00> : vector<17xf32>
    %271 = vector.multi_reduction <add>, %270, %cst_117 [1] : vector<17x17xf32> to vector<17xf32>
    %272 = vector.shape_cast %271 : vector<17xf32> to vector<17x1xf32>
    %273 = tpu.reciprocal %272 {approx = true} : vector<17x1xf32> -> vector<17x1xf32>
    %274 = vector.broadcast %273 : vector<17x1xf32> to vector<17x17xf32>
    %275 = arith.mulf %270, %274 : vector<17x17xf32>
    %cst_118 = arith.constant dense<0.000000e+00> : vector<17x8xf32>
    %276 = tpu.matmul %275, %262, %cst_118 {dimension_numbers = #tpu.dot_dimension_numbers<[1], [0], [0], [1], [0, 0, 1, 1], [], []>} : vector<17x17xf32>, vector<17x8xf32>, vector<17x8xf32> -> vector<17x8xf32>
    %277 = vector.extract_strided_slice %242 {offsets = [0, 16], sizes = [17, 8], strides = [1, 1]} : vector<17x96xf32> to vector<17x8xf32>
    %278 = vector.extract_strided_slice %242 {offsets = [0, 48], sizes = [17, 8], strides = [1, 1]} : vector<17x96xf32> to vector<17x8xf32>
    %279 = vector.extract_strided_slice %242 {offsets = [0, 80], sizes = [17, 8], strides = [1, 1]} : vector<17x96xf32> to vector<17x8xf32>
    "tpu.trace_start"() <{level = 10 : i32, message = "qd,kd->qk"}> : () -> ()
    %cst_119 = arith.constant dense<0.000000e+00> : vector<17x17xf32>
    %280 = tpu.matmul %277, %278, %cst_119 {dimension_numbers = #tpu.dot_dimension_numbers<[1], [1], [0], [0], [0, 0, 1, 0], [], []>} : vector<17x8xf32>, vector<17x8xf32>, vector<17x17xf32> -> vector<17x17xf32>
    "tpu.trace_stop"() : () -> ()
    %cst_120 = arith.constant 0.353553385 : f32
    %281 = vector.broadcast %cst_120 : f32 to vector<17x17xf32>
    %282 = arith.mulf %280, %281 : vector<17x17xf32>
    %cst_121 = arith.constant dense<0xFF800000> : vector<17xf32>
    %283 = vector.multi_reduction <maximumf>, %282, %cst_121 [1] : vector<17x17xf32> to vector<17xf32>
    %284 = vector.shape_cast %283 : vector<17xf32> to vector<17x1xf32>
    %285 = vector.broadcast %284 : vector<17x1xf32> to vector<17x17xf32>
    %286 = arith.subf %282, %285 : vector<17x17xf32>
    %287 = math.exp %286 : vector<17x17xf32>
    %cst_122 = arith.constant dense<0.000000e+00> : vector<17xf32>
    %288 = vector.multi_reduction <add>, %287, %cst_122 [1] : vector<17x17xf32> to vector<17xf32>
    %289 = vector.shape_cast %288 : vector<17xf32> to vector<17x1xf32>
    %290 = tpu.reciprocal %289 {approx = true} : vector<17x1xf32> -> vector<17x1xf32>
    %291 = vector.broadcast %290 : vector<17x1xf32> to vector<17x17xf32>
    %292 = arith.mulf %287, %291 : vector<17x17xf32>
    %cst_123 = arith.constant dense<0.000000e+00> : vector<17x8xf32>
    %293 = tpu.matmul %292, %279, %cst_123 {dimension_numbers = #tpu.dot_dimension_numbers<[1], [0], [0], [1], [0, 0, 1, 1], [], []>} : vector<17x17xf32>, vector<17x8xf32>, vector<17x8xf32> -> vector<17x8xf32>
    %294 = vector.extract_strided_slice %242 {offsets = [0, 24], sizes = [17, 8], strides = [1, 1]} : vector<17x96xf32> to vector<17x8xf32>
    %295 = vector.extract_strided_slice %242 {offsets = [0, 56], sizes = [17, 8], strides = [1, 1]} : vector<17x96xf32> to vector<17x8xf32>
    %296 = vector.extract_strided_slice %242 {offsets = [0, 88], sizes = [17, 8], strides = [1, 1]} : vector<17x96xf32> to vector<17x8xf32>
    "tpu.trace_start"() <{level = 10 : i32, message = "qd,kd->qk"}> : () -> ()
    %cst_124 = arith.constant dense<0.000000e+00> : vector<17x17xf32>
    %297 = tpu.matmul %294, %295, %cst_124 {dimension_numbers = #tpu.dot_dimension_numbers<[1], [1], [0], [0], [0, 0, 1, 0], [], []>} : vector<17x8xf32>, vector<17x8xf32>, vector<17x17xf32> -> vector<17x17xf32>
    "tpu.trace_stop"() : () -> ()
    %cst_125 = arith.constant 0.353553385 : f32
    %298 = vector.broadcast %cst_125 : f32 to vector<17x17xf32>
    %299 = arith.mulf %297, %298 : vector<17x17xf32>
    %cst_126 = arith.constant dense<0xFF800000> : vector<17xf32>
    %300 = vector.multi_reduction <maximumf>, %299, %cst_126 [1] : vector<17x17xf32> to vector<17xf32>
    %301 = vector.shape_cast %300 : vector<17xf32> to vector<17x1xf32>
    %302 = vector.broadcast %301 : vector<17x1xf32> to vector<17x17xf32>
    %303 = arith.subf %299, %302 : vector<17x17xf32>
    %304 = math.exp %303 : vector<17x17xf32>
    %cst_127 = arith.constant dense<0.000000e+00> : vector<17xf32>
    %305 = vector.multi_reduction <add>, %304, %cst_127 [1] : vector<17x17xf32> to vector<17xf32>
    %306 = vector.shape_cast %305 : vector<17xf32> to vector<17x1xf32>
    %307 = tpu.reciprocal %306 {approx = true} : vector<17x1xf32> -> vector<17x1xf32>
    %308 = vector.broadcast %307 : vector<17x1xf32> to vector<17x17xf32>
    %309 = arith.mulf %304, %308 : vector<17x17xf32>
    %cst_128 = arith.constant dense<0.000000e+00> : vector<17x8xf32>
    %310 = tpu.matmul %309, %296, %cst_128 {dimension_numbers = #tpu.dot_dimension_numbers<[1], [0], [0], [1], [0, 0, 1, 1], [], []>} : vector<17x17xf32>, vector<17x8xf32>, vector<17x8xf32> -> vector<17x8xf32>
    %311 = tpu.concatenate %259, %276, %293, %310 in 1 : vector<17x8xf32>, vector<17x8xf32>, vector<17x8xf32>, vector<17x8xf32> -> vector<17x32xf32>
    %312 = arith.truncf %311 : vector<17x32xf32> to vector<17x32xbf16>
    %c1_129 = arith.constant 1 : index
    %c0_130 = arith.constant 0 : index
    %c0_131 = arith.constant 0 : index
    %313 = vector.load %arg8[%c1_129, %c0_130, %c0_131] : memref<2x32x32xf32, #tpu.memory_space<vmem>>, vector<1x32x32xf32>
    %314 = vector.shape_cast %313 : vector<1x32x32xf32> to vector<32x32xf32>
    %315 = arith.truncf %314 : vector<32x32xf32> to vector<32x32xbf16>
    %cst_132 = arith.constant dense<0.000000e+00> : vector<17x32xf32>
    %316 = tpu.matmul %312, %315, %cst_132 {dimension_numbers = #tpu.dot_dimension_numbers<[1], [0], [0], [1], [0, 0, 1, 1], [], []>} : vector<17x32xbf16>, vector<32x32xbf16>, vector<17x32xf32> -> vector<17x32xf32>
    %c1_133 = arith.constant 1 : index
    %c0_134 = arith.constant 0 : index
    %c0_135 = arith.constant 0 : index
    %317 = vector.load %arg9[%c1_133, %c0_134, %c0_135] : memref<2x1x32xf32, #tpu.memory_space<vmem>>, vector<1x1x32xf32>
    %318 = vector.shape_cast %317 : vector<1x1x32xf32> to vector<1x32xf32>
    %319 = vector.broadcast %318 : vector<1x32xf32> to vector<17x32xf32>
    %320 = arith.addf %316, %319 : vector<17x32xf32>
    %321 = arith.addf %207, %320 : vector<17x32xf32>
    %c1_136 = arith.constant 1 : index
    %c0_137 = arith.constant 0 : index
    %c0_138 = arith.constant 0 : index
    %322 = vector.load %arg10[%c1_136, %c0_137, %c0_138] : memref<2x1x32xf32, #tpu.memory_space<vmem>>, vector<1x1x32xf32>
    %323 = vector.shape_cast %322 : vector<1x1x32xf32> to vector<1x32xf32>
    %c1_139 = arith.constant 1 : index
    %c0_140 = arith.constant 0 : index
    %c0_141 = arith.constant 0 : index
    %324 = vector.load %arg11[%c1_139, %c0_140, %c0_141] : memref<2x1x32xf32, #tpu.memory_space<vmem>>, vector<1x1x32xf32>
    %325 = vector.shape_cast %324 : vector<1x1x32xf32> to vector<1x32xf32>
    %cst_142 = arith.constant dense<0.000000e+00> : vector<17xf32>
    %326 = vector.multi_reduction <add>, %321, %cst_142 [1] : vector<17x32xf32> to vector<17xf32>
    %327 = vector.shape_cast %326 : vector<17xf32> to vector<17x1xf32>
    %cst_143 = arith.constant 3.200000e+01 : f32
    %328 = vector.broadcast %cst_143 : f32 to vector<17x1xf32>
    %329 = arith.divf %327, %328 : vector<17x1xf32>
    %330 = vector.broadcast %329 : vector<17x1xf32> to vector<17x32xf32>
    %331 = arith.subf %321, %330 : vector<17x32xf32>
    %332 = arith.mulf %331, %331 : vector<17x32xf32>
    %cst_144 = arith.constant dense<0.000000e+00> : vector<17xf32>
    %333 = vector.multi_reduction <add>, %332, %cst_144 [1] : vector<17x32xf32> to vector<17xf32>
    %334 = vector.shape_cast %333 : vector<17xf32> to vector<17x1xf32>
    %cst_145 = arith.constant 3.200000e+01 : f32
    %335 = vector.broadcast %cst_145 : f32 to vector<17x1xf32>
    %336 = arith.divf %334, %335 : vector<17x1xf32>
    %337 = vector.broadcast %329 : vector<17x1xf32> to vector<17x32xf32>
    %338 = arith.subf %321, %337 : vector<17x32xf32>
    %cst_146 = arith.constant 9.99999974E-6 : f32
    %339 = vector.broadcast %cst_146 : f32 to vector<17x1xf32>
    %340 = arith.addf %336, %339 : vector<17x1xf32>
    %341 = math.rsqrt %340 : vector<17x1xf32>
    %342 = vector.broadcast %341 : vector<17x1xf32> to vector<17x32xf32>
    %343 = arith.mulf %338, %342 : vector<17x32xf32>
    %344 = vector.broadcast %323 : vector<1x32xf32> to vector<17x32xf32>
    %345 = arith.mulf %343, %344 : vector<17x32xf32>
    %346 = vector.broadcast %325 : vector<1x32xf32> to vector<17x32xf32>
    %347 = arith.addf %345, %346 : vector<17x32xf32>
    %348 = arith.truncf %347 : vector<17x32xf32> to vector<17x32xbf16>
    %c1_147 = arith.constant 1 : index
    %c0_148 = arith.constant 0 : index
    %c0_149 = arith.constant 0 : index
    %349 = vector.load %arg12[%c1_147, %c0_148, %c0_149] : memref<2x32x64xf32, #tpu.memory_space<vmem>>, vector<1x32x64xf32>
    %350 = vector.shape_cast %349 : vector<1x32x64xf32> to vector<32x64xf32>
    %351 = arith.truncf %350 : vector<32x64xf32> to vector<32x64xbf16>
    %cst_150 = arith.constant dense<0.000000e+00> : vector<17x64xf32>
    %352 = tpu.matmul %348, %351, %cst_150 {dimension_numbers = #tpu.dot_dimension_numbers<[1], [0], [0], [1], [0, 0, 1, 1], [], []>} : vector<17x32xbf16>, vector<32x64xbf16>, vector<17x64xf32> -> vector<17x64xf32>
    %c1_151 = arith.constant 1 : index
    %c0_152 = arith.constant 0 : index
    %c0_153 = arith.constant 0 : index
    %353 = vector.load %arg13[%c1_151, %c0_152, %c0_153] : memref<2x1x64xf32, #tpu.memory_space<vmem>>, vector<1x1x64xf32>
    %354 = vector.shape_cast %353 : vector<1x1x64xf32> to vector<1x64xf32>
    %355 = vector.broadcast %354 : vector<1x64xf32> to vector<17x64xf32>
    %356 = arith.addf %352, %355 : vector<17x64xf32>
    %cst_154 = arith.constant 5.000000e-01 : f32
    %357 = vector.broadcast %cst_154 : f32 to vector<17x64xf32>
    %358 = arith.mulf %357, %356 : vector<17x64xf32>
    %cst_155 = arith.constant 0.707106769 : f32
    %359 = vector.broadcast %cst_155 : f32 to vector<17x64xf32>
    %360 = arith.mulf %356, %359 : vector<17x64xf32>
    %361 = math.absf %360 : vector<17x64xf32>
    %cst_156 = arith.constant 0.327591091 : f32
    %362 = vector.broadcast %cst_156 : f32 to vector<17x64xf32>
    %363 = arith.mulf %362, %361 : vector<17x64xf32>
    %cst_157 = arith.constant 1.000000e+00 : f32
    %364 = vector.broadcast %cst_157 : f32 to vector<17x64xf32>
    %365 = arith.addf %364, %363 : vector<17x64xf32>
    %cst_158 = arith.constant 1.000000e+00 : f32
    %366 = vector.broadcast %cst_158 : f32 to vector<17x64xf32>
    %367 = arith.divf %366, %365 : vector<17x64xf32>
    %cst_159 = arith.constant 1.06140542 : f32
    %368 = vector.broadcast %cst_159 : f32 to vector<17x64xf32>
    %369 = arith.mulf %368, %367 : vector<17x64xf32>
    %cst_160 = arith.constant -1.45315206 : f32
    %370 = vector.broadcast %cst_160 : f32 to vector<17x64xf32>
    %371 = arith.addf %369, %370 : vector<17x64xf32>
    %372 = arith.mulf %371, %367 : vector<17x64xf32>
    %cst_161 = arith.constant 1.42141378 : f32
    %373 = vector.broadcast %cst_161 : f32 to vector<17x64xf32>
    %374 = arith.addf %372, %373 : vector<17x64xf32>
    %375 = arith.mulf %374, %367 : vector<17x64xf32>
    %cst_162 = arith.constant -0.284496725 : f32
    %376 = vector.broadcast %cst_162 : f32 to vector<17x64xf32>
    %377 = arith.addf %375, %376 : vector<17x64xf32>
    %378 = arith.mulf %377, %367 : vector<17x64xf32>
    %cst_163 = arith.constant 0.254829586 : f32
    %379 = vector.broadcast %cst_163 : f32 to vector<17x64xf32>
    %380 = arith.addf %378, %379 : vector<17x64xf32>
    %381 = arith.mulf %380, %367 : vector<17x64xf32>
    %cst_164 = arith.constant 0.000000e+00 : f32
    %382 = vector.broadcast %cst_164 : f32 to vector<17x64xf32>
    %383 = arith.subf %382, %361 : vector<17x64xf32>
    %384 = arith.mulf %383, %361 : vector<17x64xf32>
    %385 = math.exp %384 : vector<17x64xf32>
    %386 = arith.mulf %381, %385 : vector<17x64xf32>
    %cst_165 = arith.constant 1.000000e+00 : f32
    %387 = vector.broadcast %cst_165 : f32 to vector<17x64xf32>
    %388 = arith.subf %387, %386 : vector<17x64xf32>
    %cst_166 = arith.constant 0.000000e+00 : f32
    %389 = vector.broadcast %cst_166 : f32 to vector<17x64xf32>
    %390 = arith.cmpf oge, %360, %389 : vector<17x64xf32>
    %cst_167 = arith.constant 0.000000e+00 : f32
    %391 = vector.broadcast %cst_167 : f32 to vector<17x64xf32>
    %392 = arith.subf %391, %388 : vector<17x64xf32>
    %393 = arith.select %390, %388, %392 : vector<17x64xi1>, vector<17x64xf32>
    %cst_168 = arith.constant 1.000000e+00 : f32
    %394 = vector.broadcast %cst_168 : f32 to vector<17x64xf32>
    %395 = arith.addf %394, %393 : vector<17x64xf32>
    %396 = arith.mulf %358, %395 : vector<17x64xf32>
    %397 = arith.truncf %396 : vector<17x64xf32> to vector<17x64xbf16>
    %c1_169 = arith.constant 1 : index
    %c0_170 = arith.constant 0 : index
    %c0_171 = arith.constant 0 : index
    %398 = vector.load %arg14[%c1_169, %c0_170, %c0_171] : memref<2x64x32xf32, #tpu.memory_space<vmem>>, vector<1x64x32xf32>
    %399 = vector.shape_cast %398 : vector<1x64x32xf32> to vector<64x32xf32>
    %400 = arith.truncf %399 : vector<64x32xf32> to vector<64x32xbf16>
    %cst_172 = arith.constant dense<0.000000e+00> : vector<17x32xf32>
    %401 = tpu.matmul %397, %400, %cst_172 {dimension_numbers = #tpu.dot_dimension_numbers<[1], [0], [0], [1], [0, 0, 1, 1], [], []>} : vector<17x64xbf16>, vector<64x32xbf16>, vector<17x32xf32> -> vector<17x32xf32>
    %c1_173 = arith.constant 1 : index
    %c0_174 = arith.constant 0 : index
    %c0_175 = arith.constant 0 : index
    %402 = vector.load %arg15[%c1_173, %c0_174, %c0_175] : memref<2x1x32xf32, #tpu.memory_space<vmem>>, vector<1x1x32xf32>
    %403 = vector.shape_cast %402 : vector<1x1x32xf32> to vector<1x32xf32>
    %404 = vector.broadcast %403 : vector<1x32xf32> to vector<17x32xf32>
    %405 = arith.addf %401, %404 : vector<17x32xf32>
    %406 = arith.addf %321, %405 : vector<17x32xf32>
    %407 = vector.extract_strided_slice %406 {offsets = [0, 0], sizes = [1, 32], strides = [1, 1]} : vector<17x32xf32> to vector<1x32xf32>
    %c0_176 = arith.constant 0 : index
    %c0_177 = arith.constant 0 : index
    %408 = vector.load %arg16[%c0_176, %c0_177] : memref<1x32xf32, #tpu.memory_space<vmem>>, vector<1x32xf32>
    %c0_178 = arith.constant 0 : index
    %c0_179 = arith.constant 0 : index
    %409 = vector.load %arg17[%c0_178, %c0_179] : memref<1x32xf32, #tpu.memory_space<vmem>>, vector<1x32xf32>
    %cst_180 = arith.constant dense<0.000000e+00> : vector<1xf32>
    %410 = vector.multi_reduction <add>, %407, %cst_180 [1] : vector<1x32xf32> to vector<1xf32>
    %411 = vector.shape_cast %410 : vector<1xf32> to vector<1x1xf32>
    %cst_181 = arith.constant 3.200000e+01 : f32
    %412 = vector.broadcast %cst_181 : f32 to vector<1x1xf32>
    %413 = arith.divf %411, %412 : vector<1x1xf32>
    %414 = vector.broadcast %413 : vector<1x1xf32> to vector<1x32xf32>
    %415 = arith.subf %407, %414 : vector<1x32xf32>
    %416 = arith.mulf %415, %415 : vector<1x32xf32>
    %cst_182 = arith.constant dense<0.000000e+00> : vector<1xf32>
    %417 = vector.multi_reduction <add>, %416, %cst_182 [1] : vector<1x32xf32> to vector<1xf32>
    %418 = vector.shape_cast %417 : vector<1xf32> to vector<1x1xf32>
    %cst_183 = arith.constant 3.200000e+01 : f32
    %419 = vector.broadcast %cst_183 : f32 to vector<1x1xf32>
    %420 = arith.divf %418, %419 : vector<1x1xf32>
    %421 = vector.broadcast %413 : vector<1x1xf32> to vector<1x32xf32>
    %422 = arith.subf %407, %421 : vector<1x32xf32>
    %cst_184 = arith.constant 9.99999974E-6 : f32
    %423 = vector.broadcast %cst_184 : f32 to vector<1x1xf32>
    %424 = arith.addf %420, %423 : vector<1x1xf32>
    %425 = math.rsqrt %424 : vector<1x1xf32>
    %426 = vector.broadcast %425 : vector<1x1xf32> to vector<1x32xf32>
    %427 = arith.mulf %422, %426 : vector<1x32xf32>
    %428 = arith.mulf %427, %408 : vector<1x32xf32>
    %429 = arith.addf %428, %409 : vector<1x32xf32>
    %430 = arith.truncf %429 : vector<1x32xf32> to vector<1x32xbf16>
    %c0_185 = arith.constant 0 : index
    %c0_186 = arith.constant 0 : index
    %431 = vector.load %arg18[%c0_185, %c0_186] : memref<32x32xf32, #tpu.memory_space<vmem>>, vector<32x32xf32>
    %432 = arith.truncf %431 : vector<32x32xf32> to vector<32x32xbf16>
    %cst_187 = arith.constant dense<0.000000e+00> : vector<1x32xf32>
    %433 = tpu.matmul %430, %432, %cst_187 {dimension_numbers = #tpu.dot_dimension_numbers<[1], [0], [0], [1], [0, 0, 1, 1], [], []>} : vector<1x32xbf16>, vector<32x32xbf16>, vector<1x32xf32> -> vector<1x32xf32>
    %c0_188 = arith.constant 0 : index
    %c0_189 = arith.constant 0 : index
    %434 = vector.load %arg19[%c0_188, %c0_189] : memref<1x32xf32, #tpu.memory_space<vmem>>, vector<1x32xf32>
    %435 = arith.addf %433, %434 : vector<1x32xf32>
    %436 = math.tanh %435 : vector<1x32xf32>
    %437 = arith.truncf %436 : vector<1x32xf32> to vector<1x32xbf16>
    %c0_190 = arith.constant 0 : index
    %c0_191 = arith.constant 0 : index
    %438 = vector.load %arg20[%c0_190, %c0_191] : memref<32x128xf32, #tpu.memory_space<vmem>>, vector<32x128xf32>
    %439 = arith.truncf %438 : vector<32x128xf32> to vector<32x128xbf16>
    %cst_192 = arith.constant dense<0.000000e+00> : vector<1x128xf32>
    %440 = tpu.matmul %437, %439, %cst_192 {dimension_numbers = #tpu.dot_dimension_numbers<[1], [0], [0], [1], [0, 0, 1, 1], [], []>} : vector<1x32xbf16>, vector<32x128xbf16>, vector<1x128xf32> -> vector<1x128xf32>
    %c0_193 = arith.constant 0 : index
    %c0_194 = arith.constant 0 : index
    %441 = vector.load %arg21[%c0_193, %c0_194] : memref<1x128xf32, #tpu.memory_space<vmem>>, vector<1x128xf32>
    %442 = arith.addf %440, %441 : vector<1x128xf32>
    %c0_195 = arith.constant 0 : index
    %c0_196 = arith.constant 0 : index
    %c0_197 = arith.constant 0 : index
    %443 = vector.load %arg22[%c0_195, %c0_196, %c0_197] : memref<1x1x128xf32, #tpu.memory_space<vmem>>, vector<1x1x128xf32>
    %444 = vector.shape_cast %443 : vector<1x1x128xf32> to vector<1x128xf32>
    %445 = vector.shape_cast %442 : vector<1x128xf32> to vector<1x1x128xf32>
    tpu.vector_store %arg22[%c0_195, %c0_196, %c0_197], %445 {strides = array<i32>} : memref<1x1x128xf32, #tpu.memory_space<vmem>>, vector<1x1x128xf32>,
    return
  }
  func.func @transform_0(%arg0: i32) -> (i32, i32, i32) {
    %c0_i32 = arith.constant 0 : i32
    %c0_i32_0 = arith.constant 0 : i32
    %c0_i32_1 = arith.constant 0 : i32
    return %arg0, %c0_i32, %c0_i32_0 : i32, i32, i32
  }
  func.func @transform_1(%arg0: i32) -> (i32, i32, i32) {
    %c0_i32 = arith.constant 0 : i32
    %c0_i32_0 = arith.constant 0 : i32
    %c0_i32_1 = arith.constant 0 : i32
    return %arg0, %c0_i32, %c0_i32_0 : i32, i32, i32
  }
  func.func @transform_2(%arg0: i32) -> (i32, i32) {
    %c0_i32 = arith.constant 0 : i32
    %c0_i32_0 = arith.constant 0 : i32
    %c0_i32_1 = arith.constant 0 : i32
    return %c0_i32, %c0_i32_0 : i32, i32
  }
  func.func @transform_3(%arg0: i32) -> (i32, i32, i32) {
    %c0_i32 = arith.constant 0 : i32
    %c0_i32_0 = arith.constant 0 : i32
    %c0_i32_1 = arith.constant 0 : i32
    %c0_i32_2 = arith.constant 0 : i32
    return %c0_i32, %c0_i32_0, %c0_i32_1 : i32, i32, i32
  }
  func.func @transform_4(%arg0: i32) -> (i32, i32, i32) {
    %c0_i32 = arith.constant 0 : i32
    %c0_i32_0 = arith.constant 0 : i32
    %c0_i32_1 = arith.constant 0 : i32
    %c0_i32_2 = arith.constant 0 : i32
    return %c0_i32, %c0_i32_0, %c0_i32_1 : i32, i32, i32
  }
  func.func @transform_5(%arg0: i32) -> (i32, i32, i32) {
    %c0_i32 = arith.constant 0 : i32
    %c0_i32_0 = arith.constant 0 : i32
    %c0_i32_1 = arith.constant 0 : i32
    %c0_i32_2 = arith.constant 0 : i32
    return %c0_i32, %c0_i32_0, %c0_i32_1 : i32, i32, i32
  }
  func.func @transform_6(%arg0: i32) -> (i32, i32, i32) {
    %c0_i32 = arith.constant 0 : i32
    %c0_i32_0 = arith.constant 0 : i32
    %c0_i32_1 = arith.constant 0 : i32
    %c0_i32_2 = arith.constant 0 : i32
    return %c0_i32, %c0_i32_0, %c0_i32_1 : i32, i32, i32
  }
  func.func @transform_7(%arg0: i32) -> (i32, i32, i32) {
    %c0_i32 = arith.constant 0 : i32
    %c0_i32_0 = arith.constant 0 : i32
    %c0_i32_1 = arith.constant 0 : i32
    %c0_i32_2 = arith.constant 0 : i32
    return %c0_i32, %c0_i32_0, %c0_i32_1 : i32, i32, i32
  }
  func.func @transform_8(%arg0: i32) -> (i32, i32, i32) {
    %c0_i32 = arith.constant 0 : i32
    %c0_i32_0 = arith.constant 0 : i32
    %c0_i32_1 = arith.constant 0 : i32
    %c0_i32_2 = arith.constant 0 : i32
    return %c0_i32, %c0_i32_0, %c0_i32_1 : i32, i32, i32
  }
  func.func @transform_9(%arg0: i32) -> (i32, i32, i32) {
    %c0_i32 = arith.constant 0 : i32
    %c0_i32_0 = arith.constant 0 : i32
    %c0_i32_1 = arith.constant 0 : i32
    %c0_i32_2 = arith.constant 0 : i32
    return %c0_i32, %c0_i32_0, %c0_i32_1 : i32, i32, i32
  }
  func.func @transform_10(%arg0: i32) -> (i32, i32, i32) {
    %c0_i32 = arith.constant 0 : i32
    %c0_i32_0 = arith.constant 0 : i32
    %c0_i32_1 = arith.constant 0 : i32
    %c0_i32_2 = arith.constant 0 : i32
    return %c0_i32, %c0_i32_0, %c0_i32_1 : i32, i32, i32
  }
  func.func @transform_11(%arg0: i32) -> (i32, i32, i32) {
    %c0_i32 = arith.constant 0 : i32
    %c0_i32_0 = arith.constant 0 : i32
    %c0_i32_1 = arith.constant 0 : i32
    %c0_i32_2 = arith.constant 0 : i32
    return %c0_i32, %c0_i32_0, %c0_i32_1 : i32, i32, i32
  }
  func.func @transform_12(%arg0: i32) -> (i32, i32, i32) {
    %c0_i32 = arith.constant 0 : i32
    %c0_i32_0 = arith.constant 0 : i32
    %c0_i32_1 = arith.constant 0 : i32
    %c0_i32_2 = arith.constant 0 : i32
    return %c0_i32, %c0_i32_0, %c0_i32_1 : i32, i32, i32
  }
  func.func @transform_13(%arg0: i32) -> (i32, i32, i32) {
    %c0_i32 = arith.constant 0 : i32
    %c0_i32_0 = arith.constant 0 : i32
    %c0_i32_1 = arith.constant 0 : i32
    %c0_i32_2 = arith.constant 0 : i32
    return %c0_i32, %c0_i32_0, %c0_i32_1 : i32, i32, i32
  }
  func.func @transform_14(%arg0: i32) -> (i32, i32, i32) {
    %c0_i32 = arith.constant 0 : i32
    %c0_i32_0 = arith.constant 0 : i32
    %c0_i32_1 = arith.constant 0 : i32
    %c0_i32_2 = arith.constant 0 : i32
    return %c0_i32, %c0_i32_0, %c0_i32_1 : i32, i32, i32
  }
  func.func @transform_15(%arg0: i32) -> (i32, i32) {
    %c0_i32 = arith.constant 0 : i32
    %c0_i32_0 = arith.constant 0 : i32
    %c0_i32_1 = arith.constant 0 : i32
    return %c0_i32, %c0_i32_0 : i32, i32
  }
  func.func @transform_16(%arg0: i32) -> (i32, i32) {
    %c0_i32 = arith.constant 0 : i32
    %c0_i32_0 = arith.constant 0 : i32
    %c0_i32_1 = arith.constant 0 : i32
    return %c0_i32, %c0_i32_0 : i32, i32
  }
  func.func @transform_17(%arg0: i32) -> (i32, i32) {
    %c0_i32 = arith.constant 0 : i32
    %c0_i32_0 = arith.constant 0 : i32
    %c0_i32_1 = arith.constant 0 : i32
    return %c0_i32, %c0_i32_0 : i32, i32
  }
  func.func @transform_18(%arg0: i32) -> (i32, i32) {
    %c0_i32 = arith.constant 0 : i32
    %c0_i32_0 = arith.constant 0 : i32
    %c0_i32_1 = arith.constant 0 : i32
    return %c0_i32, %c0_i32_0 : i32, i32
  }
  func.func @transform_19(%arg0: i32) -> (i32, i32) {
    %c0_i32 = arith.constant 0 : i32
    %c0_i32_0 = arith.constant 0 : i32
    %c0_i32_1 = arith.constant 0 : i32
    return %c0_i32, %c0_i32_0 : i32, i32
  }
  func.func @transform_20(%arg0: i32) -> (i32, i32) {
    %c0_i32 = arith.constant 0 : i32
    %c0_i32_0 = arith.constant 0 : i32
    %c0_i32_1 = arith.constant 0 : i32
    return %c0_i32, %c0_i32_0 : i32, i32
  }
  func.func @transform_21(%arg0: i32) -> (i32, i32, i32) {
    %c0_i32 = arith.constant 0 : i32
    %c0_i32_0 = arith.constant 0 : i32
    %c0_i32_1 = arith.constant 0 : i32
    return %arg0, %c0_i32, %c0_i32_0 : i32, i32, i32
  }
}

</mosaic_0001>

<bundles_post_ra>
// kernel: vit_forward.1
= control target key start
LH: loop header
LB: loop body
LE: loop exit
PB: predicated region body
PF: predicated region fallthrough
CT: control target
= control target key end

     0   :  { %s4399_s0 = inlined_call_operand.vmem [shape: f32[2,17,64], index: 0, kind: input, shape index: {}]   ;;  %s4400_s1 = inlined_call_operand.vmem [shape: f32[2,17,32], index: 1, kind: input, shape index: {}]   ;;  %s4401_s2 = inlined_call_operand.vmem [shape: f32[64,32], index: 2, kind: input, shape index: {}]   ;;  %s4402_s3 = inlined_call_operand.vmem [shape: f32[2,1,32], index: 3, kind: input, shape index: {}]   ;;  %s4403_s4 = inlined_call_operand.vmem [shape: f32[2,1,32], index: 4, kind: input, shape index: {}]   ;;  %s4404_s5 = inlined_call_operand.vmem [shape: f32[2,32,96], index: 5, kind: input, shape index: {}]   ;;  %s4405_s6 = inlined_call_operand.vmem [shape: f32[2,1,96], index: 6, kind: input, shape index: {}]   ;;  %s4406_s7 = inlined_call_operand.vmem [shape: f32[2,32,32], index: 7, kind: input, shape index: {}]   ;;  %s4407_s8 = inlined_call_operand.vmem [shape: f32[2,1,32], index: 8, kind: input, shape index: {}]   ;;  %s4408_s9 = inlined_call_operand.vmem [shape: f32[2,1,32], index: 9, kind: input, shape index: {}]   ;;  %s4409_s10 = inlined_call_operand.vmem [shape: f32[2,1,32], index: 10, kind: input, shape index: {}]   ;;  %s4410_s11 = inlined_call_operand.vmem [shape: f32[2,32,64], index: 11, kind: input, shape index: {}]   ;;  %s4411_s12 = inlined_call_operand.vmem [shape: f32[2,1,64], index: 12, kind: input, shape index: {}]   ;;  %s4412_s13 = inlined_call_operand.vmem [shape: f32[2,64,32], index: 13, kind: input, shape index: {}]   ;;  %s4413_s14 = inlined_call_operand.vmem [shape: f32[2,1,32], index: 14, kind: input, shape index: {}]   ;;  %s4414_s15 = inlined_call_operand.vmem [shape: f32[1,32], index: 15, kind: input, shape index: {}]   ;;  %s4415_s16 = inlined_call_operand.vmem [shape: f32[1,32], index: 16, kind: input, shape index: {}]   ;;  %s4416_s17 = inlined_call_operand.vmem [shape: f32[32,32], index: 17, kind: input, shape index: {}]   ;;  %s4417_s18 = inlined_call_operand.vmem [shape: f32[1,32], index: 18, kind: input, shape index: {}]   ;;  %s4418_s19 = inlined_call_operand.vmem [shape: f32[32,128], index: 19, kind: input, shape index: {}]   ;;  %s4419_s20 = inlined_call_operand.vmem [shape: f32[1,128], index: 20, kind: input, shape index: {}]   ;;  %s4420_s21 = inlined_call_operand.hbm [shape: f32[2,1,128], index: 21, kind: output, shape index: {}]  }
   0x1   :  { %4459 = sst [smem:[#allocation11_spill]] %s4399_s0 }
   0x2   :  { %4460 = sst [smem:[#allocation12_spill]] %s4400_s1 }
   0x3   :  { %4461 = sst [smem:[#allocation13_spill]] %s4401_s2 }
   0x4   :  { %4462 = sst [smem:[#allocation14_spill]] %s4402_s3 }
   0x5   :  { %4463 = sst [smem:[#allocation15_spill]] %s4403_s4 }
   0x6   :  { %4464 = sst [smem:[#allocation16_spill]] %s4404_s5 }
   0x7   :  { %4465 = sst [smem:[#allocation17_spill]] %s4405_s6 }
   0x8   :  { %4466 = sst [smem:[#allocation18_spill]] %s4419_s20 }
   0x9   :  { %26 = vsyncpa [#allocation3], 0 }
   0xa   :  { %28 = vsyncpa [#allocation3 + $0x1], 0  ;;  %s3522_s2 = smov 0   ;;  %s3524_s25 = smov 0  }
   0xb   :  { %s3526_s26 = smov 0   ;;  %s3528_s27 = smov 0  }
   0xc LB: > { %4467 = sst [smem:[#allocation5_spill]] %s3383_s2  ;;  %s3543_s3 = sadd.s32 4294967295, %s3395_s27   ;;  %s3395_s27 = sphi %s3528_s27, %s4499_s27   ;;  %s3391_s26 = sphi %s3526_s26, %s4501_s26   ;;  %s3387_s25 = sphi %s3524_s25, %s4503_s25   ;;  %s3383_s2 = sphi %s3522_s2, %s4502_s2  }
   0xd   : > { %4468 = sst [smem:[#allocation6_spill]] %s3391_s26  ;;  %s2903_s28 = sadd.s32 4294967294, %s3395_s27  }
   0xe   : > { %4469 = sst [smem:[#allocation7_spill]] %s3395_s27  ;;  %s3547_s29 = sadd.s32 1, %s3395_s27  }
   0xf   : > { %4470 = sst [smem:[#allocation8_spill]] %s3547_s29  ;;  %s492_s0 = sadd.s32 1, %s3391_s26 }
  0x10   : > { %s489_s4 = ssub.s32 %s3395_s27, %s3547_s29  ;;  %p502_p0 = scmp.ne.s32.totalorder %s3391_s26, %s3387_s25 }
  0x11   : > { %p490_p1 = scmp.eq.s32.totalorder %s489_s4, 0  ;;  %p503_p2 = scmp.eq.s32.totalorder %s3543_s3, 1 }
  0x12   : > { %p508_p3 = scmp.ne.s32.totalorder %s3387_s25, %s3383_s2  ;;  %p509_p4 = scmp.eq.s32.totalorder %s2903_s28, 1 }
  0x13   : > { %s3558_s30 = scalar_select %p490_p1, %s3391_s26, %s492_s0  }
  0x14   : > { %p3560_p5 = por %p503_p2, %p502_p0  ;;  %p3564_p6 = por %p509_p4, %p508_p3 }
  0x15   : > { %4471 = sst [smem:[#allocation9_spill]] %s3558_s30  ;;  %p2906_p7 = scmp.ge.s32.totalorder %s3395_s27, 1 }
  0x16   : > { %s4473_s22 = scalar_select %p3564_p6, 1, 0 }
  0x17   : > { %p600_p8 = scmp.lt.s32.totalorder %s3395_s27, 3 }
  0x18   : > { %4474 = sst [smem:[#allocation10_spill]] %s4473_s22 }
  0x19   : > { %p601_p9 = pnand %p2906_p7, %p600_p8 }
  0x1a   : > { %s4475_s24 = sld [smem:[#allocation13_spill]] (!%p601_p9)  ;;  %p664_p10 = scmp.lt.s32.totalorder (!%p601_p9), %s3543_s3, 1 }
  0x1b   : > { %604 = sbr.rel (%p601_p9) target bundleno = 5229 (0x146d), region = 104  ;;  %s4476_s27 = sld [smem:[#allocation11_spill]] (!%p601_p9) }
  0x1c   : > { %s4477_s28 = sld [smem:[#allocation12_spill]] (!%p601_p9)  ;;  %s4449_s2 = smov (!%p601_p9), 96  }
  0x1d   : > { %s4480_s4 = sld [smem:[#allocation15_spill]] (!%p601_p9)  ;;  %s4451_s22 = smov (!%p601_p9), 88  }
  0x1e   : > { %s4481_s6 = sld [smem:[#allocation17_spill]] (!%p601_p9)  ;;  %s4431_s1 = smov (!%p601_p9), 64  }
  0x1f   : > { %s4441_s26 = smov (!%p601_p9), 112   ;;  %s4439_s29 = smov (!%p601_p9), 56  }
  0x20   : > { %v686_v0 = vld [vmem:[%s4475_s24 + $0x30] sm:$0xff]  ;;  %v687_v1 = vld [vmem:[%s4475_s24 + $0x38] sm:$0xff]  ;;  %v684_v2 = vld [vmem:[%s4475_s24 + $0x20] sm:$0xff]  ;;  %s665_s23 = scalar_select %p664_p10, %s3543_s3, 1  ;;  %vm695_vm0 = vcmask 523264   ;;  %vm722_vm1 = vcmask 261120  }
  0x21   : > { %v691_v3 = vpack.c.bf16 %v687_v1, %v686_v0  ;;  %v685_v4 = vld [vmem:[%s4475_s24 + $0x28] sm:$0xff]  ;;  %v682_v5 = vld [vmem:[%s4475_s24 + $0x10] sm:$0xff]  ;;  %v683_v7 = vld [vmem:[%s4475_s24 + $0x18] sm:$0xff]  ;;  %vm729_vm2 = vcmask 253952   ;;  %v3397_v30 = vmov 32.0   ;;  %vm854_vm13 = vcmask 64512  }
  0x22   : > { %v690_v6 = vpack.c.bf16 %v685_v4, %v684_v2  ;;  %s3042_s0 = smul.u32 24, %s665_s23  ;;  %v689_v8 = vpack.c.bf16 %v683_v7, %v682_v5  ;;  %v680_v9 = vld [vmem:[%s4475_s24] sm:$0xff]  ;;  %v681_v10 = vld [vmem:[%s4475_s24 + $0x8] sm:$0xff]  ;;  %3183 = vrcp.f32 %v3397_v30  ;;  %vm896_vm14 = vcmask 138240   ;;  %s4445_s23 = smov 120  }
  0x23   : > { %706 = vmatpush.bf16.msra.mxu0 %v691_v3  ;;  %v688_v11 = vpack.c.bf16 %v681_v10, %v680_v9  ;;  %vm903_vm15 = vcmask 131072   ;;  %s4482_s24 = smov 88  }
  0x24   : > { %s668_s20 = scalar_lea.vmem %s4476_s27, %s3042_s0  ;;  %s673_s30 = scalar_lea.vmem %s4477_s28, %s3042_s0 }
  0x25   : > { %v675_v12 = vld [vmem:[%s668_s20] sm:$0xff]  ;;  %v676_v13 = vld [vmem:[%s668_s20 + $0x8] sm:$0xff]  ;;  %v677_v15 = vld [vmem:[%s668_s20 + $0x10] sm:$0x1]  ;;  %s4478_s0 = sld [smem:[#allocation16_spill]]  ;;  %s4447_s28 = smov 72  }
  0x26   : > { %v678_v14 = vpack.c.bf16 %v676_v13, %v675_v12  ;;  %v679_v16 = vpack.c.bf16 %v677_v15, %v677_v15  ;;  %v692_v17 = vld [vmem:[%s673_s30] sm:$0xff]  ;;  %v693_v21 = vld [vmem:[%s673_s30 + $0x8] sm:$0xff]  ;;  %v694_v25 = vld [vmem:[%s673_s30 + $0x10] sm:$0x1]  ;;  %s4479_s30 = sld [smem:[#allocation14_spill]]  ;;  %s4443_s20 = smov 80  }
  0x27   : > { %707 = vmatpush.bf16.msra.mxu0 %v690_v6  ;;  %s4433_s27 = smov 104  }
  0x28   : > { %v3184_v31 = vpop.eup %3183 }
  0x29   : > { %v734_v32 = vmul.f32 32.0, %v3184_v31  ;;  %vm738_vm3 = vweird.f32 %v3184_v31 }
  0x2b   : > { %708 = vmatpush.bf16.msra.mxu0 %v689_v8  ;;  %v735_v33 = vsub.f32 1.0, %v734_v32  ;;  %v813_v52 = vld [vmem:[%s4478_s0 + $0x10] sm:$0xff]  ;;  %v814_v53 = vld [vmem:[%s4478_s0 + $0x18] sm:$0xff]  ;;  %v811_v57 = vld [vmem:[%s4478_s0] sm:$0xff] }
  0x2c   : > { %v816_v54 = vpack.c.bf16 %v814_v53, %v813_v52  ;;  %v812_v58 = vld [vmem:[%s4478_s0 + $0x8] sm:$0xff] }
  0x2d   : > { %v736_v34 = vmul.f32 %v3184_v31, %v735_v33  ;;  %v815_v59 = vpack.c.bf16 %v812_v58, %v811_v57 }
  0x2e   : > { %833 = vmatpush.bf16.msra.mxu1 %v816_v54 }
  0x2f   : > { %709 = vmatpush.bf16.msra.mxu0 %v688_v11  ;;  %v737_v35 = vadd.f32 %v3184_v31, %v736_v34 }
  0x31   : > { %v3616_v36 = vsel %vm738_vm3, %v3184_v31, %v737_v35  ;;  %vm948_vm3 = vcmask 1040384  }
  0x32   : > { %2909 = vmatmul.msk.bf16.vlgmr.msra.gmra.mxu0 %vm695_vm0, %v678_v14  ;;  %834 = vmatpush.bf16.msra.mxu1 %v815_v59 }
  0x42   : > { %2910 = vmatmul.msk.bf16.gmra.mxu0 %vm695_vm0, %v679_v16 }
  0xaf   : > { %v711_v18 = vpop.f32.mrf.mxu0 }
  0xb0   : > { %v3604_v19 = vadd.f32 %v711_v18, %v692_v17  ;;  %v3167_v17 = vld [vmem:[%s4479_s30] ss:$0 sm:$0xff] }
  0xb2   : > { %v723_v20 = vsel %vm722_vm1, %v3604_v19, 0.0 }
  0xb3   : > { %724 = vadd.xlane.f32.xlu0 %v723_v20 }
  0xb7   : > { %v713_v22 = vpop.f32.mrf.mxu0 }
  0xb8   : > { %v3608_v23 = vadd.f32 %v713_v22, %v693_v21 }
  0xba   : > { %v726_v24 = vsel %vm722_vm1, %v3608_v23, 0.0 }
  0xbb   : > { %727 = vadd.xlane.f32.xlu0 %v726_v24 }
  0xbf   : > { %v716_v26 = vpop.f32.mrf.mxu0 }
  0xc0   : > { %v3612_v27 = vadd.f32 %v716_v26, %v694_v25  ;;  %v3168_v26 = vld [vmem:[%s4480_s4] ss:$0 sm:$0xff] }
  0xc2   : > { %v730_v28 = vsel %vm729_vm2, %v3612_v27, 0.0 }
  0xc3   : > { %731 = vadd.xlane.f32.xlu1 %v730_v28 }
  0xc7   : > { %v718_v29 = vpop.f32.mrf.mxu0 }
 0x126   : > { %v725_v37 = vpop.xlane.xlu0 %724 }
 0x127   : > { %v740_v38 = vmul.f32 %v3616_v36, %v725_v37 }
 0x129   : > { %v743_v39 = vsub.f32 %v3604_v19, %v740_v38 }
 0x12b   : > { %v746_v40 = vmul.f32 %v743_v39, %v743_v39 }
 0x12d   : > { %v749_v41 = vsel %vm722_vm1, %v746_v40, 0.0 }
 0x12e   : > { %750 = vadd.xlane.f32.xlu1 %v749_v41  ;;  %v728_v42 = vpop.xlane.xlu0 %727  ;;  %v3169_v41 = vld [vmem:[%s4481_s6] ss:$0 sm:$0xff] }
 0x12f   : > { %v741_v43 = vmul.f32 %v3616_v36, %v728_v42 }
 0x131   : > { %v744_v44 = vsub.f32 %v3608_v23, %v741_v43 }
 0x133   : > { %v747_v45 = vmul.f32 %v744_v44, %v744_v44 }
 0x135   : > { %v752_v46 = vsel %vm722_vm1, %v747_v45, 0.0 }
 0x136   : > { %v732_v47 = vpop.xlane.xlu1 %731  ;;  %753 = vadd.xlane.f32.xlu2 %v752_v46 }
 0x137   : > { %v742_v48 = vmul.f32 %v3616_v36, %v732_v47 }
 0x139   : > { %v3626_v49 = vsub.f32 %v3612_v27, %v742_v48 }
 0x13b   : > { %v748_v50 = vmul.f32 %v3626_v49, %v3626_v49 }
 0x13d   : > { %v755_v51 = vsel %vm729_vm2, %v748_v50, 0.0 }
 0x13e   : > { %756 = vadd.xlane.f32.xlu2 %v755_v51 }
 0x1a1   : > { %v751_v55 = vpop.xlane.xlu1 %750 }
 0x1a2   : > { %v758_v56 = vmul.f32 %v751_v55, %v3616_v36 }
 0x1a4   : > { %v761_v60 = vadd.f32 1e-05, %v758_v56 }
 0x1a6   : > { %3185 = vrsqrt.f32 %v761_v60  ;;  %vm770_vm5 = vweird.f32 %v761_v60 }
 0x1a9   : > { %v754_v61 = vpop.xlane.xlu2 %753 }
 0x1aa   : > { %v759_v62 = vmul.f32 %v754_v61, %v3616_v36 }
 0x1ac   : > { %v3186_v63 = vpop.eup %3185  ;;  %v762_v0 = vadd.f32 1e-05, %v759_v62 }
 0x1ad   : > { %v765_v1 = vmul.f32 %v3186_v63, %v761_v60  ;;  %vm771_vm4 = vweird.f32 %v3186_v63 }
 0x1ae   : > { %3187 = vrsqrt.f32 %v762_v0  ;;  %vm772_vm6 = vmor %vm770_vm5, %vm771_vm4  ;;  %vm780_vm8 = vweird.f32 %v762_v0  ;;  %vm1409_vm4 = vcmask 130048   ;;  %vm1413_vm5 = vcmask 195584  }
 0x1af   : > { %v766_v2 = vmul.f32 %v3186_v63, %v765_v1 }
 0x1b1   : > { %v767_v3 = vmul.f32 0.5, %v766_v2  ;;  %v757_v4 = vpop.xlane.xlu2 %756 }
 0x1b2   : > { %v760_v5 = vmul.f32 %v757_v4, %v3616_v36 }
 0x1b3   : > { %v768_v6 = vsub.f32 1.5, %v767_v3 }
 0x1b4   : > { %v3188_v7 = vpop.eup %3187  ;;  %v763_v8 = vadd.f32 1e-05, %v760_v5 }
 0x1b5   : > { %v769_v9 = vmul.f32 %v3186_v63, %v768_v6  ;;  %v775_v10 = vmul.f32 %v3188_v7, %v762_v0  ;;  %vm781_vm7 = vweird.f32 %v3188_v7 }
 0x1b6   : > { %3189 = vrsqrt.f32 %v763_v8  ;;  %vm782_vm9 = vmor %vm780_vm8, %vm781_vm7  ;;  %vm790_vm11 = vweird.f32 %v763_v8 }
 0x1b7   : > { %v776_v11 = vmul.f32 %v3188_v7, %v775_v10  ;;  %v773_v12 = vsel %vm772_vm6, %v3186_v63, %v769_v9 }
 0x1b8   : > { %v794_v16 = vmul.f32 %v773_v12, %v743_v39 }
 0x1b9   : > { %v777_v13 = vmul.f32 0.5, %v776_v11 }
 0x1ba   : > { %v800_v25 = vmul.f32 %v3167_v17, %v794_v16 }
 0x1bb   : > { %v778_v14 = vsub.f32 1.5, %v777_v13 }
 0x1bc   : > { %v3190_v15 = vpop.eup %3189  ;;  %v806_v31 = vadd.f32 %v3168_v26, %v800_v25 }
 0x1bd   : > { %v779_v18 = vmul.f32 %v3188_v7, %v778_v14  ;;  %v785_v20 = vmul.f32 %v3190_v15, %v763_v8  ;;  %vm791_vm10 = vweird.f32 %v3190_v15 }
 0x1be   : > { %vm792_vm12 = vmor %vm790_vm11, %vm791_vm10 }
 0x1bf   : > { %v783_v21 = vsel %vm782_vm9, %v3188_v7, %v779_v18  ;;  %v786_v22 = vmul.f32 %v3190_v15, %v785_v20 }
 0x1c0   : > { %v795_v24 = vmul.f32 %v783_v21, %v744_v44 }
 0x1c1   : > { %v787_v28 = vmul.f32 0.5, %v786_v22 }
 0x1c2   : > { %v801_v29 = vmul.f32 %v3167_v17, %v795_v24 }
 0x1c3   : > { %v788_v30 = vsub.f32 1.5, %v787_v28 }
 0x1c4   : > { %v807_v32 = vadd.f32 %v3168_v26, %v801_v29 }
 0x1c5   : > { %v789_v33 = vmul.f32 %v3190_v15, %v788_v30 }
 0x1c6   : > { %v809_v34 = vpack.c.bf16 %v807_v32, %v806_v31 }
 0x1c7   : > { %v793_v35 = vsel %vm792_vm12, %v3190_v15, %v789_v33 }
 0x1c8   : > { %2911 = vmatmul.msk.bf16.vlgmr.msra.gmra.mxu1 %vm722_vm1, %v809_v34  ;;  %v796_v37 = vmul.f32 %v793_v35, %v3626_v49 }
 0x1ca   : > { %v802_v38 = vmul.f32 %v3167_v17, %v796_v37 }
 0x1cc   : > { %v808_v39 = vadd.f32 %v3168_v26, %v802_v38 }
 0x1ce   : > { %v810_v40 = vpack.c.bf16 %v808_v39, %v808_v39 }
 0x1d8   : > { %2912 = vmatmul.msk.bf16.gmra.mxu1 %vm722_vm1, %v810_v40 }
 0x245   : > { %v836_v42 = vpop.f32.mrf.mxu1 }
 0x246   : > { %v3658_v43 = vadd.f32 %v3169_v41, %v836_v42 }
 0x248   : > { %848 = vrot.lane.b32.xlu2 %v3658_v43, %s4449_s2 }
 0x24d   : > { %v838_v44 = vpop.f32.mrf.mxu1 }
 0x24e   : > { %v3662_v45 = vadd.f32 %v3169_v41, %v838_v44 }
 0x250   : > { %850 = vrot.lane.b32.xlu1 %v3662_v45, %s4449_s2  ;;  %v3690_v61 = vpack.i.bf16 %v3658_v43, %v3662_v45 }
 0x255   : > { %v841_v46 = vpop.f32.mrf.mxu1 }
 0x256   : > { %v3666_v47 = vadd.f32 %v3169_v41, %v841_v46 }
 0x258   : > { %852 = vrot.lane.b32.xlu0 %v3666_v47, %s4449_s2  ;;  %s4483_s2 = smov 96  }
 0x25d   : > { %v843_v48 = vpop.f32.mrf.mxu1 }
 0x2a2   : > { %v849_v51 = vpop.permute.xlu2 %848 }
 0x2c2   : > { %v851_v50 = vpop.permute.xlu1 %850 }
 0x2ca   : > { %v853_v49 = vpop.permute.xlu0 %852 }
 0x2cb   : > { %2913 = vmatpush.xpose.msk.msra.mxu2 %vm854_vm13, %v853_v49 }
 0x2cf   : > { %2914 = vmatpush.xpose.msk.msra.mxu2 %vm854_vm13, %v851_v50 }
 0x2d3   : > { %2915 = vmatpush.xpose.msk.msra.mxu2 %vm854_vm13, %v849_v51 }
 0x2d6   : > { %2916 = vmatmul.msk.f32.vlgmr.msra.gmra.mxu2 %vm854_vm13, %v3658_v43 }
 0x2de   : > { %2917 = vmatmul.msk.f32.gmra.mxu2 %vm854_vm13, %v3662_v45 }
 0x2e6   : > { %2918 = vmatmul.msk.f32.gmra.mxu2 %vm854_vm13, %v3666_v47 }
 0x359   : > { %v884_v52 = vpop.f32.mrf.mxu2 }
 0x35a   : > { %v893_v53 = vmul.f32 0.35355338, %v884_v52 }
 0x35c   : > { %v897_v54 = vsel %vm896_vm14, %v893_v53, -inf }
 0x35d   : > { %898 = vmax.xlane.f32.xlu0 %v897_v54 }
 0x361   : > { %v887_v55 = vpop.f32.mrf.mxu2 }
 0x362   : > { %v894_v56 = vmul.f32 0.35355338, %v887_v55 }
 0x364   : > { %v900_v57 = vsel %vm896_vm14, %v894_v56, -inf }
 0x365   : > { %901 = vmax.xlane.f32.xlu2 %v900_v57 }
 0x369   : > { %v890_v58 = vpop.f32.mrf.mxu2 }
 0x36a   : > { %v895_v59 = vmul.f32 0.35355338, %v890_v58 }
 0x36c   : > { %v904_v60 = vsel %vm903_vm15, %v895_v59, -inf }
 0x36d   : > { %905 = vmax.xlane.f32.xlu1 %v904_v60 }
 0x371   : > { %987 = vrot.lane.b32.xlu0 %v3666_v47, %s4451_s22 }
 0x379   : > { %981 = vrot.lane.b32.xlu0 %v3666_v47, %s4445_s23 }
 0x37d   : > { %935 = vrot.lane.b32.xlu2 %v3666_v47, %s4431_s1 }
 0x385   : > { %985 = vrot.lane.b32.xlu2 %v3662_v45, %s4451_s22 }
 0x386   : > { %3098 = vrot.lane.b32.xlu1 %v3690_v61, %s4431_s1  ;;  %s4435_s1 = smov 48  }
 0x38d   : > { %977 = vrot.lane.b32.xlu2 %v3658_v43, %s4445_s23 }
 0x38e   : > { %983 = vrot.lane.b32.xlu1 %v3658_v43, %s4451_s22  ;;  %s4484_s22 = smov 72  }
 0x395   : > { %1249 = vrot.lane.b32.xlu2 %v3666_v47, %s4447_s28 }
 0x396   : > { %979 = vrot.lane.b32.xlu1 %v3662_v45, %s4445_s23  ;;  %s4485_s23 = smov 120  }
 0x39d   : > { %1245 = vrot.lane.b32.xlu2 %v3658_v43, %s4447_s28 }
 0x39e   : > { %1247 = vrot.lane.b32.xlu1 %v3662_v45, %s4447_s28  ;;  %s4486_s28 = smov 80  }
 0x3a5   : > { %1116 = vrot.lane.b32.xlu2 %v3662_v45, %s4443_s20 }
 0x3a6   : > { %1239 = vrot.lane.b32.xlu1 %v3658_v43, %s4433_s27 }
 0x3ad   : > { %1108 = vrot.lane.b32.xlu2 %v3658_v43, %s4441_s26 }
 0x3ae   : > { %1241 = vrot.lane.b32.xlu1 %v3662_v45, %s4433_s27 }
 0x3b5   : > { %1112 = vrot.lane.b32.xlu2 %v3666_v47, %s4441_s26 }
 0x3b6   : > { %1243 = vrot.lane.b32.xlu1 %v3666_v47, %s4433_s27  ;;  %s4437_s27 = smov 40  }
 0x3d0   : > { %v899_v62 = vpop.xlane.xlu0 %898 }
 0x3d1   : > { %v907_v63 = vsub.f32 %v893_v53, %v899_v62 }
 0x3d3   : > { %v910_v0 = vmul.f32 1.442695, %v907_v63 }
 0x3d5   : > { %3191 = vpow2.f32 %v910_v0 }
 0x3d8   : > { %v902_v1 = vpop.xlane.xlu2 %901 }
 0x3d9   : > { %v908_v2 = vsub.f32 %v894_v56, %v902_v1 }
 0x3db   : > { %v3192_v3 = vpop.eup %3191  ;;  %v912_v4 = vmul.f32 1.442695, %v908_v2 }
 0x3dc   : > { %v916_v5 = vsel %vm896_vm14, %v3192_v3, 0.0 }
 0x3dd   : > { %3193 = vpow2.f32 %v912_v4  ;;  %917 = vadd.xlane.f32.xlu0 %v916_v5 }
 0x3e0   : > { %v936_v6 = vpop.permute.xlu2 %935  ;;  %v906_v7 = vpop.xlane.xlu1 %905 }
 0x3e1   : > { %v909_v8 = vsub.f32 %v895_v59, %v906_v7  ;;  %2919 = vmatpush.msk.msra.mxu3 %vm948_vm3, %v936_v6 }
 0x3e3   : > { %v3194_v9 = vpop.eup %3193  ;;  %v914_v10 = vmul.f32 1.442695, %v909_v8  ;;  %v988_v17 = vpop.permute.xlu0 %987 }
 0x3e4   : > { %v919_v11 = vsel %vm896_vm14, %v3194_v9, 0.0 }
 0x3e5   : > { %3195 = vpow2.f32 %v914_v10  ;;  %920 = vadd.xlane.f32.xlu0 %v919_v11 }
 0x3e8   : > { %v986_v18 = vpop.permute.xlu2 %985 }
 0x3eb   : > { %v3196_v12 = vpop.eup %3195  ;;  %v982_v21 = vpop.permute.xlu0 %981 }
 0x3ec   : > { %v922_v13 = vsel %vm903_vm15, %v3196_v12, 0.0 }
 0x3ed   : > { %923 = vadd.xlane.f32.xlu0 %v922_v13 }
 0x3f0   : > { %v978_v22 = vpop.permute.xlu2 %977 }
 0x3f8   : > { %v3099_v14 = vpop.permute.xlu1 %3098  ;;  %v1250_v28 = vpop.permute.xlu2 %1249 }
 0x3f9   : > { %v3100_v15 = vunpack.i.l.bf16 %v3099_v14  ;;  %v3101_v16 = vunpack.i.h.bf16 %v3099_v14 }
 0x3fb   : > { %965 = vmatpush.msra.mxu3 %v3100_v15 }
 0x3fd   : > { %966 = vmatpush.msra.mxu3 %v3101_v16 }
 0x3ff   : > { %2923 = vmatpush.xpose.msk.msrb.mxu3 %vm854_vm13, %v988_v17 }
 0x400   : > { %v984_v20 = vpop.permute.xlu1 %983  ;;  %v1246_v35 = vpop.permute.xlu2 %1245 }
 0x401   : > { %1118 = vrot.lane.b32.xlu0 %v3666_v47, %s4443_s20 }
 0x403   : > { %2924 = vmatpush.xpose.msk.msrb.mxu3 %vm854_vm13, %v986_v18 }
 0x407   : > { %2925 = vmatpush.xpose.msk.msrb.mxu3 %vm854_vm13, %v984_v20 }
 0x408   : > { %v980_v25 = vpop.permute.xlu1 %979  ;;  %v1117_v40 = vpop.permute.xlu2 %1116 }
 0x409   : > { %1114 = vrot.lane.b32.xlu0 %v3658_v43, %s4443_s20  ;;  %s4487_s20 = smov 112  }
 0x410   : > { %v1248_v31 = vpop.permute.xlu1 %1247  ;;  %v1109_v42 = vpop.permute.xlu2 %1108 }
 0x411   : > { %1110 = vrot.lane.b32.xlu0 %v3662_v45, %s4441_s26  ;;  %s4489_s26 = smov 104  }
 0x418   : > { %v1240_v43 = vpop.permute.xlu1 %1239  ;;  %v1113_v45 = vpop.permute.xlu2 %1112 }
 0x420   : > { %v1242_v46 = vpop.permute.xlu1 %1241 }
 0x428   : > { %v1244_v48 = vpop.permute.xlu1 %1243 }
 0x450   : > { %v918_v24 = vpop.xlane.xlu0 %917 }
 0x451   : > { %3197 = vrcp.f32 %v918_v24 }
 0x457   : > { %v3198_v26 = vpop.eup %3197 }
 0x458   : > { %v921_v29 = vpop.xlane.xlu0 %920  ;;  %v928_v30 = vmul.f32 %v3198_v26, %v3192_v3 }
 0x459   : > { %3199 = vrcp.f32 %v921_v29 }
 0x45a   : > { %2920 = vmatmul.msk.f32.vlgmr.msra.gmra.mxu3 %vm896_vm14, %v928_v30 }
 0x45b   : > { %2943 = vmatpush.xpose.msk.msra.mxu3 %vm854_vm13, %v1250_v28 }
 0x45f   : > { %v3200_v32 = vpop.eup %3199  ;;  %2944 = vmatpush.xpose.msk.msra.mxu3 %vm854_vm13, %v1248_v31 }
 0x460   : > { %v924_v33 = vpop.xlane.xlu0 %923  ;;  %v929_v34 = vmul.f32 %v3200_v32, %v3194_v9 }
 0x461   : > { %3201 = vrcp.f32 %v924_v33 }
 0x462   : > { %2921 = vmatmul.msk.f32.gmra.mxu3 %vm896_vm14, %v929_v34 }
 0x463   : > { %2945 = vmatpush.xpose.msk.msra.mxu3 %vm854_vm13, %v1246_v35 }
 0x467   : > { %v3202_v37 = vpop.eup %3201 }
 0x468   : > { %v930_v38 = vmul.f32 %v3202_v37, %v3196_v12 }
 0x46a   : > { %2922 = vmatmul.msk.f32.gmra.mxu3 %vm896_vm14, %v930_v38 }
 0x472   : > { %2926 = vmatmul.msk.f32.vlgmr.msrb.gmra.mxu3 %vm854_vm13, %v978_v22 }
 0x473   : > { %v1119_v39 = vpop.permute.xlu0 %1118 }
 0x474   : > { %2933 = vmatpush.xpose.msk.msrb.mxu1 %vm854_vm13, %v1119_v39 }
 0x478   : > { %2934 = vmatpush.xpose.msk.msrb.mxu1 %vm854_vm13, %v1117_v40 }
 0x47a   : > { %2927 = vmatmul.msk.f32.gmra.mxu3 %vm854_vm13, %v980_v25 }
 0x47b   : > { %v1115_v41 = vpop.permute.xlu0 %1114 }
 0x47c   : > { %2935 = vmatpush.xpose.msk.msrb.mxu1 %vm854_vm13, %v1115_v41 }
 0x47f   : > { %2936 = vmatmul.msk.f32.vlgmr.msrb.gmra.mxu1 %vm854_vm13, %v1109_v42 }
 0x482   : > { %2928 = vmatmul.msk.f32.gmra.mxu3 %vm854_vm13, %v982_v21 }
 0x483   : > { %v1111_v44 = vpop.permute.xlu0 %1110 }
 0x487   : > { %2937 = vmatmul.msk.f32.gmra.mxu1 %vm854_vm13, %v1111_v44 }
 0x48a   : > { %2946 = vmatmul.msk.f32.vlgmr.msra.gmra.mxu3 %vm854_vm13, %v1240_v43 }
 0x48f   : > { %2938 = vmatmul.msk.f32.gmra.mxu1 %vm854_vm13, %v1113_v45 }
 0x492   : > { %2947 = vmatmul.msk.f32.gmra.mxu3 %vm854_vm13, %v1242_v46 }
 0x49a   : > { %2948 = vmatmul.msk.f32.gmra.mxu3 %vm854_vm13, %v1244_v48 }
 0x4dd   : > { %v3751_v49 = vpop.f32.mrf.mxu3 }
 0x4e5   : > { %v3753_v50 = vpop.f32.mrf.mxu3 }
 0x4ed   : > { %v3755_v51 = vpop.f32.mrf.mxu3 }
 0x4f5   : > { %v1018_v52 = vpop.f32.mrf.mxu3 }
 0x4f6   : > { %v3757_v53 = vmul.f32 0.35355338, %v1018_v52 }
 0x4f8   : > { %v1030_v54 = vsel %vm896_vm14, %v3757_v53, -inf }
 0x4f9   : > { %1031 = vmax.xlane.f32.xlu0 %v1030_v54 }
 0x4fc   : > { %v1149_v55 = vpop.f32.mrf.mxu1 }
 0x4fd   : > { %v1158_v56 = vmul.f32 0.35355338, %v1149_v55  ;;  %v1021_v57 = vpop.f32.mrf.mxu3 }
 0x4fe   : > { %v3762_v59 = vmul.f32 0.35355338, %v1021_v57 }
 0x4ff   : > { %v1161_v58 = vsel %vm896_vm14, %v1158_v56, -inf }
 0x500   : > { %1162 = vmax.xlane.f32.xlu1 %v1161_v58  ;;  %v1033_v2 = vsel %vm896_vm14, %v3762_v59, -inf }
 0x504   : > { %v1152_v60 = vpop.f32.mrf.mxu1 }
 0x505   : > { %v1159_v62 = vmul.f32 0.35355338, %v1152_v60  ;;  %v1024_v63 = vpop.f32.mrf.mxu3 }
 0x506   : > { %v3764_v0 = vmul.f32 0.35355338, %v1024_v63 }
 0x507   : > { %v1164_v1 = vsel %vm896_vm14, %v1159_v62, -inf }
 0x508   : > { %1165 = vmax.xlane.f32.xlu0 %v1164_v1  ;;  %1034 = vmax.xlane.f32.xlu1 %v1033_v2  ;;  %v1036_v3 = vsel %vm903_vm15, %v3764_v0, -inf }
 0x509   : > { %1037 = vmax.xlane.f32.xlu2 %v1036_v3 }
 0x50c   : > { %v1155_v10 = vpop.f32.mrf.mxu1 }
 0x50d   : > { %v1280_v4 = vpop.f32.mrf.mxu3  ;;  %v1160_v11 = vmul.f32 0.35355338, %v1155_v10 }
 0x50e   : > { %v1289_v5 = vmul.f32 0.35355338, %v1280_v4 }
 0x50f   : > { %v1167_v12 = vsel %vm903_vm15, %v1160_v11, -inf }
 0x510   : > { %v1292_v6 = vsel %vm896_vm14, %v1289_v5, -inf }
 0x511   : > { %1293 = vmax.xlane.f32.xlu0 %v1292_v6 }
 0x515   : > { %v1283_v7 = vpop.f32.mrf.mxu3 }
 0x516   : > { %v1290_v8 = vmul.f32 0.35355338, %v1283_v7 }
 0x518   : > { %v1295_v9 = vsel %vm896_vm14, %v1290_v8, -inf }
 0x519   : > { %1296 = vmax.xlane.f32.xlu2 %v1295_v9 }
 0x51d   : > { %v1286_v44 = vpop.f32.mrf.mxu3 }
 0x51e   : > { %v1291_v46 = vmul.f32 0.35355338, %v1286_v44 }
 0x520   : > { %v1298_v52 = vsel %vm903_vm15, %v1291_v46, -inf }
 0x525   : > { %3103 = vrot.lane.b32.xlu0 %v3690_v61, %s4439_s29 }
 0x531   : > { %1067 = vrot.lane.b32.xlu2 %v3666_v47, %s4439_s29  ;;  %s4456_s29 = smov 24  }
 0x55a   : > { %1168 = vmax.xlane.f32.xlu2 %v1167_v12 }
 0x56c   : > { %v1032_v13 = vpop.xlane.xlu0 %1031 }
 0x56d   : > { %v1039_v43 = vsub.f32 %v3757_v53, %v1032_v13 }
 0x56f   : > { %v1042_v45 = vmul.f32 1.442695, %v1039_v43 }
 0x572   : > { %1198 = vrot.lane.b32.xlu2 %v3666_v47, %s4435_s1 }
 0x573   : > { %v1163_v14 = vpop.xlane.xlu1 %1162 }
 0x574   : > { %v1170_v15 = vsub.f32 %v1158_v56, %v1163_v14 }
 0x576   : > { %v1173_v16 = vmul.f32 1.442695, %v1170_v15 }
 0x578   : > { %3203 = vpow2.f32 %v1173_v16 }
 0x57b   : > { %v1166_v17 = vpop.xlane.xlu0 %1165  ;;  %v1035_v48 = vpop.xlane.xlu1 %1034 }
 0x57c   : > { %v1038_v21 = vpop.xlane.xlu2 %1037  ;;  %v1171_v30 = vsub.f32 %v1159_v62, %v1166_v17 }
 0x57d   : > { %v1041_v60 = vsub.f32 %v3764_v0, %v1038_v21 }
 0x57e   : > { %v3780_v18 = vpop.eup %3203  ;;  %v1175_v33 = vmul.f32 1.442695, %v1171_v30 }
 0x57f   : > { %v1179_v20 = vsel %vm896_vm14, %v3780_v18, 0.0  ;;  %v1046_v62 = vmul.f32 1.442695, %v1041_v60 }
 0x580   : > { %1180 = vadd.xlane.f32.xlu1 %v1179_v20 }
 0x584   : > { %v1294_v22 = vpop.xlane.xlu0 %1293 }
 0x585   : > { %v1301_v24 = vsub.f32 %v1289_v5, %v1294_v22 }
 0x587   : > { %v1304_v25 = vmul.f32 1.442695, %v1301_v24 }
 0x589   : > { %3205 = vpow2.f32 %v1304_v25 }
 0x58c   : > { %v1297_v26 = vpop.xlane.xlu2 %1296 }
 0x58d   : > { %v1302_v28 = vsub.f32 %v1290_v8, %v1297_v26 }
 0x58f   : > { %v3784_v29 = vpop.eup %3205  ;;  %v1306_v31 = vmul.f32 1.442695, %v1302_v28 }
 0x590   : > { %v1310_v32 = vsel %vm896_vm14, %v3784_v29, 0.0 }
 0x591   : > { %3207 = vpow2.f32 %v1306_v31  ;;  %1311 = vadd.xlane.f32.xlu0 %v1310_v32 }
 0x592   : > { %3209 = vpow2.f32 %v1175_v33 }
 0x593   : > { %3211 = vpow2.f32 %v1042_v45 }
 0x594   : > { %v1068_v34 = vpop.permute.xlu2 %1067 }
 0x595   : > { %2929 = vmatpush.msk.msrb.mxu2 %vm948_vm3, %v1068_v34 }
 0x597   : > { %v3789_v35 = vpop.eup %3207  ;;  %v3104_v37 = vpop.permute.xlu0 %3103 }
 0x598   : > { %v1313_v38 = vsel %vm896_vm14, %v3789_v35, 0.0  ;;  %v3105_v39 = vunpack.i.l.bf16 %v3104_v37  ;;  %v3106_v40 = vunpack.i.h.bf16 %v3104_v37  ;;  %v3795_v41 = vpop.eup %3209 }
 0x599   : > { %1329 = vrot.lane.b32.xlu1 %v3666_v47, %s4437_s27  ;;  %1314 = vadd.xlane.f32.xlu0 %v1313_v38  ;;  %v1182_v42 = vsel %vm896_vm14, %v3795_v41, 0.0  ;;  %v1040_v47 = vsub.f32 %v3762_v59, %v1035_v48  ;;  %v3212_v57 = vpop.eup %3211 }
 0x59a   : > { %1096 = vmatpush.msrb.mxu2 %v3105_v39  ;;  %v1048_v53 = vsel %vm896_vm14, %v3212_v57, 0.0 }
 0x59b   : > { %v1044_v54 = vmul.f32 1.442695, %v1040_v47 }
 0x59c   : > { %1097 = vmatpush.msrb.mxu2 %v3106_v40 }
 0x59d   : > { %3213 = vpow2.f32 %v1044_v54 }
 0x5a1   : > { %3108 = vrot.lane.b32.xlu1 %v3690_v61, %s4437_s27  ;;  %1183 = vadd.xlane.f32.xlu0 %v1182_v42  ;;  %s4453_s27 = smov 16  }
 0x5a3   : > { %v3214_v59 = vpop.eup %3213 }
 0x5a4   : > { %v1051_v3 = vsel %vm896_vm14, %v3214_v59, 0.0 }
 0x5cb   : > { %1299 = vmax.xlane.f32.xlu1 %v1298_v52 }
 0x5cd   : > { %v1169_v55 = vpop.xlane.xlu2 %1168 }
 0x5ce   : > { %v1172_v56 = vsub.f32 %v1160_v11, %v1169_v55 }
 0x5d0   : > { %v1177_v58 = vmul.f32 1.442695, %v1172_v56 }
 0x5d2   : > { %3215 = vpow2.f32 %v1177_v58 }
 0x5d3   : > { %1049 = vadd.xlane.f32.xlu1 %v1048_v53  ;;  %3217 = vpow2.f32 %v1046_v62 }
 0x5d5   : > { %v1199_v63 = vpop.permute.xlu2 %1198 }
 0x5d6   : > { %2939 = vmatpush.msk.msrb.mxu0 %vm948_vm3, %v1199_v63  ;;  %v1421_v63 = vld [vmem:[%s4406_s7 + $0x10] sm:$0xff] }
 0x5d8   : > { %v3807_v1 = vpop.eup %3215 }
 0x5d9   : > { %v1185_v2 = vsel %vm903_vm15, %v3807_v1, 0.0  ;;  %v3218_v0 = vpop.eup %3217 }
 0x5da   : > { %1186 = vadd.xlane.f32.xlu0 %v1185_v2  ;;  %v1054_v4 = vsel %vm903_vm15, %v3218_v0, 0.0  ;;  %v1419_v2 = vld [vmem:[%s4406_s7] sm:$0xff] }
 0x5db   : > { %1052 = vadd.xlane.f32.xlu1 %v1051_v3  ;;  %v1420_v3 = vld [vmem:[%s4406_s7 + $0x8] sm:$0xff] }
 0x5e3   : > { %1055 = vadd.xlane.f32.xlu1 %v1054_v4 }
 0x5f3   : > { %v1181_v5 = vpop.xlane.xlu1 %1180 }
 0x5fc   : > { %3113 = vrot.lane.b32.xlu1 %v3690_v61, %s4435_s1  ;;  %s3409_s1 = smov 8  }
 0x604   : > { %v1312_v24 = vpop.xlane.xlu0 %1311 }
 0x60b   : > { %v1330_v6 = vpop.permute.xlu1 %1329 }
 0x60c   : > { %2949 = vmatpush.msk.msra.mxu2 %vm948_vm3, %v1330_v6  ;;  %v1315_v28 = vpop.xlane.xlu0 %1314 }
 0x613   : > { %v3109_v7 = vpop.permute.xlu1 %3108 }
 0x614   : > { %v3110_v8 = vunpack.i.l.bf16 %v3109_v7  ;;  %v3111_v9 = vunpack.i.h.bf16 %v3109_v7  ;;  %v1184_v33 = vpop.xlane.xlu0 %1183 }
 0x616   : > { %1358 = vmatpush.msra.mxu2 %v3110_v8 }
 0x618   : > { %1359 = vmatpush.msra.mxu2 %v3111_v9 }
 0x63e   : > { %v1300_v10 = vpop.xlane.xlu1 %1299 }
 0x63f   : > { %v1303_v11 = vsub.f32 %v1291_v46, %v1300_v10 }
 0x641   : > { %v1308_v12 = vmul.f32 1.442695, %v1303_v11 }
 0x643   : > { %3219 = vpow2.f32 %v1308_v12 }
 0x646   : > { %v1050_v13 = vpop.xlane.xlu1 %1049 }
 0x647   : > { %3221 = vrcp.f32 %v1050_v13 }
 0x649   : > { %v3220_v14 = vpop.eup %3219 }
 0x64a   : > { %v1316_v15 = vsel %vm903_vm15, %v3220_v14, 0.0 }
 0x64b   : > { %1317 = vadd.xlane.f32.xlu1 %v1316_v15 }
 0x64d   : > { %v3222_v61 = vpop.eup %3221 }
 0x64e   : > { %v1053_v16 = vpop.xlane.xlu1 %1052  ;;  %v1060_v17 = vmul.f32 %v3222_v61, %v3212_v57 }
 0x64f   : > { %3223 = vrcp.f32 %v1053_v16 }
 0x650   : > { %2930 = vmatmul.msk.f32.vlgmr.msrb.gmra.mxu2 %vm896_vm14, %v1060_v17 }
 0x655   : > { %v3224_v20 = vpop.eup %3223 }
 0x656   : > { %v1056_v21 = vpop.xlane.xlu1 %1055  ;;  %v1061_v22 = vmul.f32 %v3224_v20, %v3214_v59  ;;  %v1422_v59 = vld [vmem:[%s4406_s7 + $0x18] sm:$0xff] }
 0x657   : > { %3225 = vrcp.f32 %v1056_v21 }
 0x658   : > { %2931 = vmatmul.msk.f32.gmra.mxu2 %vm896_vm14, %v1061_v22  ;;  %3227 = vrcp.f32 %v1312_v24 }
 0x659   : > { %3229 = vrcp.f32 %v1315_v28 }
 0x65a   : > { %3231 = vrcp.f32 %v1181_v5 }
 0x65b   : > { %3233 = vrcp.f32 %v1184_v33 }
 0x65d   : > { %v3226_v25 = vpop.eup %3225 }
 0x65e   : > { %v1062_v26 = vmul.f32 %v3226_v25, %v3218_v0  ;;  %v3228_v30 = vpop.eup %3227  ;;  %v1423_v0 = vpack.c.bf16 %v1420_v3, %v1419_v2 }
 0x65f   : > { %v1322_v31 = vmul.f32 %v3228_v30, %v3784_v29  ;;  %v3230_v32 = vpop.eup %3229  ;;  %v1187_v29 = vpop.xlane.xlu0 %1186  ;;  %v3170_v30 = vld [vmem:[%s4407_s8] ss:$0 sm:$0xff] }
 0x660   : > { %2932 = vmatmul.msk.f32.gmra.mxu2 %vm896_vm14, %v1062_v26  ;;  %v1323_v37 = vmul.f32 %v3230_v32, %v3789_v35  ;;  %v3232_v38 = vpop.eup %3231  ;;  %3235 = vrcp.f32 %v1187_v29 }
 0x661   : > { %v1191_v42 = vmul.f32 %v3232_v38, %v3780_v18  ;;  %v3234_v43 = vpop.eup %3233 }
 0x662   : > { %v1192_v44 = vmul.f32 %v3234_v43, %v3795_v41 }
 0x666   : > { %v3236_v35 = vpop.eup %3235 }
 0x667   : > { %v1193_v45 = vmul.f32 %v3236_v35, %v3807_v1  ;;  %v1424_v1 = vpack.c.bf16 %v1422_v59, %v1421_v63  ;;  %v1538_v59 = vld [vmem:[%s4410_s11] sm:$0xff] }
 0x668   : > { %2950 = vmatmul.msk.f32.vlgmr.msra.gmra.mxu2 %vm896_vm14, %v1322_v31 }
 0x669   : > { %1441 = vmatpush.bf16.msra.mxu1 %v1424_v1  ;;  %v1539_v1 = vld [vmem:[%s4410_s11 + $0x8] sm:$0xff] }
 0x66a   : > { %v1542_v3 = vpack.c.bf16 %v1539_v1, %v1538_v59  ;;  %v1701_v59 = vld [vmem:[%s4412_s13 + $0x38] sm:$0xff] }
 0x66d   : > { %1442 = vmatpush.bf16.msra.mxu1 %v1423_v0 }
 0x66e   : > { %v3114_v34 = vpop.permute.xlu1 %3113 }
 0x66f   : > { %v3115_v39 = vunpack.i.l.bf16 %v3114_v34  ;;  %v3116_v40 = vunpack.i.h.bf16 %v3114_v34 }
 0x670   : > { %2951 = vmatmul.msk.f32.gmra.mxu2 %vm896_vm14, %v1323_v37 }
 0x671   : > { %1227 = vmatpush.msrb.mxu0 %v3115_v39 }
 0x673   : > { %1228 = vmatpush.msrb.mxu0 %v3116_v40 }
 0x674   : > { %2940 = vmatmul.msk.f32.vlgmr.msrb.gmra.mxu0 %vm896_vm14, %v1191_v42 }
 0x67c   : > { %2941 = vmatmul.msk.f32.gmra.mxu0 %vm896_vm14, %v1192_v44 }
 0x684   : > { %2942 = vmatmul.msk.f32.gmra.mxu0 %vm896_vm14, %v1193_v45 }
 0x6be   : > { %v1318_v46 = vpop.xlane.xlu1 %1317 }
 0x6bf   : > { %3237 = vrcp.f32 %v1318_v46 }
 0x6c5   : > { %v3238_v48 = vpop.eup %3237 }
 0x6c6   : > { %v1324_v47 = vmul.f32 %v3238_v48, %v3220_v14 }
 0x6c8   : > { %2952 = vmatmul.msk.f32.gmra.mxu2 %vm896_vm14, %v1324_v47 }
 0x6d3   : > { %v1099_v18 = vpop.f32.mrf.mxu2 }
 0x6db   : > { %v1102_v52 = vpop.f32.mrf.mxu2 }
 0x6dc   : > { %v3117_v54 = vpack.i.bf16 %v1102_v52, %v1099_v18 }
 0x6de   : > { %3118 = vrot.lane.b32.xlu0 %v3117_v54, %s3409_s1 }
 0x6e3   : > { %v1105_v41 = vpop.f32.mrf.mxu2 }
 0x6eb   : > { %v1361_v56 = vpop.f32.mrf.mxu2 }
 0x6f1   : > { %v1230_v55 = vpop.f32.mrf.mxu0 }
 0x6f3   : > { %v1364_v60 = vpop.f32.mrf.mxu2 }
 0x6f4   : > { %v3127_v62 = vpack.i.bf16 %v1364_v60, %v1361_v56  ;;  %v1541_v60 = vld [vmem:[%s4410_s11 + $0x18] sm:$0xff] }
 0x6f9   : > { %v1233_v57 = vpop.f32.mrf.mxu0 }
 0x6fa   : > { %v3122_v58 = vpack.i.bf16 %v1233_v57, %v1230_v55 }
 0x6fc   : > { %3123 = vrot.lane.b32.xlu2 %v3122_v58, %s4453_s27  ;;  %v1540_v58 = vld [vmem:[%s4410_s11 + $0x10] sm:$0xff] }
 0x701   : > { %v1236_v53 = vpop.f32.mrf.mxu0 }
 0x702   : > { %1389 = vrot.lane.b32.xlu0 %v1236_v53, %s4453_s27  ;;  %v1543_v53 = vpack.c.bf16 %v1541_v60, %v1540_v58  ;;  %s4488_s27 = smov 56  }
 0x704   : > { %3128 = vrot.lane.b32.xlu2 %v3127_v62, %s4456_s29  ;;  %1560 = vmatpush.bf16.msra.mxu0 %v1543_v53 }
 0x708   : > { %1561 = vmatpush.bf16.msra.mxu0 %v1542_v3 }
 0x70c   : > { %1377 = vrot.lane.b32.xlu2 %v1105_v41, %s3409_s1 }
 0x74b   : > { %v1367_v4 = vpop.f32.mrf.mxu2 }
 0x74c   : > { %1401 = vrot.lane.b32.xlu2 %v1367_v4, %s4456_s29 }
 0x750   : > { %v3119_v6 = vpop.permute.xlu0 %3118 }
 0x751   : > { %v3121_v7 = vunpack.i.h.bf16 %v3119_v6  ;;  %v3120_v8 = vunpack.i.l.bf16 %v3119_v6 }
 0x753   : > { %v1407_v12 = vsel %vm854_vm13, %v3753_v50, %v3121_v7  ;;  %v1406_v13 = vsel %vm854_vm13, %v3751_v49, %v3120_v8 }
 0x756   : > { %v3124_v5 = vpop.permute.xlu2 %3123 }
 0x757   : > { %v3126_v9 = vunpack.i.h.bf16 %v3124_v5  ;;  %v3125_v10 = vunpack.i.l.bf16 %v3124_v5 }
 0x759   : > { %v1411_v61 = vsel %vm1409_vm4, %v1407_v12, %v3126_v9  ;;  %v1410_v16 = vsel %vm1409_vm4, %v1406_v13, %v3125_v10 }
 0x75e   : > { %v3129_v11 = vpop.permute.xlu2 %3128 }
 0x75f   : > { %v3131_v14 = vunpack.i.h.bf16 %v3129_v11  ;;  %v3130_v15 = vunpack.i.l.bf16 %v3129_v11 }
 0x761   : > { %v1414_v17 = vsel %vm1413_vm5, %v1410_v16, %v3130_v15  ;;  %v1415_v20 = vsel %vm1413_vm5, %v1411_v61, %v3131_v14 }
 0x762   : > { %v1417_v21 = vpack.c.bf16 %v1415_v20, %v1414_v17  ;;  %v3171_v17 = vld [vmem:[%s4408_s9] ss:$0 sm:$0xff] }
 0x764   : > { %2953 = vmatmul.msk.bf16.vlgmr.msra.gmra.mxu1 %vm722_vm1, %v1417_v21 }
 0x766   : > { %v1378_v22 = vpop.permute.xlu2 %1377 }
 0x767   : > { %v1408_v50 = vsel %vm854_vm13, %v3755_v51, %v1378_v22 }
 0x774   : > { %v1390_v24 = vpop.permute.xlu0 %1389 }
 0x775   : > { %v1412_v49 = vsel %vm1409_vm4, %v1408_v50, %v1390_v24  ;;  %v3172_v24 = vld [vmem:[%s4409_s10] ss:$0 sm:$0xff] }
 0x7a6   : > { %v1402_v25 = vpop.permute.xlu2 %1401 }
 0x7a7   : > { %v1416_v26 = vsel %vm1413_vm5, %v1412_v49, %v1402_v25 }
 0x7a8   : > { %v1418_v28 = vpack.c.bf16 %v1416_v26, %v1416_v26 }
 0x7aa   : > { %2954 = vmatmul.msk.bf16.gmra.mxu1 %vm722_vm1, %v1418_v28 }
 0x7e1   : > { %v1444_v31 = vpop.f32.mrf.mxu1 }
 0x7e2   : > { %v1445_v32 = vadd.f32 %v3170_v30, %v1444_v31 }
 0x7e4   : > { %v3867_v33 = vadd.f32 %v1445_v32, %v3604_v19 }
 0x7e6   : > { %v1458_v51 = vsel %vm722_vm1, %v3867_v33, 0.0 }
 0x7e7   : > { %1459 = vadd.xlane.f32.xlu0 %v1458_v51 }
 0x7e9   : > { %v1446_v34 = vpop.f32.mrf.mxu1 }
 0x7ea   : > { %v1447_v37 = vadd.f32 %v3170_v30, %v1446_v34 }
 0x7ec   : > { %v3872_v38 = vadd.f32 %v1447_v37, %v3608_v23 }
 0x7ee   : > { %v1461_v39 = vsel %vm722_vm1, %v3872_v38, 0.0 }
 0x7ef   : > { %1462 = vadd.xlane.f32.xlu1 %v1461_v39 }
 0x827   : > { %v1449_v40 = vpop.f32.mrf.mxu1 }
 0x828   : > { %v1450_v42 = vadd.f32 %v3170_v30, %v1449_v40 }
 0x82a   : > { %v3877_v29 = vadd.f32 %v1450_v42, %v3612_v27 }
 0x82c   : > { %v1464_v19 = vsel %vm729_vm2, %v3877_v29, 0.0 }
 0x82d   : > { %1465 = vadd.xlane.f32.xlu2 %v1464_v19 }
 0x82f   : > { %v1451_v43 = vpop.f32.mrf.mxu1 }
 0x85a   : > { %v1460_v44 = vpop.xlane.xlu0 %1459 }
 0x85b   : > { %v1467_v35 = vmul.f32 %v1460_v44, %v3616_v36 }
 0x85d   : > { %v1470_v23 = vsub.f32 %v3867_v33, %v1467_v35 }
 0x85f   : > { %v1473_v45 = vmul.f32 %v1470_v23, %v1470_v23 }
 0x861   : > { %v1476_v46 = vsel %vm722_vm1, %v1473_v45, 0.0 }
 0x862   : > { %v1463_v48 = vpop.xlane.xlu1 %1462  ;;  %1477 = vadd.xlane.f32.xlu1 %v1476_v46  ;;  %v3921_v46 = vld [vmem:[%s4411_s12] ss:$0 sm:$0xff] }
 0x863   : > { %v1468_v47 = vmul.f32 %v1463_v48, %v3616_v36 }
 0x865   : > { %v1471_v27 = vsub.f32 %v3872_v38, %v1468_v47 }
 0x867   : > { %v1474_v18 = vmul.f32 %v1471_v27, %v1471_v27 }
 0x869   : > { %v1479_v52 = vsel %vm722_vm1, %v1474_v18, 0.0 }
 0x86a   : > { %1480 = vadd.xlane.f32.xlu1 %v1479_v52 }
 0x8a0   : > { %v1466_v54 = vpop.xlane.xlu2 %1465 }
 0x8a1   : > { %v1469_v41 = vmul.f32 %v1466_v54, %v3616_v36 }
 0x8a3   : > { %v3889_v55 = vsub.f32 %v3877_v29, %v1469_v41 }
 0x8a5   : > { %v1475_v56 = vmul.f32 %v3889_v55, %v3889_v55 }
 0x8a7   : > { %v1482_v57 = vsel %vm729_vm2, %v1475_v56, 0.0 }
 0x8a8   : > { %1483 = vadd.xlane.f32.xlu1 %v1482_v57 }
 0x8d5   : > { %v1478_v62 = vpop.xlane.xlu1 %1477 }
 0x8d6   : > { %v1485_v63 = vmul.f32 %v1478_v62, %v3616_v36 }
 0x8d8   : > { %v1488_v2 = vadd.f32 1e-05, %v1485_v63  ;;  %v1700_v63 = vld [vmem:[%s4412_s13 + $0x30] sm:$0xff] }
 0x8d9   : > { %v1705_v3 = vpack.c.bf16 %v1701_v59, %v1700_v63 }
 0x8da   : > { %3239 = vrsqrt.f32 %v1488_v2  ;;  %vm1497_vm7 = vweird.f32 %v1488_v2 }
 0x8db   : > { %1720 = vmatpush.bf16.msrb.mxu3 %v1705_v3 }
 0x8dd   : > { %v1481_v0 = vpop.xlane.xlu1 %1480 }
 0x8de   : > { %v1486_v4 = vmul.f32 %v1481_v0, %v3616_v36 }
 0x8e0   : > { %v3240_v5 = vpop.eup %3239  ;;  %v1489_v6 = vadd.f32 1e-05, %v1486_v4 }
 0x8e1   : > { %v1492_v7 = vmul.f32 %v3240_v5, %v1488_v2  ;;  %vm1498_vm6 = vweird.f32 %v3240_v5 }
 0x8e2   : > { %3241 = vrsqrt.f32 %v1489_v6  ;;  %vm1499_vm8 = vmor %vm1497_vm7, %vm1498_vm6  ;;  %vm1507_vm10 = vweird.f32 %v1489_v6 }
 0x8e3   : > { %v1493_v8 = vmul.f32 %v3240_v5, %v1492_v7 }
 0x8e5   : > { %v1494_v9 = vmul.f32 0.5, %v1493_v8 }
 0x8e7   : > { %v1495_v10 = vsub.f32 1.5, %v1494_v9 }
 0x8e8   : > { %v3242_v11 = vpop.eup %3241 }
 0x8e9   : > { %v1496_v12 = vmul.f32 %v3240_v5, %v1495_v10  ;;  %v1502_v13 = vmul.f32 %v3242_v11, %v1489_v6  ;;  %vm1508_vm9 = vweird.f32 %v3242_v11  ;;  %v1699_v6 = vld [vmem:[%s4412_s13 + $0x28] sm:$0xff] }
 0x8ea   : > { %vm1509_vm11 = vmor %vm1507_vm10, %vm1508_vm9 }
 0x8eb   : > { %v1503_v14 = vmul.f32 %v3242_v11, %v1502_v13  ;;  %v1500_v15 = vsel %vm1499_vm8, %v3240_v5, %v1496_v12  ;;  %v1698_v5 = vld [vmem:[%s4412_s13 + $0x20] sm:$0xff] }
 0x8ec   : > { %v1521_v20 = vmul.f32 %v1500_v15, %v1470_v23  ;;  %v1704_v8 = vpack.c.bf16 %v1699_v6, %v1698_v5  ;;  %v1696_v15 = vld [vmem:[%s4412_s13 + $0x10] sm:$0xff] }
 0x8ed   : > { %v1504_v61 = vmul.f32 0.5, %v1503_v14 }
 0x8ee   : > { %v1527_v50 = vmul.f32 %v3171_v17, %v1521_v20  ;;  %1721 = vmatpush.bf16.msrb.mxu3 %v1704_v8 }
 0x8ef   : > { %v1505_v16 = vsub.f32 1.5, %v1504_v61  ;;  %v1697_v61 = vld [vmem:[%s4412_s13 + $0x18] sm:$0xff] }
 0x8f0   : > { %v1533_v26 = vadd.f32 %v3172_v24, %v1527_v50 }
 0x8f1   : > { %v1506_v21 = vmul.f32 %v3242_v11, %v1505_v16 }
 0x8f3   : > { %v1510_v22 = vsel %vm1509_vm11, %v3242_v11, %v1506_v21 }
 0x8f4   : > { %v1522_v49 = vmul.f32 %v1510_v22, %v1471_v27 }
 0x8f6   : > { %v1528_v25 = vmul.f32 %v3171_v17, %v1522_v49 }
 0x8f8   : > { %v1534_v28 = vadd.f32 %v3172_v24, %v1528_v25  ;;  %v1694_v25 = vld [vmem:[%s4412_s13] sm:$0xff] }
 0x8fa   : > { %v1536_v30 = vpack.c.bf16 %v1534_v28, %v1533_v26  ;;  %v1695_v26 = vld [vmem:[%s4412_s13 + $0x8] sm:$0xff] }
 0x8fc   : > { %2955 = vmatmul.msk.bf16.vlgmr.msra.gmra.mxu0 %vm722_vm1, %v1536_v30  ;;  %v1702_v30 = vpack.c.bf16 %v1695_v26, %v1694_v25 }
 0x91b   : > { %v1484_v31 = vpop.xlane.xlu1 %1483 }
 0x91c   : > { %v1487_v32 = vmul.f32 %v1484_v31, %v3616_v36 }
 0x91e   : > { %v1490_v51 = vadd.f32 1e-05, %v1487_v32 }
 0x920   : > { %3243 = vrsqrt.f32 %v1490_v51  ;;  %vm1517_vm6 = vweird.f32 %v1490_v51 }
 0x926   : > { %v3244_v34 = vpop.eup %3243 }
 0x927   : > { %v1512_v37 = vmul.f32 %v3244_v34, %v1490_v51  ;;  %vm1518_vm12 = vweird.f32 %v3244_v34 }
 0x928   : > { %vm1519_vm7 = vmor %vm1517_vm6, %vm1518_vm12 }
 0x929   : > { %v1513_v39 = vmul.f32 %v3244_v34, %v1512_v37 }
 0x92b   : > { %v1514_v40 = vmul.f32 0.5, %v1513_v39 }
 0x92d   : > { %v1515_v42 = vsub.f32 1.5, %v1514_v40 }
 0x92f   : > { %v1516_v19 = vmul.f32 %v3244_v34, %v1515_v42 }
 0x931   : > { %v1520_v43 = vsel %vm1519_vm7, %v3244_v34, %v1516_v19 }
 0x932   : > { %v1523_v44 = vmul.f32 %v1520_v43, %v3889_v55 }
 0x934   : > { %v1529_v35 = vmul.f32 %v3171_v17, %v1523_v44  ;;  %v1703_v17 = vpack.c.bf16 %v1697_v61, %v1696_v15 }
 0x936   : > { %v1535_v23 = vadd.f32 %v3172_v24, %v1529_v35  ;;  %1722 = vmatpush.bf16.msrb.mxu3 %v1703_v17 }
 0x938   : > { %v1537_v45 = vpack.c.bf16 %v1535_v23, %v1535_v23 }
 0x93a   : > { %2956 = vmatmul.msk.bf16.gmra.mxu0 %vm722_vm1, %v1537_v45  ;;  %1723 = vmatpush.bf16.msrb.mxu3 %v1702_v30 }
 0x979   : > { %v1563_v48 = vpop.f32.mrf.mxu0 }
 0x97a   : > { %v3924_v47 = vadd.f32 %v3921_v46, %v1563_v48 }
 0x97c   : > { %v3927_v27 = vmul.f32 0.70710677, %v3924_v47  ;;  %v1572_v8 = vmul.f32 0.5, %v3924_v47 }
 0x97e   : > { %v1578_v18 = vand.u32 2147483647, %v3927_v27 }
 0x980   : > { %v1581_v52 = vmul.f32 0.3275911, %v1578_v18  ;;  %v1659_v13 = vsub.f32 0.0, %v1578_v18 }
 0x981   : > { %v1565_v54 = vpop.f32.mrf.mxu0 }
 0x982   : > { %v1584_v41 = vadd.f32 1.0, %v1581_v52  ;;  %v3931_v55 = vadd.f32 %v3921_v46, %v1565_v54  ;;  %v1662_v24 = vmul.f32 %v1659_v13, %v1578_v18 }
 0x984   : > { %3245 = vrcp.f32 %v1584_v41  ;;  %v3934_v56 = vmul.f32 0.70710677, %v3931_v55  ;;  %v1598_v2 = vand.u32 2147483648, %v1584_v41  ;;  %v1596_v4 = vand.u32 2147483647, %v1584_v41 }
 0x985   : > { %vm1592_vm9 = vweird.f32 %v1584_v41  ;;  %v1665_v34 = vmul.f32 1.442695, %v1662_v24 }
 0x986   : > { %v1579_v57 = vand.u32 2147483647, %v3934_v56  ;;  %v1599_v9 = vor.u32 1.1754944e-38, %v1598_v2  ;;  %vm1597_vm11 = vcmp.eq.f32.partialorder %v1596_v4, 8.507059e+37 }
 0x988   : > { %v1582_v58 = vmul.f32 0.3275911, %v1579_v57  ;;  %v1660_v42 = vsub.f32 0.0, %v1579_v57 }
 0x98a   : > { %v3246_v60 = vpop.eup %3245  ;;  %v1585_v62 = vadd.f32 1.0, %v1582_v58  ;;  %v1663_v23 = vmul.f32 %v1660_v42, %v1579_v57 }
 0x98b   : > { %v1588_v53 = vmul.f32 %v3246_v60, %v1584_v41  ;;  %vm1593_vm8 = vweird.f32 %v3246_v60 }
 0x98c   : > { %3247 = vrcp.f32 %v1585_v62  ;;  %vm1594_vm10 = vmor %vm1592_vm9, %vm1593_vm8  ;;  %v1613_v22 = vand.u32 2147483648, %v1585_v62  ;;  %v1611_v49 = vand.u32 2147483647, %v1585_v62  ;;  %vm1607_vm6 = vweird.f32 %v1585_v62 }
 0x98d   : > { %v1589_v1 = vsub.f32 1.0, %v1588_v53  ;;  %3249 = vpow2.f32 %v1665_v34  ;;  %v1667_v54 = vmul.f32 1.442695, %v1663_v23  ;;  %vm1677_vm9 = vcmp.ge.f32.partialorder %v3927_v27, 0.0 }
 0x98e   : > { %v1614_v51 = vor.u32 1.1754944e-38, %v1613_v22  ;;  %vm1612_vm8 = vcmp.eq.f32.partialorder %v1611_v49, 8.507059e+37 }
 0x98f   : > { %v1590_v0 = vmul.f32 %v3246_v60, %v1589_v1  ;;  %3251 = vpow2.f32 %v1667_v54 }
 0x991   : > { %v1591_v7 = vadd.f32 %v3246_v60, %v1590_v0 }
 0x992   : > { %v3248_v10 = vpop.eup %3247 }
 0x993   : > { %v1595_v11 = vsel %vm1594_vm10, %v3246_v60, %v1591_v7  ;;  %v1603_v14 = vmul.f32 %v3248_v10, %v1585_v62  ;;  %vm1608_vm12 = vweird.f32 %v3248_v10  ;;  %v3250_v41 = vpop.eup %3249  ;;  %vm1678_vm10 = vcmp.ge.f32.partialorder %v3934_v56, 0.0 }
 0x994   : > { %v1600_v12 = vsel %vm1597_vm11, %v1599_v9, %v1595_v11  ;;  %vm1609_vm7 = vmor %vm1607_vm6, %vm1608_vm12  ;;  %v1573_v9 = vmul.f32 0.5, %v3931_v55 }
 0x995   : > { %v1632_v16 = vmul.f32 1.0614054, %v1600_v12  ;;  %v1604_v20 = vsub.f32 1.0, %v1603_v14  ;;  %v3252_v3 = vpop.eup %3251 }
 0x997   : > { %v1635_v21 = vadd.f32 -1.4531521, %v1632_v16  ;;  %v1605_v50 = vmul.f32 %v3248_v10, %v1604_v20 }
 0x999   : > { %v1638_v28 = vmul.f32 %v1635_v21, %v1600_v12  ;;  %v1606_v31 = vadd.f32 %v3248_v10, %v1605_v50 }
 0x99b   : > { %v1641_v32 = vadd.f32 1.4214138, %v1638_v28  ;;  %v1610_v37 = vsel %vm1609_vm7, %v3248_v10, %v1606_v31 }
 0x99c   : > { %v1615_v40 = vsel %vm1612_vm8, %v1614_v51, %v1610_v37 }
 0x99d   : > { %v1644_v39 = vmul.f32 %v1641_v32, %v1600_v12  ;;  %v1633_v19 = vmul.f32 1.0614054, %v1615_v40 }
 0x99f   : > { %v1647_v43 = vadd.f32 -0.28449672, %v1644_v39  ;;  %v1636_v44 = vadd.f32 -1.4531521, %v1633_v19 }
 0x9a1   : > { %v1650_v35 = vmul.f32 %v1647_v43, %v1600_v12  ;;  %v1639_v45 = vmul.f32 %v1636_v44, %v1615_v40 }
 0x9a3   : > { %v1653_v48 = vadd.f32 0.2548296, %v1650_v35  ;;  %v1642_v18 = vadd.f32 1.4214138, %v1639_v45 }
 0x9a5   : > { %v1656_v52 = vmul.f32 %v1653_v48, %v1600_v12  ;;  %v1645_v58 = vmul.f32 %v1642_v18, %v1615_v40 }
 0x9a7   : > { %v1671_v60 = vmul.f32 %v3250_v41, %v1656_v52  ;;  %v1648_v53 = vadd.f32 -0.28449672, %v1645_v58  ;;  %v3174_v41 = vld [vmem:[%s4413_s14] ss:$0 sm:$0xff] }
 0x9a9   : > { %v1674_v62 = vsub.f32 1.0, %v1671_v60  ;;  %v1651_v63 = vmul.f32 %v1648_v53, %v1615_v40 }
 0x9ab   : > { %v1654_v59 = vadd.f32 0.2548296, %v1651_v63  ;;  %v1680_v1 = vsub.f32 0.0, %v1674_v62 }
 0x9ad   : > { %v1657_v2 = vmul.f32 %v1654_v59, %v1615_v40  ;;  %v1683_v57 = vsel %vm1677_vm9, %v1674_v62, %v1680_v1 }
 0x9ae   : > { %v1686_v6 = vadd.f32 1.0, %v1683_v57 }
 0x9af   : > { %v1672_v0 = vmul.f32 %v3252_v3, %v1657_v2 }
 0x9b0   : > { %v1689_v13 = vmul.f32 %v1686_v6, %v1572_v8 }
 0x9b1   : > { %v1675_v4 = vsub.f32 1.0, %v1672_v0 }
 0x9b3   : > { %v1681_v5 = vsub.f32 0.0, %v1675_v4 }
 0x9b5   : > { %v1684_v7 = vsel %vm1678_vm10, %v1675_v4, %v1681_v5 }
 0x9b6   : > { %v1687_v10 = vadd.f32 1.0, %v1684_v7 }
 0x9b7   : > { %v1568_v11 = vpop.f32.mrf.mxu0 }
 0x9b8   : > { %v1569_v12 = vadd.f32 %v3921_v46, %v1568_v11  ;;  %v1690_v14 = vmul.f32 %v1687_v10, %v1573_v9 }
 0x9ba   : > { %v1577_v15 = vmul.f32 0.70710677, %v1569_v12  ;;  %v1692_v61 = vpack.c.bf16 %v1690_v14, %v1689_v13  ;;  %v1574_v48 = vmul.f32 0.5, %v1569_v12 }
 0x9bc   : > { %v1580_v27 = vand.u32 2147483647, %v1577_v15  ;;  %2957 = vmatmul.msk.bf16.vlgmr.msrb.gmra.mxu3 %vm695_vm0, %v1692_v61  ;;  %vm1679_vm8 = vcmp.ge.f32.partialorder %v1577_v15, 0.0 }
 0x9be   : > { %v1583_v16 = vmul.f32 0.3275911, %v1580_v27  ;;  %v1661_v25 = vsub.f32 0.0, %v1580_v27 }
 0x9bf   : > { %v1570_v17 = vpop.f32.mrf.mxu0 }
 0x9c0   : > { %v1586_v20 = vadd.f32 1.0, %v1583_v16  ;;  %v1664_v31 = vmul.f32 %v1661_v25, %v1580_v27  ;;  %v2963_v16 = vld [vmem:[%s4478_s0 + $0x30] sm:$0xff]  ;;  %v2964_v17 = vld [vmem:[%s4478_s0 + $0x38] sm:$0xff] }
 0x9c2   : > { %3253 = vrcp.f32 %v1586_v20  ;;  %v1628_v22 = vand.u32 2147483648, %v1586_v20  ;;  %v1626_v24 = vand.u32 2147483647, %v1586_v20  ;;  %vm1622_vm12 = vweird.f32 %v1586_v20 }
 0x9c3   : > { %v1669_v34 = vmul.f32 1.442695, %v1664_v31 }
 0x9c4   : > { %v1629_v46 = vor.u32 1.1754944e-38, %v1628_v22  ;;  %vm1627_vm7 = vcmp.eq.f32.partialorder %v1626_v24, 8.507059e+37  ;;  %v2962_v22 = vld [vmem:[%s4478_s0 + $0x28] sm:$0xff] }
 0x9c5   : > { %3255 = vpow2.f32 %v1669_v34 }
 0x9c8   : > { %v3254_v56 = vpop.eup %3253 }
 0x9c9   : > { %v1618_v21 = vmul.f32 %v3254_v56, %v1586_v20  ;;  %vm1623_vm11 = vweird.f32 %v3254_v56  ;;  %v1827_v20 = vpack.c.bf16 %v2964_v17, %v2963_v16 }
 0x9ca   : > { %vm1624_vm6 = vmor %vm1622_vm12, %vm1623_vm11 }
 0x9cb   : > { %v1619_v47 = vsub.f32 1.0, %v1618_v21  ;;  %v3256_v43 = vpop.eup %3255  ;;  %1845 = vmatpush.bf16.msrb.mxu2 %v1827_v20 }
 0x9cd   : > { %v1620_v55 = vmul.f32 %v3254_v56, %v1619_v47  ;;  %v2961_v47 = vld [vmem:[%s4478_s0 + $0x20] sm:$0xff] }
 0x9ce   : > { %v1826_v24 = vpack.c.bf16 %v2962_v22, %v2961_v47 }
 0x9cf   : > { %v1621_v50 = vadd.f32 %v3254_v56, %v1620_v55 }
 0x9d0   : > { %1846 = vmatpush.bf16.msrb.mxu2 %v1826_v24 }
 0x9d1   : > { %v1625_v49 = vsel %vm1624_vm6, %v3254_v56, %v1621_v50 }
 0x9d2   : > { %v1630_v26 = vsel %vm1627_vm7, %v1629_v46, %v1625_v49 }
 0x9d3   : > { %v1634_v28 = vmul.f32 1.0614054, %v1630_v26 }
 0x9d5   : > { %v1637_v30 = vadd.f32 -1.4531521, %v1634_v28 }
 0x9d7   : > { %v1640_v32 = vmul.f32 %v1637_v30, %v1630_v26 }
 0x9d9   : > { %v1643_v51 = vadd.f32 1.4214138, %v1640_v32 }
 0x9db   : > { %v1646_v37 = vmul.f32 %v1643_v51, %v1630_v26 }
 0x9dd   : > { %v1649_v39 = vadd.f32 -0.28449672, %v1646_v37 }
 0x9df   : > { %v1652_v40 = vmul.f32 %v1649_v39, %v1630_v26 }
 0x9e1   : > { %v1655_v42 = vadd.f32 0.2548296, %v1652_v40 }
 0x9e3   : > { %v1658_v19 = vmul.f32 %v1655_v42, %v1630_v26 }
 0x9e5   : > { %v1673_v44 = vmul.f32 %v3256_v43, %v1658_v19  ;;  %v3175_v19 = vld [vmem:[%s4479_s30 + $0x1] ss:$0 sm:$0xff] }
 0x9e7   : > { %v1676_v35 = vsub.f32 1.0, %v1673_v44 }
 0x9e9   : > { %v1682_v23 = vsub.f32 0.0, %v1676_v35 }
 0x9eb   : > { %v1685_v45 = vsel %vm1679_vm8, %v1676_v35, %v1682_v23  ;;  %v3176_v23 = vld [vmem:[%s4480_s4 + $0x1] ss:$0 sm:$0xff] }
 0x9ec   : > { %v1688_v18 = vadd.f32 1.0, %v1685_v45 }
 0x9ee   : > { %v1691_v52 = vmul.f32 %v1688_v18, %v1574_v48 }
 0x9f0   : > { %v1693_v54 = vpack.c.bf16 %v1691_v52, %v1691_v52 }
 0x9f2   : > { %2958 = vmatmul.msk.bf16.gmra.mxu3 %vm695_vm0, %v1693_v54 }
 0xa3f   : > { %v1725_v58 = vpop.f32.mrf.mxu3 }
 0xa40   : > { %v1726_v60 = vadd.f32 %v3174_v41, %v1725_v58 }
 0xa42   : > { %v3972_v53 = vadd.f32 %v1726_v60, %v3867_v33 }
 0xa44   : > { %v1741_v62 = vsel %vm722_vm1, %v3972_v53, 0.0 }
 0xa45   : > { %1742 = vadd.xlane.f32.xlu1 %v1741_v62 }
 0xa47   : > { %v1727_v63 = vpop.f32.mrf.mxu3 }
 0xa48   : > { %v1728_v59 = vadd.f32 %v3174_v41, %v1727_v63 }
 0xa4a   : > { %v3977_v1 = vadd.f32 %v1728_v59, %v3872_v38 }
 0xa4c   : > { %v1744_v2 = vsel %vm722_vm1, %v3977_v1, 0.0 }
 0xa4d   : > { %1745 = vadd.xlane.f32.xlu0 %v1744_v2 }
 0xa75   : > { %v1730_v3 = vpop.f32.mrf.mxu3 }
 0xa76   : > { %v1731_v0 = vadd.f32 %v3174_v41, %v1730_v3 }
 0xa78   : > { %v3982_v57 = vadd.f32 %v1731_v0, %v3877_v29 }
 0xa7a   : > { %v1747_v33 = vsel %vm729_vm2, %v3982_v57, 0.0 }
 0xa7b   : > { %1748 = vadd.xlane.f32.xlu1 %v1747_v33 }
 0xa7d   : > { %v1732_v4 = vpop.f32.mrf.mxu3 }
 0xab8   : > { %v1743_v5 = vpop.xlane.xlu1 %1742 }
 0xab9   : > { %v1750_v6 = vmul.f32 %v1743_v5, %v3616_v36 }
 0xabb   : > { %v1753_v38 = vsub.f32 %v3972_v53, %v1750_v6 }
 0xabd   : > { %v1756_v7 = vmul.f32 %v1753_v38, %v1753_v38 }
 0xabf   : > { %v1759_v8 = vsel %vm722_vm1, %v1756_v7, 0.0 }
 0xac0   : > { %v1746_v9 = vpop.xlane.xlu0 %1745  ;;  %1760 = vadd.xlane.f32.xlu2 %v1759_v8  ;;  %v3177_v8 = vld [vmem:[%s4481_s6 + $0x1] ss:$0 sm:$0xff] }
 0xac1   : > { %v1751_v10 = vmul.f32 %v1746_v9, %v3616_v36 }
 0xac3   : > { %v1754_v29 = vsub.f32 %v3977_v1, %v1751_v10 }
 0xac5   : > { %v1757_v11 = vmul.f32 %v1754_v29, %v1754_v29 }
 0xac7   : > { %v1762_v12 = vsel %vm722_vm1, %v1757_v11, 0.0 }
 0xac8   : > { %1763 = vadd.xlane.f32.xlu0 %v1762_v12 }
 0xaee   : > { %v1749_v13 = vpop.xlane.xlu1 %1748 }
 0xaef   : > { %v1752_v14 = vmul.f32 %v1749_v13, %v3616_v36 }
 0xaf1   : > { %v3994_v15 = vsub.f32 %v3982_v57, %v1752_v14 }
 0xaf3   : > { %v1758_v61 = vmul.f32 %v3994_v15, %v3994_v15 }
 0xaf5   : > { %v1765_v27 = vsel %vm729_vm2, %v1758_v61, 0.0 }
 0xaf6   : > { %1766 = vadd.xlane.f32.xlu1 %v1765_v27 }
 0xb33   : > { %v1761_v56 = vpop.xlane.xlu2 %1760 }
 0xb34   : > { %v1768_v21 = vmul.f32 %v1761_v56, %v3616_v36 }
 0xb36   : > { %v1771_v55 = vadd.f32 1e-05, %v1768_v21 }
 0xb38   : > { %3257 = vrsqrt.f32 %v1771_v55  ;;  %vm1780_vm10 = vweird.f32 %v1771_v55 }
 0xb3b   : > { %v1764_v50 = vpop.xlane.xlu0 %1763 }
 0xb3c   : > { %v1769_v46 = vmul.f32 %v1764_v50, %v3616_v36 }
 0xb3e   : > { %v3258_v49 = vpop.eup %3257  ;;  %v1772_v25 = vadd.f32 1e-05, %v1769_v46 }
 0xb3f   : > { %v1775_v26 = vmul.f32 %v3258_v49, %v1771_v55  ;;  %vm1781_vm9 = vweird.f32 %v3258_v49 }
 0xb40   : > { %3259 = vrsqrt.f32 %v1772_v25  ;;  %vm1782_vm11 = vmor %vm1780_vm10, %vm1781_vm9  ;;  %vm1790_vm6 = vweird.f32 %v1772_v25 }
 0xb41   : > { %v1776_v28 = vmul.f32 %v3258_v49, %v1775_v26 }
 0xb43   : > { %v1777_v30 = vmul.f32 0.5, %v1776_v28 }
 0xb45   : > { %v1778_v31 = vsub.f32 1.5, %v1777_v30 }
 0xb46   : > { %v3260_v32 = vpop.eup %3259 }
 0xb47   : > { %v1779_v51 = vmul.f32 %v3258_v49, %v1778_v31  ;;  %v1785_v34 = vmul.f32 %v3260_v32, %v1772_v25  ;;  %vm1791_vm12 = vweird.f32 %v3260_v32 }
 0xb48   : > { %vm1792_vm7 = vmor %vm1790_vm6, %vm1791_vm12 }
 0xb49   : > { %v1786_v37 = vmul.f32 %v3260_v32, %v1785_v34  ;;  %v1783_v39 = vsel %vm1782_vm11, %v3258_v49, %v1779_v51 }
 0xb4a   : > { %v1804_v43 = vmul.f32 %v1783_v39, %v1753_v38 }
 0xb4b   : > { %v1787_v40 = vmul.f32 0.5, %v1786_v37 }
 0xb4c   : > { %v1810_v45 = vmul.f32 %v3175_v19, %v1804_v43 }
 0xb4d   : > { %v1788_v42 = vsub.f32 1.5, %v1787_v40 }
 0xb4e   : > { %v1816_v52 = vadd.f32 %v3176_v23, %v1810_v45 }
 0xb4f   : > { %v1789_v44 = vmul.f32 %v3260_v32, %v1788_v42 }
 0xb51   : > { %v1793_v35 = vsel %vm1792_vm7, %v3260_v32, %v1789_v44 }
 0xb52   : > { %v1805_v48 = vmul.f32 %v1793_v35, %v1754_v29 }
 0xb54   : > { %v1811_v18 = vmul.f32 %v3175_v19, %v1805_v48 }
 0xb56   : > { %v1817_v54 = vadd.f32 %v3176_v23, %v1811_v18 }
 0xb58   : > { %v1819_v41 = vpack.c.bf16 %v1817_v54, %v1816_v52 }
 0xb5a   : > { %2966 = vmatmul.msk.bf16.vlgmr.msrb.gmra.mxu2 %vm722_vm1, %v1819_v41 }
 0xb69   : > { %v1767_v58 = vpop.xlane.xlu1 %1766 }
 0xb6a   : > { %v1770_v60 = vmul.f32 %v1767_v58, %v3616_v36 }
 0xb6c   : > { %v1773_v62 = vadd.f32 1e-05, %v1770_v60 }
 0xb6e   : > { %3261 = vrsqrt.f32 %v1773_v62  ;;  %vm1800_vm9 = vweird.f32 %v1773_v62 }
 0xb74   : > { %v3262_v63 = vpop.eup %3261 }
 0xb75   : > { %v1795_v59 = vmul.f32 %v3262_v63, %v1773_v62  ;;  %vm1801_vm8 = vweird.f32 %v3262_v63 }
 0xb76   : > { %vm1802_vm10 = vmor %vm1800_vm9, %vm1801_vm8 }
 0xb77   : > { %v1796_v2 = vmul.f32 %v3262_v63, %v1795_v59 }
 0xb79   : > { %v1797_v3 = vmul.f32 0.5, %v1796_v2 }
 0xb7b   : > { %v1798_v0 = vsub.f32 1.5, %v1797_v3 }
 0xb7d   : > { %v1799_v33 = vmul.f32 %v3262_v63, %v1798_v0 }
 0xb7f   : > { %v1803_v4 = vsel %vm1802_vm10, %v3262_v63, %v1799_v33 }
 0xb80   : > { %v1806_v5 = vmul.f32 %v1803_v4, %v3994_v15 }
 0xb82   : > { %v1812_v6 = vmul.f32 %v3175_v19, %v1806_v5 }
 0xb84   : > { %v1818_v38 = vadd.f32 %v3176_v23, %v1812_v6 }
 0xb86   : > { %v1820_v7 = vpack.c.bf16 %v1818_v38, %v1818_v38 }
 0xb88   : > { %2967 = vmatmul.msk.bf16.gmra.mxu2 %vm722_vm1, %v1820_v7 }
 0xbdd   : > { %v1848_v9 = vpop.f32.mrf.mxu2 }
 0xbde   : > { %v1849_v10 = vadd.f32 %v3177_v8, %v1848_v9 }
 0xbe0   : > { %1991 = vrot.lane.b32.xlu1 %v1849_v10, %s4482_s24 }
 0xbe5   : > { %v1850_v29 = vpop.f32.mrf.mxu2 }
 0xbe6   : > { %v1851_v11 = vadd.f32 %v3177_v8, %v1850_v29 }
 0xbe8   : > { %1993 = vrot.lane.b32.xlu0 %v1851_v11, %s4482_s24  ;;  %1862 = vrot.lane.b32.xlu1 %v1851_v11, %s4483_s2  ;;  %v4048_v15 = vpack.i.bf16 %v1849_v10, %v1851_v11 }
 0xc0b   : > { %v1853_v12 = vpop.f32.mrf.mxu2 }
 0xc0c   : > { %v4029_v13 = vadd.f32 %v3177_v8, %v1853_v12 }
 0xc0e   : > { %2257 = vrot.lane.b32.xlu1 %v4029_v13, %s4484_s22  ;;  %1864 = vrot.lane.b32.xlu0 %v4029_v13, %s4483_s2 }
 0xc0f   : > { %1995 = vrot.lane.b32.xlu2 %v4029_v13, %s4482_s24  ;;  %s4490_s24 = smov 64  }
 0xc13   : > { %v1855_v14 = vpop.f32.mrf.mxu2 }
 0xc16   : > { %2253 = vrot.lane.b32.xlu1 %v1849_v10, %s4484_s22  ;;  %1860 = vrot.lane.b32.xlu0 %v1849_v10, %s4483_s2  ;;  %s4491_s2 = smov 40  }
 0xc17   : > { %1985 = vrot.lane.b32.xlu2 %v1849_v10, %s4485_s23 }
 0xc1e   : > { %2124 = vrot.lane.b32.xlu1 %v1851_v11, %s4486_s28  ;;  %1989 = vrot.lane.b32.xlu0 %v4029_v13, %s4485_s23 }
 0xc1f   : > { %1987 = vrot.lane.b32.xlu2 %v1851_v11, %s4485_s23  ;;  %s4493_s23 = smov 16  }
 0xc26   : > { %2116 = vrot.lane.b32.xlu1 %v1849_v10, %s4487_s20  ;;  %2126 = vrot.lane.b32.xlu0 %v4029_v13, %s4486_s28 }
 0xc27   : > { %2255 = vrot.lane.b32.xlu2 %v1851_v11, %s4484_s22  ;;  %s4492_s22 = smov 48  }
 0xc2e   : > { %3133 = vrot.lane.b32.xlu1 %v4048_v15, %s4488_s27  ;;  %2122 = vrot.lane.b32.xlu0 %v1849_v10, %s4486_s28 }
 0xc2f   : > { %2247 = vrot.lane.b32.xlu2 %v1849_v10, %s4489_s26 }
 0xc36   : > { %2118 = vrot.lane.b32.xlu0 %v1851_v11, %s4487_s20 }
 0xc37   : > { %2249 = vrot.lane.b32.xlu2 %v1851_v11, %s4489_s26 }
 0xc3e   : > { %3138 = vrot.lane.b32.xlu0 %v4048_v15, %s4490_s24 }
 0xc3f   : > { %1944 = vrot.lane.b32.xlu2 %v4029_v13, %s4490_s24 }
 0xc46   : > { %2075 = vrot.lane.b32.xlu0 %v4029_v13, %s4488_s27  ;;  %s4495_s27 = sld [smem:[#allocation18_spill]] }
 0xc52   : > { %v1992_v16 = vpop.permute.xlu1 %1991 }
 0xc5a   : > { %v1994_v27 = vpop.permute.xlu0 %1993  ;;  %v1863_v20 = vpop.permute.xlu1 %1862 }
 0xc69   : > { %v1996_v61 = vpop.permute.xlu2 %1995 }
 0xc6a   : > { %2978 = vmatpush.xpose.msk.msra.mxu3 %vm854_vm13, %v1996_v61 }
 0xc6e   : > { %2979 = vmatpush.xpose.msk.msra.mxu3 %vm854_vm13, %v1994_v27 }
 0xc71   : > { %v1986_v17 = vpop.permute.xlu2 %1985 }
 0xc72   : > { %2980 = vmatpush.xpose.msk.msra.mxu3 %vm854_vm13, %v1992_v16 }
 0xc75   : > { %2981 = vmatmul.msk.f32.vlgmr.msra.gmra.mxu3 %vm854_vm13, %v1986_v17 }
 0xc79   : > { %v1988_v56 = vpop.permute.xlu2 %1987 }
 0xc7d   : > { %2982 = vmatmul.msk.f32.gmra.mxu3 %vm854_vm13, %v1988_v56 }
 0xc80   : > { %v1865_v21 = vpop.permute.xlu0 %1864  ;;  %v2258_v47 = vpop.permute.xlu1 %2257 }
 0xc81   : > { %v2256_v22 = vpop.permute.xlu2 %2255  ;;  %2968 = vmatpush.xpose.msk.msrb.mxu1 %vm854_vm13, %v1865_v21  ;;  %3039 = vmatpush.xpose.msk.msra.mxu2 %vm854_vm13, %v1865_v21 }
 0xc82   : > { %2998 = vmatpush.xpose.msk.msrb.mxu3 %vm854_vm13, %v2258_v47 }
 0xc85   : > { %2969 = vmatpush.xpose.msk.msrb.mxu1 %vm854_vm13, %v1863_v20  ;;  %3040 = vmatpush.xpose.msk.msra.mxu2 %vm854_vm13, %v1863_v20 }
 0xc86   : > { %2999 = vmatpush.xpose.msk.msrb.mxu3 %vm854_vm13, %v2256_v22 }
 0xc88   : > { %v1861_v55 = vpop.permute.xlu0 %1860  ;;  %v2254_v24 = vpop.permute.xlu1 %2253 }
 0xc89   : > { %v2248_v50 = vpop.permute.xlu2 %2247  ;;  %2970 = vmatpush.xpose.msk.msrb.mxu1 %vm854_vm13, %v1861_v55  ;;  %3041 = vmatpush.xpose.msk.msra.mxu2 %vm854_vm13, %v1861_v55 }
 0xc8a   : > { %3000 = vmatpush.xpose.msk.msrb.mxu3 %vm854_vm13, %v2254_v24 }
 0xc8c   : > { %2971 = vmatmul.msk.f32.vlgmr.msrb.gmra.mxu1 %vm854_vm13, %v1849_v10  ;;  %2973 = vmatmul.msk.f32.vlgmr.msra.gmra.mxu2 %vm854_vm13, %v4029_v13 }
 0xc90   : > { %v1990_v46 = vpop.permute.xlu0 %1989  ;;  %v2125_v26 = vpop.permute.xlu1 %2124 }
 0xc91   : > { %v2250_v49 = vpop.permute.xlu2 %2249  ;;  %2983 = vmatmul.msk.f32.gmra.mxu3 %vm854_vm13, %v1990_v46 }
 0xc94   : > { %2972 = vmatmul.msk.f32.gmra.mxu1 %vm854_vm13, %v1851_v11 }
 0xc98   : > { %v2127_v25 = vpop.permute.xlu0 %2126  ;;  %v2117_v31 = vpop.permute.xlu1 %2116 }
 0xc99   : > { %v1945_v28 = vpop.permute.xlu2 %1944  ;;  %2988 = vmatpush.xpose.msk.msra.mxu1 %vm854_vm13, %v2127_v25  ;;  %3001 = vmatmul.msk.f32.vlgmr.msrb.gmra.mxu3 %vm854_vm13, %v2248_v50 }
 0xc9a   : > { %2974 = vmatpush.msk.msrb.mxu0 %vm948_vm3, %v1945_v28 }
 0xc9d   : > { %2989 = vmatpush.xpose.msk.msra.mxu1 %vm854_vm13, %v2125_v26 }
 0xca0   : > { %v2123_v30 = vpop.permute.xlu0 %2122  ;;  %v3134_v39 = vpop.permute.xlu1 %3133 }
 0xca1   : > { %2990 = vmatpush.xpose.msk.msra.mxu1 %vm854_vm13, %v2123_v30  ;;  %3002 = vmatmul.msk.f32.gmra.mxu3 %vm854_vm13, %v2250_v49  ;;  %v3135_v42 = vunpack.i.l.bf16 %v3134_v39  ;;  %v3136_v19 = vunpack.i.h.bf16 %v3134_v39 }
 0xca4   : > { %2991 = vmatmul.msk.f32.vlgmr.msra.gmra.mxu1 %vm854_vm13, %v2117_v31 }
 0xca8   : > { %v2119_v32 = vpop.permute.xlu0 %2118 }
 0xcac   : > { %2992 = vmatmul.msk.f32.gmra.mxu1 %vm854_vm13, %v2119_v32 }
 0xcb0   : > { %v3139_v51 = vpop.permute.xlu0 %3138 }
 0xcb1   : > { %v3140_v34 = vunpack.i.l.bf16 %v3139_v51  ;;  %v3141_v37 = vunpack.i.h.bf16 %v3139_v51 }
 0xcb3   : > { %1973 = vmatpush.msrb.mxu0 %v3140_v34 }
 0xcb5   : > { %1974 = vmatpush.msrb.mxu0 %v3141_v37 }
 0xcb8   : > { %v2076_v40 = vpop.permute.xlu0 %2075 }
 0xcb9   : > { %2984 = vmatpush.msk.msrb.mxu2 %vm948_vm3, %v2076_v40 }
 0xcbb   : > { %2104 = vmatpush.msrb.mxu2 %v3135_v42 }
 0xcbd   : > { %2105 = vmatpush.msrb.mxu2 %v3136_v19 }
 0xcf8   : > { %v2026_v43 = vpop.f32.mrf.mxu3 }
 0xcf9   : > { %v2035_v44 = vmul.f32 0.35355338, %v2026_v43 }
 0xcfb   : > { %v2038_v35 = vsel %vm896_vm14, %v2035_v44, -inf }
 0xcfc   : > { %2039 = vmax.xlane.f32.xlu2 %v2038_v35 }
 0xd00   : > { %v2029_v23 = vpop.f32.mrf.mxu3 }
 0xd01   : > { %v2036_v45 = vmul.f32 0.35355338, %v2029_v23 }
 0xd03   : > { %v2041_v48 = vsel %vm896_vm14, %v2036_v45, -inf }
 0xd04   : > { %2042 = vmax.xlane.f32.xlu0 %v2041_v48 }
 0xd09   : > { %v1895_v18 = vpop.f32.mrf.mxu1 }
 0xd0a   : > { %v1904_v52 = vmul.f32 0.35355338, %v1895_v18 }
 0xd0c   : > { %v1907_v54 = vsel %vm896_vm14, %v1904_v52, -inf }
 0xd0d   : > { %1908 = vmax.xlane.f32.xlu1 %v1907_v54 }
 0xd0f   : > { %v1901_v41 = vpop.f32.mrf.mxu2 }
 0xd10   : > { %v1906_v58 = vmul.f32 0.35355338, %v1901_v41 }
 0xd11   : > { %v1898_v62 = vpop.f32.mrf.mxu1 }
 0xd12   : > { %v1913_v60 = vsel %vm903_vm15, %v1906_v58, -inf  ;;  %v1905_v59 = vmul.f32 0.35355338, %v1898_v62 }
 0xd13   : > { %1914 = vmax.xlane.f32.xlu2 %v1913_v60 }
 0xd14   : > { %v2032_v63 = vpop.f32.mrf.mxu3  ;;  %v1910_v2 = vsel %vm896_vm14, %v1905_v59, -inf }
 0xd15   : > { %v2037_v7 = vmul.f32 0.35355338, %v2032_v63 }
 0xd17   : > { %v2044_v10 = vsel %vm903_vm15, %v2037_v7, -inf }
 0xd1b   : > { %1911 = vmax.xlane.f32.xlu2 %v1910_v2 }
 0xd1c   : > { %v2288_v3 = vpop.f32.mrf.mxu3 }
 0xd1d   : > { %v2297_v11 = vmul.f32 0.35355338, %v2288_v3 }
 0xd1f   : > { %v2300_v12 = vsel %vm896_vm14, %v2297_v11, -inf }
 0xd21   : > { %v2157_v0 = vpop.f32.mrf.mxu1 }
 0xd22   : > { %v2166_v33 = vmul.f32 0.35355338, %v2157_v0 }
 0xd24   : > { %v2291_v4 = vpop.f32.mrf.mxu3  ;;  %v2169_v5 = vsel %vm896_vm14, %v2166_v33, -inf }
 0xd25   : > { %v4096_v6 = vmul.f32 0.35355338, %v2291_v4  ;;  %2170 = vmax.xlane.f32.xlu1 %v2169_v5 }
 0xd27   : > { %v2303_v38 = vsel %vm896_vm14, %v4096_v6, -inf }
 0xd28   : > { %2304 = vmax.xlane.f32.xlu2 %v2303_v38 }
 0xd29   : > { %v2160_v8 = vpop.f32.mrf.mxu1 }
 0xd2a   : > { %v4100_v9 = vmul.f32 0.35355338, %v2160_v8 }
 0xd2c   : > { %v2172_v29 = vsel %vm896_vm14, %v4100_v9, -inf }
 0xd2d   : > { %2045 = vmax.xlane.f32.xlu1 %v2044_v10  ;;  %2173 = vmax.xlane.f32.xlu0 %v2172_v29 }
 0xd35   : > { %2301 = vmax.xlane.f32.xlu0 %v2300_v12 }
 0xd49   : > { %2337 = vrot.lane.b32.xlu0 %v4029_v13, %s4491_s2 }
 0xd6f   : > { %v2040_v14 = vpop.xlane.xlu2 %2039 }
 0xd70   : > { %v2047_v61 = vsub.f32 %v2035_v44, %v2040_v14 }
 0xd72   : > { %v2050_v27 = vmul.f32 1.442695, %v2047_v61 }
 0xd74   : > { %3263 = vpow2.f32 %v2050_v27 }
 0xd77   : > { %v2043_v22 = vpop.xlane.xlu0 %2042 }
 0xd78   : > { %v2048_v50 = vsub.f32 %v2036_v45, %v2043_v22 }
 0xd7a   : > { %v4108_v16 = vpop.eup %3263  ;;  %v2052_v25 = vmul.f32 1.442695, %v2048_v50 }
 0xd7b   : > { %v2056_v17 = vsel %vm896_vm14, %v4108_v16, 0.0 }
 0xd7c   : > { %2057 = vadd.xlane.f32.xlu1 %v2056_v17 }
 0xd80   : > { %v1909_v20 = vpop.xlane.xlu1 %1908 }
 0xd81   : > { %v1916_v56 = vsub.f32 %v1904_v52, %v1909_v20 }
 0xd83   : > { %v1919_v21 = vmul.f32 1.442695, %v1916_v56 }
 0xd85   : > { %3265 = vpow2.f32 %v1919_v21 }
 0xd86   : > { %v1915_v47 = vpop.xlane.xlu2 %1914 }
 0xd87   : > { %v1918_v55 = vsub.f32 %v1906_v58, %v1915_v47 }
 0xd89   : > { %v1923_v24 = vmul.f32 1.442695, %v1918_v55 }
 0xd8b   : > { %v4112_v46 = vpop.eup %3265  ;;  %3267 = vpow2.f32 %v1923_v24 }
 0xd8c   : > { %v1925_v49 = vsel %vm896_vm14, %v4112_v46, 0.0  ;;  %3269 = vpow2.f32 %v2052_v25 }
 0xd8d   : > { %1926 = vadd.xlane.f32.xlu2 %v1925_v49 }
 0xd8e   : > { %v1912_v26 = vpop.xlane.xlu2 %1911 }
 0xd8f   : > { %v1917_v28 = vsub.f32 %v1905_v59, %v1912_v26 }
 0xd91   : > { %v4116_v30 = vpop.eup %3267  ;;  %v1921_v31 = vmul.f32 1.442695, %v1917_v28 }
 0xd92   : > { %v1931_v32 = vsel %vm903_vm15, %v4116_v30, 0.0  ;;  %v4120_v51 = vpop.eup %3269 }
 0xd93   : > { %3271 = vpow2.f32 %v1921_v31  ;;  %v2059_v19 = vsel %vm896_vm14, %v4120_v51, 0.0 }
 0xd95   : > { %1932 = vadd.xlane.f32.xlu2 %v1931_v32 }
 0xd98   : > { %v2171_v34 = vpop.xlane.xlu1 %2170 }
 0xd99   : > { %v3272_v37 = vpop.eup %3271  ;;  %v2178_v39 = vsub.f32 %v2166_v33, %v2171_v34 }
 0xd9a   : > { %v1928_v40 = vsel %vm896_vm14, %v3272_v37, 0.0 }
 0xd9b   : > { %v2181_v42 = vmul.f32 1.442695, %v2178_v39  ;;  %1929 = vadd.xlane.f32.xlu0 %v1928_v40  ;;  %v2305_v35 = vpop.xlane.xlu2 %2304 }
 0xd9c   : > { %v2310_v18 = vsub.f32 %v4096_v6, %v2305_v35 }
 0xd9d   : > { %3273 = vpow2.f32 %v2181_v42  ;;  %2060 = vadd.xlane.f32.xlu2 %v2059_v19 }
 0xd9e   : > { %v2314_v54 = vmul.f32 1.442695, %v2310_v18 }
 0xda0   : > { %v2174_v43 = vpop.xlane.xlu0 %2173  ;;  %v2046_v44 = vpop.xlane.xlu1 %2045 }
 0xda1   : > { %v2049_v23 = vsub.f32 %v2037_v7, %v2046_v44  ;;  %v2179_v4 = vsub.f32 %v4100_v9, %v2174_v43 }
 0xda3   : > { %v4125_v45 = vpop.eup %3273  ;;  %v2054_v48 = vmul.f32 1.442695, %v2049_v23  ;;  %v2183_v5 = vmul.f32 1.442695, %v2179_v4  ;;  %v3010_v4 = vld [vmem:[%s4406_s7 + $0x30] sm:$0xff] }
 0xda4   : > { %v2187_v52 = vsel %vm896_vm14, %v4125_v45, 0.0 }
 0xda5   : > { %2188 = vadd.xlane.f32.xlu1 %v2187_v52  ;;  %3275 = vpow2.f32 %v2054_v48 }
 0xda6   : > { %3277 = vpow2.f32 %v2314_v54 }
 0xda8   : > { %v2302_v41 = vpop.xlane.xlu0 %2301 }
 0xda9   : > { %v2309_v58 = vsub.f32 %v2297_v11, %v2302_v41 }
 0xdab   : > { %v2312_v60 = vmul.f32 1.442695, %v2309_v58  ;;  %v3276_v62 = vpop.eup %3275 }
 0xdac   : > { %v2062_v63 = vsel %vm903_vm15, %v3276_v62, 0.0  ;;  %v3278_v59 = vpop.eup %3277 }
 0xdad   : > { %3279 = vpow2.f32 %v2312_v60  ;;  %2063 = vadd.xlane.f32.xlu1 %v2062_v63  ;;  %v2321_v0 = vsel %vm896_vm14, %v3278_v59, 0.0 }
 0xdae   : > { %3281 = vpow2.f32 %v2183_v5  ;;  %v3011_v5 = vld [vmem:[%s4406_s7 + $0x38] sm:$0xff] }
 0xdb3   : > { %v3280_v2 = vpop.eup %3279 }
 0xdb4   : > { %v2318_v3 = vsel %vm896_vm14, %v3280_v2, 0.0  ;;  %v4143_v6 = vpop.eup %3281 }
 0xdb5   : > { %2319 = vadd.xlane.f32.xlu0 %v2318_v3  ;;  %3143 = vrot.lane.b32.xlu2 %v4048_v15, %s4491_s2  ;;  %v2190_v38 = vsel %vm896_vm14, %v4143_v6, 0.0 }
 0xdb6   : > { %2322 = vadd.xlane.f32.xlu1 %v2321_v0 }
 0xdbb   : > { %v2338_v33 = vpop.permute.xlu0 %2337 }
 0xdbc   : > { %3004 = vmatpush.msk.msra.mxu2 %vm948_vm3, %v2338_v33 }
 0xdc9   : > { %3148 = vrot.lane.b32.xlu0 %v4048_v15, %s4492_s22 }
 0xdcf   : > { %2206 = vrot.lane.b32.xlu1 %v4029_v13, %s4492_s22  ;;  %s3353_s22 = scalar_lea.hbm %s4420_s21, 2 }
 0xdd1   : > { %2120 = vrot.lane.b32.xlu0 %v4029_v13, %s4487_s20 }
 0xdde   : > { %2191 = vadd.xlane.f32.xlu2 %v2190_v38  ;;  %v3008_v38 = vld [vmem:[%s4406_s7 + $0x20] sm:$0xff] }
 0xdef   : > { %v2058_v7 = vpop.xlane.xlu1 %2057 }
 0xdf0   : > { %3283 = vrcp.f32 %v2058_v7  ;;  %v3009_v7 = vld [vmem:[%s4406_s7 + $0x28] sm:$0xff] }
 0xdf6   : > { %v3284_v8 = vpop.eup %3283 }
 0xdf7   : > { %v2068_v15 = vmul.f32 %v3284_v8, %v4108_v16  ;;  %v2430_v8 = vpack.c.bf16 %v3009_v7, %v3008_v38 }
 0xdf9   : > { %2985 = vmatmul.msk.f32.vlgmr.msrb.gmra.mxu2 %vm896_vm14, %v2068_v15 }
 0xe00   : > { %v1927_v9 = vpop.xlane.xlu2 %1926 }
 0xe01   : > { %3285 = vrcp.f32 %v1927_v9 }
 0xe07   : > { %v3286_v10 = vpop.eup %3285 }
 0xe08   : > { %v1937_v29 = vmul.f32 %v3286_v10, %v4112_v46  ;;  %v1933_v11 = vpop.xlane.xlu2 %1932 }
 0xe0a   : > { %2975 = vmatmul.msk.f32.vlgmr.msrb.gmra.mxu0 %vm896_vm14, %v1937_v29 }
 0xe0e   : > { %v1930_v12 = vpop.xlane.xlu0 %1929 }
 0xe0f   : > { %3287 = vrcp.f32 %v1930_v12 }
 0xe10   : > { %v2061_v14 = vpop.xlane.xlu2 %2060 }
 0xe11   : > { %3289 = vrcp.f32 %v2061_v14 }
 0xe12   : > { %3291 = vrcp.f32 %v1933_v11 }
 0xe15   : > { %v3288_v61 = vpop.eup %3287 }
 0xe16   : > { %v1938_v27 = vmul.f32 %v3288_v61, %v3272_v37 }
 0xe17   : > { %v3290_v17 = vpop.eup %3289 }
 0xe18   : > { %2976 = vmatmul.msk.f32.gmra.mxu0 %vm896_vm14, %v1938_v27  ;;  %v3144_v16 = vpop.permute.xlu2 %3143  ;;  %v2189_v20 = vpop.xlane.xlu1 %2188  ;;  %v2069_v56 = vmul.f32 %v3290_v17, %v4120_v51 }
 0xe19   : > { %v3145_v21 = vunpack.i.l.bf16 %v3144_v16  ;;  %v3292_v47 = vpop.eup %3291  ;;  %v3146_v22 = vunpack.i.h.bf16 %v3144_v16 }
 0xe1a   : > { %2986 = vmatmul.msk.f32.gmra.mxu2 %vm896_vm14, %v2069_v56  ;;  %v1939_v55 = vmul.f32 %v3292_v47, %v4116_v30 }
 0xe1b   : > { %2366 = vmatpush.msra.mxu2 %v3145_v21 }
 0xe1d   : > { %2367 = vmatpush.msra.mxu2 %v3146_v22 }
 0xe20   : > { %2977 = vmatmul.msk.f32.gmra.mxu0 %vm896_vm14, %v1939_v55  ;;  %v2064_v24 = vpop.xlane.xlu1 %2063 }
 0xe21   : > { %3293 = vrcp.f32 %v2064_v24 }
 0xe27   : > { %v3294_v50 = vpop.eup %3293 }
 0xe28   : > { %v2320_v46 = vpop.xlane.xlu0 %2319  ;;  %v2070_v49 = vmul.f32 %v3294_v50, %v3276_v62 }
 0xe29   : > { %3295 = vrcp.f32 %v2320_v46  ;;  %v2323_v25 = vpop.xlane.xlu1 %2322 }
 0xe2a   : > { %2987 = vmatmul.msk.f32.gmra.mxu2 %vm896_vm14, %v2070_v49  ;;  %3297 = vrcp.f32 %v2323_v25 }
 0xe2b   : > { %3299 = vrcp.f32 %v2189_v20 }
 0xe2f   : > { %v3296_v26 = vpop.eup %3295 }
 0xe30   : > { %v2330_v28 = vmul.f32 %v3296_v26, %v3280_v2  ;;  %v3298_v31 = vpop.eup %3297 }
 0xe31   : > { %v2331_v32 = vmul.f32 %v3298_v31, %v3278_v59  ;;  %v3300_v34 = vpop.eup %3299 }
 0xe32   : > { %3005 = vmatmul.msk.f32.vlgmr.msra.gmra.mxu2 %vm896_vm14, %v2330_v28  ;;  %v2199_v42 = vmul.f32 %v3300_v34, %v4125_v45  ;;  %v4200_v28 = vld [vmem:[%s4407_s8 + $0x1] ss:$0 sm:$0xff] }
 0xe3a   : > { %3006 = vmatmul.msk.f32.gmra.mxu2 %vm896_vm14, %v2331_v32 }
 0xe3b   : > { %v3149_v30 = vpop.permute.xlu0 %3148 }
 0xe3c   : > { %v3150_v37 = vunpack.i.l.bf16 %v3149_v30  ;;  %v3151_v40 = vunpack.i.h.bf16 %v3149_v30 }
 0xe41   : > { %v2207_v51 = vpop.permute.xlu1 %2206 }
 0xe42   : > { %2994 = vmatpush.msk.msra.mxu0 %vm948_vm3, %v2207_v51 }
 0xe43   : > { %v2121_v39 = vpop.permute.xlu0 %2120 }
 0xe44   : > { %2235 = vmatpush.msra.mxu0 %v3150_v37  ;;  %2993 = vmatmul.msk.f32.gmra.mxu1 %vm854_vm13, %v2121_v39 }
 0xe46   : > { %2236 = vmatpush.msra.mxu0 %v3151_v40 }
 0xe47   : > { %2995 = vmatmul.msk.f32.vlgmr.msra.gmra.mxu0 %vm896_vm14, %v2199_v42 }
 0xe51   : > { %v2192_v19 = vpop.xlane.xlu2 %2191 }
 0xe52   : > { %3301 = vrcp.f32 %v2192_v19 }
 0xe58   : > { %v3302_v43 = vpop.eup %3301 }
 0xe59   : > { %v2200_v44 = vmul.f32 %v3302_v43, %v4143_v6  ;;  %v2431_v6 = vpack.c.bf16 %v3011_v5, %v3010_v4  ;;  %v3019_v4 = vld [vmem:[%s4410_s11 + $0x30] sm:$0xff]  ;;  %v3020_v5 = vld [vmem:[%s4410_s11 + $0x38] sm:$0xff] }
 0xe5a   : > { %v2554_v38 = vpack.c.bf16 %v3020_v5, %v3019_v4  ;;  %v3029_v4 = vld [vmem:[%s4412_s13 + $0x68] sm:$0xff] }
 0xe5b   : > { %2996 = vmatmul.msk.f32.gmra.mxu0 %vm896_vm14, %v2200_v44  ;;  %2449 = vmatpush.bf16.msrb.mxu1 %v2431_v6 }
 0xe5c   : > { %2572 = vmatpush.bf16.msrb.mxu0 %v2554_v38 }
 0xe5f   : > { %2450 = vmatpush.bf16.msrb.mxu1 %v2430_v8  ;;  %v3017_v8 = vld [vmem:[%s4410_s11 + $0x20] sm:$0xff] }
 0xe7c   : > { %v2107_v35 = vpop.f32.mrf.mxu2 }
 0xe87   : > { %v1976_v18 = vpop.f32.mrf.mxu0 }
 0xe95   : > { %v1979_v45 = vpop.f32.mrf.mxu0 }
 0xe9d   : > { %v2110_v23 = vpop.f32.mrf.mxu2  ;;  %v4168_v52 = vpop.f32.mrf.mxu0 }
 0xe9e   : > { %v3152_v48 = vpack.i.bf16 %v2110_v23, %v2107_v35 }
 0xea0   : > { %3153 = vrot.lane.b32.xlu0 %v3152_v48, %s3409_s1 }
 0xea8   : > { %2251 = vrot.lane.b32.xlu0 %v4029_v13, %s4489_s26  ;;  %s4494_s26 = smov 24  }
 0xead   : > { %v4170_v54 = vpop.f32.mrf.mxu2 }
 0xeb5   : > { %v2369_v58 = vpop.f32.mrf.mxu2 }
 0xebd   : > { %v2372_v63 = vpop.f32.mrf.mxu2 }
 0xebe   : > { %v3162_v59 = vpack.i.bf16 %v2372_v63, %v2369_v58 }
 0xec1   : > { %v2163_v2 = vpop.f32.mrf.mxu1 }
 0xec2   : > { %v2168_v3 = vmul.f32 0.35355338, %v2163_v2 }
 0xec4   : > { %v2238_v41 = vpop.f32.mrf.mxu0  ;;  %v2175_v13 = vsel %vm903_vm15, %v2168_v3, -inf }
 0xed8   : > { %v2241_v60 = vpop.f32.mrf.mxu0 }
 0xed9   : > { %v3157_v62 = vpack.i.bf16 %v2241_v60, %v2238_v41 }
 0xedb   : > { %3158 = vrot.lane.b32.xlu1 %v3157_v62, %s4493_s23 }
 0xee3   : > { %3163 = vrot.lane.b32.xlu1 %v3162_v59, %s4456_s29  ;;  %s2832_s29 = scalar_lea.hbm %s4420_s21, %s3543_s3 }
 0xf0d   : > { %2176 = vmax.xlane.f32.xlu1 %v2175_v13 }
 0xf12   : > { %v3154_v0 = vpop.permute.xlu0 %3153 }
 0xf13   : > { %v3156_v9 = vunpack.i.h.bf16 %v3154_v0  ;;  %v3155_v10 = vunpack.i.l.bf16 %v3154_v0 }
 0xf15   : > { %v2415_v14 = vsel %vm854_vm13, %v1979_v45, %v3156_v9  ;;  %v2414_v61 = vsel %vm854_vm13, %v1976_v18, %v3155_v10 }
 0xf1a   : > { %v2252_v33 = vpop.permute.xlu0 %2251 }
 0xf1b   : > { %3003 = vmatmul.msk.f32.gmra.mxu3 %vm854_vm13, %v2252_v33 }
 0xf4d   : > { %v3159_v15 = vpop.permute.xlu1 %3158 }
 0xf4e   : > { %v3161_v29 = vunpack.i.h.bf16 %v3159_v15  ;;  %v3160_v11 = vunpack.i.l.bf16 %v3159_v15  ;;  %v3018_v15 = vld [vmem:[%s4410_s11 + $0x28] sm:$0xff] }
 0xf4f   : > { %v2553_v9 = vpack.c.bf16 %v3018_v15, %v3017_v8 }
 0xf50   : > { %v2417_v16 = vsel %vm1409_vm4, %v2414_v61, %v3160_v11  ;;  %v2418_v20 = vsel %vm1409_vm4, %v2415_v14, %v3161_v29 }
 0xf51   : > { %2573 = vmatpush.bf16.msrb.mxu0 %v2553_v9 }
 0xf55   : > { %v3164_v12 = vpop.permute.xlu1 %3163 }
 0xf56   : > { %v3166_v27 = vunpack.i.h.bf16 %v3164_v12  ;;  %v3165_v17 = vunpack.i.l.bf16 %v3164_v12 }
 0xf58   : > { %v2421_v56 = vsel %vm1413_vm5, %v2418_v20, %v3166_v27  ;;  %v2420_v21 = vsel %vm1413_vm5, %v2417_v16, %v3165_v17 }
 0xf59   : > { %v2423_v47 = vpack.c.bf16 %v2421_v56, %v2420_v21 }
 0xf5b   : > { %3013 = vmatmul.msk.bf16.vlgmr.msrb.gmra.mxu1 %vm722_vm1, %v2423_v47 }
 0xf80   : > { %v2177_v22 = vpop.xlane.xlu1 %2176 }
 0xf81   : > { %v2180_v55 = vsub.f32 %v2168_v3, %v2177_v22 }
 0xf83   : > { %v2185_v24 = vmul.f32 1.442695, %v2180_v55 }
 0xf85   : > { %3303 = vpow2.f32 %v2185_v24  ;;  %v4239_v24 = vld [vmem:[%s4408_s9 + $0x1] ss:$0 sm:$0xff] }
 0xf8b   : > { %v3304_v50 = vpop.eup %3303 }
 0xf8c   : > { %v2193_v46 = vsel %vm903_vm15, %v3304_v50, 0.0 }
 0xf8d   : > { %2194 = vadd.xlane.f32.xlu1 %v2193_v46 }
 0xf9e   : > { %v2294_v49 = vpop.f32.mrf.mxu3 }
 0xf9f   : > { %v2299_v25 = vmul.f32 0.35355338, %v2294_v49 }
 0xfa1   : > { %v2306_v26 = vsel %vm903_vm15, %v2299_v25, -inf }
 0xfa2   : > { %2307 = vmax.xlane.f32.xlu0 %v2306_v26 }
 0xfd8   : > { %v2452_v31 = vpop.f32.mrf.mxu1 }
 0xfd9   : > { %v2453_v32 = vadd.f32 %v4200_v28, %v2452_v31 }
 0xfdb   : > { %v4204_v30 = vadd.f32 %v2453_v32, %v3972_v53 }
 0xfdd   : > { %v2468_v51 = vsel %vm722_vm1, %v4204_v30, 0.0 }
 0xfde   : > { %2469 = vadd.xlane.f32.xlu2 %v2468_v51 }
 0xfe0   : > { %v2454_v34 = vpop.f32.mrf.mxu1 }
 0xfe1   : > { %v2455_v37 = vadd.f32 %v4200_v28, %v2454_v34 }
 0xfe3   : > { %v2462_v39 = vadd.f32 %v2455_v37, %v3977_v1 }
 0xfe5   : > { %v2471_v40 = vsel %vm722_vm1, %v2462_v39, 0.0 }
 0xfe6   : > { %2472 = vadd.xlane.f32.xlu2 %v2471_v40  ;;  %v4255_v40 = vld [vmem:[%s4411_s12 + $0x1] ss:$0 sm:$0xff] }
0x1000   : > { %v2195_v42 = vpop.xlane.xlu1 %2194 }
0x1001   : > { %3305 = vrcp.f32 %v2195_v42 }
0x1007   : > { %v3306_v19 = vpop.eup %3305 }
0x1008   : > { %v2201_v43 = vmul.f32 %v3306_v19, %v3304_v50 }
0x100a   : > { %2997 = vmatmul.msk.f32.gmra.mxu0 %vm896_vm14, %v2201_v43 }
0x1015   : > { %v2308_v53 = vpop.xlane.xlu0 %2307 }
0x1016   : > { %v2311_v44 = vsub.f32 %v2299_v25, %v2308_v53  ;;  %v4244_v25 = vld [vmem:[%s4409_s10 + $0x1] ss:$0 sm:$0xff] }
0x1018   : > { %v2316_v35 = vmul.f32 1.442695, %v2311_v44 }
0x101a   : > { %3307 = vpow2.f32 %v2316_v35 }
0x1020   : > { %v3308_v23 = vpop.eup %3307 }
0x1021   : > { %v2324_v48 = vsel %vm903_vm15, %v3308_v23, 0.0 }
0x1022   : > { %2325 = vadd.xlane.f32.xlu2 %v2324_v48 }
0x1051   : > { %v2470_v18 = vpop.xlane.xlu2 %2469 }
0x1052   : > { %v2477_v1 = vmul.f32 %v2470_v18, %v3616_v36 }
0x1054   : > { %v2480_v45 = vsub.f32 %v4204_v30, %v2477_v1 }
0x1056   : > { %v2483_v41 = vmul.f32 %v2480_v45, %v2480_v45 }
0x1058   : > { %v2486_v58 = vsel %vm722_vm1, %v2483_v41, 0.0 }
0x1059   : > { %2487 = vadd.xlane.f32.xlu2 %v2486_v58  ;;  %v2473_v60 = vpop.xlane.xlu2 %2472 }
0x105a   : > { %v2478_v62 = vmul.f32 %v2473_v60, %v3616_v36 }
0x105c   : > { %v2481_v63 = vsub.f32 %v2462_v39, %v2478_v62  ;;  %v3030_v62 = vld [vmem:[%s4412_s13 + $0x70] sm:$0xff] }
0x105e   : > { %v2484_v59 = vmul.f32 %v2481_v63, %v2481_v63 }
0x1060   : > { %v2489_v2 = vsel %vm722_vm1, %v2484_v59, 0.0 }
0x1061   : > { %2490 = vadd.xlane.f32.xlu0 %v2489_v2 }
0x1071   : > { %2385 = vrot.lane.b32.xlu2 %v4170_v54, %s3409_s1  ;;  %s2836_s1 = sshll.u32 %s2832_s29, 4  ;;  %s2837_s1 = int_to_ptr.hbm [resolvable:$true] %s2836_s1 }
0x1072   : > { %s3347_s4 = sshra.s32 %s2837_s1, 4  ;;  %s3348_s4 = int_to_ptr.hbm [resolvable:$true] %s3347_s4 }
0x1073   : > { %s3349_s6 = scalar_lea.hbm %s3348_s4, 1  ;;  %p3354_p0 = scmp.lt.s32.totalorder %s3348_s4, %s4420_s21 }
0x1074   : > { %p3350_p11 = scmp.ne.s32.totalorder %s3348_s4, %s3349_s6  ;;  %p3355_p1 = scmp.lt.s32.totalorder %s3353_s22, %s3349_s6 }
0x1076   : > { %p3351_p12 = pnand %p3350_p11, %p3560_p5  ;;  %p3356_p2 = por %p3355_p1, %p3354_p0 }
0x1078   : > { %p3352_p13 = pneg %p3351_p12 }
0x107a   : > { %p3357_p3 = pnand %p3356_p2, %p3352_p13 }
0x1087   : > { %v2244_v3 = vpop.f32.mrf.mxu0 }
0x1088   : > { %2397 = vrot.lane.b32.xlu0 %v2244_v3, %s4493_s23  ;;  %s662_s23 = sand.u32 1, %s3387_s25  }
0x1089   : > { %s2824_s0 = scalar_lea.sflag [#allocation3], %s662_s23 }
0x1095   : > { %v2326_v13 = vpop.xlane.xlu2 %2325 }
0x1096   : > { %3309 = vrcp.f32 %v2326_v13 }
0x109c   : > { %v3310_v0 = vpop.eup %3309 }
0x109d   : > { %v2332_v33 = vmul.f32 %v3310_v0, %v3308_v23 }
0x109f   : > { %3007 = vmatmul.msk.f32.gmra.mxu2 %vm896_vm14, %v2332_v33  ;;  %v3028_v33 = vld [vmem:[%s4412_s13 + $0x60] sm:$0xff] }
0x10cc   : > { %v2488_v6 = vpop.xlane.xlu2 %2487 }
0x10cd   : > { %v2495_v54 = vmul.f32 %v2488_v6, %v3616_v36  ;;  %v2717_v6 = vpack.c.bf16 %v3029_v4, %v3028_v33 }
0x10cf   : > { %v2498_v7 = vadd.f32 1e-05, %v2495_v54 }
0x10d1   : > { %3311 = vrsqrt.f32 %v2498_v7  ;;  %vm2507_vm15 = vweird.f32 %v2498_v7 }
0x10d4   : > { %v2491_v10 = vpop.xlane.xlu0 %2490 }
0x10d5   : > { %v2496_v29 = vmul.f32 %v2491_v10, %v3616_v36  ;;  %v3026_v10 = vld [vmem:[%s4412_s13 + $0x50] sm:$0xff] }
0x10d7   : > { %v3312_v11 = vpop.eup %3311  ;;  %v2499_v12 = vadd.f32 1e-05, %v2496_v29  ;;  %v3027_v29 = vld [vmem:[%s4412_s13 + $0x58] sm:$0xff] }
0x10d8   : > { %v2502_v14 = vmul.f32 %v3312_v11, %v2498_v7  ;;  %vm2508_vm14 = vweird.f32 %v3312_v11 }
0x10d9   : > { %3313 = vrsqrt.f32 %v2499_v12  ;;  %vm2509_vm3 = vmor %vm2507_vm15, %vm2508_vm14  ;;  %vm2517_vm12 = vweird.f32 %v2499_v12 }
0x10da   : > { %v2503_v61 = vmul.f32 %v3312_v11, %v2502_v14 }
0x10dc   : > { %v2504_v27 = vmul.f32 0.5, %v2503_v61 }
0x10de   : > { %v2505_v17 = vsub.f32 1.5, %v2504_v27 }
0x10df   : > { %v3314_v16 = vpop.eup %3313 }
0x10e0   : > { %v2506_v20 = vmul.f32 %v3312_v11, %v2505_v17  ;;  %v2512_v56 = vmul.f32 %v3314_v16, %v2499_v12  ;;  %vm2518_vm11 = vweird.f32 %v3314_v16  ;;  %v2716_v12 = vpack.c.bf16 %v3027_v29, %v3026_v10 }
0x10e1   : > { %vm2519_vm6 = vmor %vm2517_vm12, %vm2518_vm11 }
0x10e2   : > { %v2513_v21 = vmul.f32 %v3314_v16, %v2512_v56  ;;  %v2510_v47 = vsel %vm2509_vm3, %v3312_v11, %v2506_v20  ;;  %v3024_v56 = vld [vmem:[%s4412_s13 + $0x40] sm:$0xff] }
0x10e3   : > { %v2531_v50 = vmul.f32 %v2510_v47, %v2480_v45 }
0x10e4   : > { %v2514_v22 = vmul.f32 0.5, %v2513_v21  ;;  %v3025_v21 = vld [vmem:[%s4412_s13 + $0x48] sm:$0xff] }
0x10e5   : > { %v2537_v26 = vmul.f32 %v4239_v24, %v2531_v50 }
0x10e6   : > { %v2515_v55 = vsub.f32 1.5, %v2514_v22  ;;  %v2715_v22 = vpack.c.bf16 %v3025_v21, %v3024_v56 }
0x10e7   : > { %v2543_v51 = vadd.f32 %v4244_v25, %v2537_v26 }
0x10e8   : > { %v2516_v46 = vmul.f32 %v3314_v16, %v2515_v55  ;;  %v2386_v55 = vpop.permute.xlu2 %2385 }
0x10ea   : > { %v2520_v49 = vsel %vm2519_vm6, %v3314_v16, %v2516_v46 }
0x10eb   : > { %v2532_v31 = vmul.f32 %v2520_v49, %v2481_v63  ;;  %v3031_v63 = vld [vmem:[%s4412_s13 + $0x78] sm:$0xff] }
0x10ec   : > { %v2718_v3 = vpack.c.bf16 %v3031_v63, %v3030_v62 }
0x10ed   : > { %v2538_v32 = vmul.f32 %v4239_v24, %v2532_v31 }
0x10ee   : > { %2734 = vmatpush.bf16.msra.mxu3 %v2718_v3 }
0x10ef   : > { %v2544_v34 = vadd.f32 %v4244_v25, %v2538_v32 }
0x10f1   : > { %v2546_v37 = vpack.c.bf16 %v2544_v34, %v2543_v51  ;;  %v2416_v51 = vsel %vm854_vm13, %v4168_v52, %v2386_v55 }
0x10f2   : > { %2735 = vmatpush.bf16.msra.mxu3 %v2717_v6 }
0x10f3   : > { %3022 = vmatmul.msk.bf16.vlgmr.msrb.gmra.mxu0 %vm722_vm1, %v2546_v37 }
0x10f6   : > { %2736 = vmatpush.bf16.msra.mxu3 %v2716_v12 }
0x10fa   : > { %v2398_v46 = vpop.permute.xlu0 %2397  ;;  %2737 = vmatpush.bf16.msra.mxu3 %v2715_v22 }
0x1122   : > { %v2375_v39 = vpop.f32.mrf.mxu2 }
0x1123   : > { %2409 = vrot.lane.b32.xlu1 %v2375_v39, %s4494_s26  ;;  %s663_s26 = scalar_lea.vmem [#allocation2], %s662_s23 }
0x1124   : > { %s2834_s24 = sshll.u32 %s663_s26, 4  ;;  %s2835_s24 = int_to_ptr.vmem [resolvable:$true] %s2834_s24 }
0x1170   : > { %v2575_v42 = vpop.f32.mrf.mxu0 }
0x1171   : > { %v4258_v19 = vadd.f32 %v4255_v40, %v2575_v42  ;;  %v2419_v42 = vsel %vm1409_vm4, %v2416_v51, %v2398_v46 }
0x1173   : > { %v4261_v43 = vmul.f32 0.70710677, %v4258_v19 }
0x1175   : > { %v2590_v53 = vand.u32 2147483647, %v4261_v43  ;;  %vm2689_vm13 = vcmp.ge.f32.partialorder %v4261_v43, 0.0 }
0x1177   : > { %v2593_v44 = vmul.f32 0.3275911, %v2590_v53  ;;  %v2671_v15 = vsub.f32 0.0, %v2590_v53 }
0x1178   : > { %v2577_v35 = vpop.f32.mrf.mxu0 }
0x1179   : > { %v2596_v23 = vadd.f32 1.0, %v2593_v44  ;;  %v4265_v48 = vadd.f32 %v4255_v40, %v2577_v35  ;;  %v2674_v17 = vmul.f32 %v2671_v15, %v2590_v53 }
0x117b   : > { %3315 = vrcp.f32 %v2596_v23  ;;  %v4268_v18 = vmul.f32 0.70710677, %v4265_v48  ;;  %v2610_v2 = vand.u32 2147483648, %v2596_v23  ;;  %v2608_v0 = vand.u32 2147483647, %v2596_v23 }
0x117c   : > { %vm2604_vm8 = vweird.f32 %v2596_v23  ;;  %v2677_v31 = vmul.f32 1.442695, %v2674_v17  ;;  %v2585_v12 = vmul.f32 0.5, %v4265_v48 }
0x117d   : > { %v4271_v1 = vand.u32 2147483647, %v4268_v18  ;;  %v2611_v38 = vor.u32 1.1754944e-38, %v2610_v2  ;;  %vm2609_vm10 = vcmp.eq.f32.partialorder %v2608_v0, 8.507059e+37  ;;  %vm2690_vm4 = vcmp.ge.f32.partialorder %v4268_v18, 0.0 }
0x117f   : > { %v2594_v45 = vmul.f32 0.3275911, %v4271_v1  ;;  %v2672_v39 = vsub.f32 0.0, %v4271_v1 }
0x1181   : > { %v3316_v41 = vpop.eup %3315  ;;  %v2597_v60 = vadd.f32 1.0, %v2594_v45 }
0x1182   : > { %v2600_v58 = vmul.f32 %v3316_v41, %v2596_v23  ;;  %vm2605_vm7 = vweird.f32 %v3316_v41 }
0x1183   : > { %3317 = vrcp.f32 %v2597_v60  ;;  %vm2606_vm9 = vmor %vm2604_vm8, %vm2605_vm7  ;;  %v2625_v27 = vand.u32 2147483648, %v2597_v60  ;;  %v2623_v20 = vand.u32 2147483647, %v2597_v60  ;;  %vm2619_vm15 = vweird.f32 %v2597_v60 }
0x1184   : > { %v2601_v59 = vsub.f32 1.0, %v2600_v58  ;;  %3319 = vpow2.f32 %v2677_v31 }
0x1185   : > { %v2626_v26 = vor.u32 1.1754944e-38, %v2625_v27  ;;  %vm2624_vm11 = vcmp.eq.f32.partialorder %v2623_v20, 8.507059e+37 }
0x1186   : > { %v2602_v13 = vmul.f32 %v3316_v41, %v2601_v59 }
0x1188   : > { %v2603_v5 = vadd.f32 %v3316_v41, %v2602_v13 }
0x1189   : > { %v3318_v54 = vpop.eup %3317 }
0x118a   : > { %v2607_v7 = vsel %vm2606_vm9, %v3316_v41, %v2603_v5  ;;  %v2615_v9 = vmul.f32 %v3318_v54, %v2597_v60  ;;  %vm2620_vm14 = vweird.f32 %v3318_v54  ;;  %v2675_v60 = vmul.f32 %v2672_v39, %v4271_v1  ;;  %v3320_v3 = vpop.eup %3319 }
0x118b   : > { %v2612_v8 = vsel %vm2609_vm10, %v2611_v38, %v2607_v7  ;;  %vm2621_vm3 = vmor %vm2619_vm15, %vm2620_vm14 }
0x118c   : > { %v2644_v11 = vmul.f32 1.0614054, %v2612_v8  ;;  %v2616_v14 = vsub.f32 1.0, %v2615_v9  ;;  %v2679_v2 = vmul.f32 1.442695, %v2675_v60  ;;  %v2776_v60 = vld [vmem:[%s4416_s17 + $0x10] sm:$0xff] }
0x118e   : > { %v2647_v61 = vadd.f32 -1.4531521, %v2644_v11  ;;  %v2617_v16 = vmul.f32 %v3318_v54, %v2616_v14  ;;  %3321 = vpow2.f32 %v2679_v2  ;;  %v2584_v11 = vmul.f32 0.5, %v4258_v19  ;;  %v3182_v19 = vld [vmem:[%s4413_s14 + $0x1] ss:$0 sm:$0xff]  ;;  %v2775_v2 = vld [vmem:[%s4416_s17 + $0x8] sm:$0xff] }
0x1190   : > { %v2650_v47 = vmul.f32 %v2647_v61, %v2612_v8  ;;  %v2618_v50 = vadd.f32 %v3318_v54, %v2617_v16 }
0x1192   : > { %v2653_v49 = vadd.f32 1.4214138, %v2650_v47  ;;  %v2622_v32 = vsel %vm2621_vm3, %v3318_v54, %v2618_v50 }
0x1193   : > { %v2627_v37 = vsel %vm2624_vm11, %v2626_v26, %v2622_v32 }
0x1194   : > { %v2656_v34 = vmul.f32 %v2653_v49, %v2612_v8  ;;  %v2645_v53 = vmul.f32 1.0614054, %v2627_v37  ;;  %v3322_v7 = vpop.eup %3321 }
0x1195   : > { %v2410_v44 = vpop.permute.xlu1 %2409 }
0x1196   : > { %v2659_v35 = vadd.f32 -0.28449672, %v2656_v34  ;;  %v2422_v23 = vsel %vm1413_vm5, %v2419_v42, %v2410_v44  ;;  %v2648_v45 = vadd.f32 -1.4531521, %v2645_v53 }
0x1197   : > { %v2424_v41 = vpack.c.bf16 %v2422_v23, %v2422_v23 }
0x1198   : > { %v2662_v58 = vmul.f32 %v2659_v35, %v2612_v8  ;;  %v2651_v62 = vmul.f32 %v2648_v45, %v2627_v37 }
0x1199   : > { %3014 = vmatmul.msk.bf16.gmra.mxu1 %vm722_vm1, %v2424_v41 }
0x119a   : > { %v2665_v52 = vadd.f32 0.2548296, %v2662_v58  ;;  %v2654_v63 = vadd.f32 1.4214138, %v2651_v62  ;;  %v2777_v62 = vld [vmem:[%s4416_s17 + $0x18] sm:$0xff] }
0x119c   : > { %v2668_v59 = vmul.f32 %v2665_v52, %v2612_v8  ;;  %v2657_v13 = vmul.f32 %v2654_v63, %v2627_v37  ;;  %v2779_v52 = vpack.c.bf16 %v2777_v62, %v2776_v60 }
0x119e   : > { %v2683_v0 = vmul.f32 %v3320_v3, %v2668_v59  ;;  %v2660_v33 = vadd.f32 -0.28449672, %v2657_v13  ;;  %2790 = vmatpush.bf16.msrb.mxu2 %v2779_v52  ;;  %v2774_v59 = vld [vmem:[%s4416_s17] sm:$0xff] }
0x119f   : > { %v2778_v13 = vpack.c.bf16 %v2775_v2, %v2774_v59 }
0x11a0   : > { %v2686_v4 = vsub.f32 1.0, %v2683_v0  ;;  %v2663_v5 = vmul.f32 %v2660_v33, %v2627_v37 }
0x11a2   : > { %v2666_v6 = vadd.f32 0.2548296, %v2663_v5  ;;  %v2692_v38 = vsub.f32 0.0, %v2686_v4  ;;  %2791 = vmatpush.bf16.msrb.mxu2 %v2778_v13 }
0x11a4   : > { %v2669_v54 = vmul.f32 %v2666_v6, %v2627_v37  ;;  %v2695_v1 = vsel %vm2689_vm13, %v2686_v4, %v2692_v38 }
0x11a5   : > { %v2698_v29 = vadd.f32 1.0, %v2695_v1 }
0x11a6   : > { %v2684_v15 = vmul.f32 %v3322_v7, %v2669_v54 }
0x11a7   : > { %v2701_v61 = vmul.f32 %v2698_v29, %v2584_v11 }
0x11a8   : > { %v2687_v9 = vsub.f32 1.0, %v2684_v15 }
0x11aa   : > { %v2693_v10 = vsub.f32 0.0, %v2687_v9 }
0x11ac   : > { %v2696_v8 = vsel %vm2690_vm4, %v2687_v9, %v2693_v10 }
0x11ad   : > { %v2699_v14 = vadd.f32 1.0, %v2696_v8 }
0x11af   : > { %v2702_v27 = vmul.f32 %v2699_v14, %v2585_v12 }
0x11b1   : > { %v2704_v17 = vpack.c.bf16 %v2702_v27, %v2701_v61 }
0x11b3   : > { %3033 = vmatmul.msk.bf16.vlgmr.msra.gmra.mxu3 %vm695_vm0, %v2704_v17 }
0x1216   : > { %v2457_v16 = vpop.f32.mrf.mxu1 }
0x1217   : > { %v2458_v43 = vadd.f32 %v4200_v28, %v2457_v16 }
0x1219   : > { %v2463_v20 = vadd.f32 %v2458_v43, %v3982_v57  ;;  %v2801_v43 = vld [vmem:[%s4418_s19 + $0x10] sm:$0xff] }
0x121b   : > { %v2474_v56 = vsel %vm729_vm2, %v2463_v20, 0.0 }
0x121c   : > { %2475 = vadd.xlane.f32.xlu0 %v2474_v56 }
0x121e   : > { %v2459_v18 = vpop.f32.mrf.mxu1 }
0x121f   : > { %v2800_v18 = vld [vmem:[%s4418_s19 + $0x8] sm:$0xff] }
0x1236   : > { %v2739_v48 = vpop.f32.mrf.mxu3 }
0x1237   : > { %v2740_v21 = vadd.f32 %v3182_v19, %v2739_v48 }
0x1239   : > { %v2746_v47 = vadd.f32 %v2740_v21, %v4204_v30 }
0x123b   : > { %v2749_v22 = vsel %vm729_vm2, %v2746_v47, 0.0 }
0x123c   : > { %2750 = vadd.xlane.f32.xlu1 %v2749_v22 }
0x123e   : > { %v2741_v55 = vpop.f32.mrf.mxu3 }
0x128f   : > { %v2476_v50 = vpop.xlane.xlu0 %2475 }
0x1290   : > { %v2479_v28 = vmul.f32 %v2476_v50, %v3616_v36 }
0x1292   : > { %v2482_v57 = vsub.f32 %v2463_v20, %v2479_v28  ;;  %v2802_v20 = vld [vmem:[%s4418_s19 + $0x18] sm:$0xff] }
0x1293   : > { %v2804_v56 = vpack.c.bf16 %v2802_v20, %v2801_v43 }
0x1294   : > { %v2485_v46 = vmul.f32 %v2482_v57, %v2482_v57 }
0x1295   : > { %2815 = vmatpush.bf16.msra.mxu1 %v2804_v56 }
0x1296   : > { %v2492_v49 = vsel %vm729_vm2, %v2485_v46, 0.0 }
0x1297   : > { %2493 = vadd.xlane.f32.xlu2 %v2492_v49 }
0x12af   : > { %v2751_v26 = vpop.xlane.xlu1 %2750 }
0x12b0   : > { %v2752_v31 = vmul.f32 %v2751_v26, %v3616_v36 }
0x12b2   : > { %v2753_v32 = vsub.f32 %v2746_v47, %v2752_v31 }
0x12b4   : > { %v2754_v51 = vmul.f32 %v2753_v32, %v2753_v32 }
0x12b6   : > { %v2755_v34 = vsel %vm729_vm2, %v2754_v51, 0.0 }
0x12b7   : > { %2756 = vadd.xlane.f32.xlu0 %v2755_v34 }
0x130a   : > { %v2494_v30 = vpop.xlane.xlu2 %2493 }
0x130b   : > { %v2497_v37 = vmul.f32 %v2494_v30, %v3616_v36 }
0x130d   : > { %v2500_v39 = vadd.f32 1e-05, %v2497_v37 }
0x130f   : > { %3323 = vrsqrt.f32 %v2500_v39  ;;  %vm2527_vm12 = vweird.f32 %v2500_v39 }
0x1315   : > { %v3324_v42 = vpop.eup %3323 }
0x1316   : > { %v2522_v53 = vmul.f32 %v3324_v42, %v2500_v39  ;;  %vm2528_vm5 = vweird.f32 %v3324_v42 }
0x1317   : > { %vm2529_vm6 = vmor %vm2527_vm12, %vm2528_vm5 }
0x1318   : > { %v2523_v44 = vmul.f32 %v3324_v42, %v2522_v53 }
0x131a   : > { %v2524_v35 = vmul.f32 0.5, %v2523_v44 }
0x131c   : > { %v2525_v23 = vsub.f32 1.5, %v2524_v35 }
0x131e   : > { %v2526_v45 = vmul.f32 %v3324_v42, %v2525_v23 }
0x1320   : > { %v2530_v41 = vsel %vm2529_vm6, %v3324_v42, %v2526_v45  ;;  %v2780_v42 = vld [vmem:[%s4417_s18] sm:$0x1] }
0x1321   : > { %v2533_v58 = vmul.f32 %v2530_v41, %v2482_v57 }
0x1323   : > { %v2539_v63 = vmul.f32 %v4239_v24, %v2533_v58 }
0x1325   : > { %v2545_v3 = vadd.f32 %v4244_v25, %v2539_v63  ;;  %v2747_v25 = vld [vmem:[%s4414_s15] sm:$0x1] }
0x1327   : > { %v2547_v0 = vpack.c.bf16 %v2545_v3, %v2545_v3 }
0x1329   : > { %3023 = vmatmul.msk.bf16.gmra.mxu0 %vm722_vm1, %v2547_v0 }
0x132a   : > { %v2757_v33 = vpop.xlane.xlu0 %2756 }
0x132b   : > { %v2758_v4 = vmul.f32 %v2757_v33, %v3616_v36  ;;  %v2748_v36 = vld [vmem:[%s4415_s16] sm:$0x1] }
0x132d   : > { %v2759_v24 = vadd.f32 1e-05, %v2758_v4 }
0x132f   : > { %3325 = vrsqrt.f32 %v2759_v24  ;;  %vm2766_vm7 = vweird.f32 %v2759_v24 }
0x1335   : > { %v3326_v5 = vpop.eup %3325 }
0x1336   : > { %v2761_v6 = vmul.f32 %v3326_v5, %v2759_v24  ;;  %vm2767_vm2 = vweird.f32 %v3326_v5  ;;  %v2805_v24 = vld [vmem:[%s4495_s27] sm:$0x1] }
0x1337   : > { %vm2768_vm8 = vmor %vm2766_vm7, %vm2767_vm2 }
0x1338   : > { %v2762_v38 = vmul.f32 %v3326_v5, %v2761_v6 }
0x133a   : > { %v2763_v54 = vmul.f32 0.5, %v2762_v38 }
0x133c   : > { %v2764_v7 = vsub.f32 1.5, %v2763_v54 }
0x133e   : > { %v2765_v15 = vmul.f32 %v3326_v5, %v2764_v7 }
0x1340   : > { %v2769_v1 = vsel %vm2768_vm8, %v3326_v5, %v2765_v15 }
0x1341   : > { %v2770_v9 = vmul.f32 %v2769_v1, %v2753_v32 }
0x1343   : > { %v2771_v10 = vmul.f32 %v2770_v9, %v2747_v25 }
0x1345   : > { %v2772_v29 = vadd.f32 %v2771_v10, %v2748_v36 }
0x1347   : > { %v2773_v8 = vpack.c.bf16 %v2772_v29, %v2772_v29 }
0x1349   : > { %3035 = vmatmul.msk.bf16.vlgmr.msrb.gmra.mxu2 %vm722_vm1, %v2773_v8 }
0x13a6   : > { %v2580_v11 = vpop.f32.mrf.mxu0 }
0x13a7   : > { %v2581_v12 = vadd.f32 %v4255_v40, %v2580_v11  ;;  %v2799_v40 = vld [vmem:[%s4418_s19] sm:$0xff] }
0x13a8   : > { %v2803_v19 = vpack.c.bf16 %v2800_v18, %v2799_v40 }
0x13a9   : > { %v2589_v14 = vmul.f32 0.70710677, %v2581_v12  ;;  %v2586_v13 = vmul.f32 0.5, %v2581_v12 }
0x13aa   : > { %2816 = vmatpush.bf16.msra.mxu1 %v2803_v19 }
0x13ab   : > { %v2592_v61 = vand.u32 2147483647, %v2589_v14  ;;  %vm2691_vm3 = vcmp.ge.f32.partialorder %v2589_v14, 0.0 }
0x13ad   : > { %v2595_v27 = vmul.f32 0.3275911, %v2592_v61  ;;  %v2673_v49 = vsub.f32 0.0, %v2592_v61 }
0x13ae   : > { %v2582_v17 = vpop.f32.mrf.mxu0 }
0x13af   : > { %v2598_v16 = vadd.f32 1.0, %v2595_v27  ;;  %v2676_v51 = vmul.f32 %v2673_v49, %v2592_v61 }
0x13b1   : > { %3327 = vrcp.f32 %v2598_v16  ;;  %v2640_v22 = vand.u32 2147483648, %v2598_v16  ;;  %v2638_v50 = vand.u32 2147483647, %v2598_v16  ;;  %vm2634_vm10 = vweird.f32 %v2598_v16 }
0x13b2   : > { %v2681_v37 = vmul.f32 1.442695, %v2676_v51 }
0x13b3   : > { %v2641_v57 = vor.u32 1.1754944e-38, %v2640_v22  ;;  %vm2639_vm15 = vcmp.eq.f32.partialorder %v2638_v50, 8.507059e+37 }
0x13b4   : > { %3329 = vpow2.f32 %v2681_v37 }
0x13b7   : > { %v3328_v48 = vpop.eup %3327 }
0x13b8   : > { %v2630_v21 = vmul.f32 %v3328_v48, %v2598_v16  ;;  %vm2635_vm9 = vweird.f32 %v3328_v48 }
0x13b9   : > { %vm2636_vm14 = vmor %vm2634_vm10, %vm2635_vm9 }
0x13ba   : > { %v2631_v47 = vsub.f32 1.0, %v2630_v21  ;;  %v3330_v58 = vpop.eup %3329 }
0x13bc   : > { %v2632_v55 = vmul.f32 %v3328_v48, %v2631_v47 }
0x13be   : > { %v2633_v28 = vadd.f32 %v3328_v48, %v2632_v55 }
0x13c0   : > { %v2637_v46 = vsel %vm2636_vm14, %v3328_v48, %v2633_v28 }
0x13c1   : > { %v2642_v26 = vsel %vm2639_vm15, %v2641_v57, %v2637_v46 }
0x13c2   : > { %v2646_v31 = vmul.f32 1.0614054, %v2642_v26 }
0x13c4   : > { %v2649_v32 = vadd.f32 -1.4531521, %v2646_v31 }
0x13c6   : > { %v2652_v34 = vmul.f32 %v2649_v32, %v2642_v26 }
0x13c8   : > { %v2655_v30 = vadd.f32 1.4214138, %v2652_v34 }
0x13ca   : > { %v2658_v39 = vmul.f32 %v2655_v30, %v2642_v26 }
0x13cc   : > { %v2661_v53 = vadd.f32 -0.28449672, %v2658_v39  ;;  %v2793_v44 = vpop.f32.mrf.mxu2 }
0x13cd   : > { %v2794_v35 = vadd.f32 %v2793_v44, %v2780_v42 }
0x13ce   : > { %v2664_v23 = vmul.f32 %v2661_v53, %v2642_v26 }
0x13cf   : > { %3331 = vtanh.f32 %v2794_v35 }
0x13d0   : > { %v2667_v45 = vadd.f32 0.2548296, %v2664_v23 }
0x13d2   : > { %v2670_v41 = vmul.f32 %v2667_v45, %v2642_v26 }
0x13d4   : > { %v2685_v60 = vmul.f32 %v3330_v58, %v2670_v41  ;;  %v2795_v62 = vpop.f32.mrf.mxu2 }
0x13d5   : > { %v3332_v52 = vpop.eup %3331 }
0x13d6   : > { %v2688_v63 = vsub.f32 1.0, %v2685_v60  ;;  %v2798_v59 = vpack.c.bf16 %v3332_v52, %v3332_v52 }
0x13d8   : > { %v2694_v2 = vsub.f32 0.0, %v2688_v63  ;;  %3036 = vmatmul.msk.bf16.vlgmr.msra.gmra.mxu1 %vm722_vm1, %v2798_v59 }
0x13da   : > { %v2697_v3 = vsel %vm2691_vm3, %v2688_v63, %v2694_v2 }
0x13db   : > { %v2700_v0 = vadd.f32 1.0, %v2697_v3 }
0x13dd   : > { %v2703_v33 = vmul.f32 %v2700_v0, %v2586_v13 }
0x13df   : > { %v2705_v4 = vpack.c.bf16 %v2703_v33, %v2703_v33 }
0x13e1   : > { %3034 = vmatmul.msk.bf16.gmra.mxu3 %vm695_vm0, %v2705_v4 }
0x1455   : > { %v2818_v5 = vpop.f32.mrf.mxu1 }
0x1456   : > { %v2819_v6 = vadd.f32 %v2818_v5, %v2805_v24 }
0x1458   : > { %2822 = vst [vmem:[%s663_s26] sm:$0x1] %v2819_v6 }
0x1459   : > { %3360 = shalt.err (!%p3357_p3)
}
0x145a   : > { %3043 = dma.vmem_to_hbm [thread:$0]  (%p3560_p5), %s2835_s24, 16, %s2837_s1, %s2824_s0  }
0x145d   : > { %v2820_v38 = vpop.f32.mrf.mxu1 }
0x1464   : > { %v2743_v54 = vpop.f32.mrf.mxu3 }
0x146c   : > { %v2744_v7 = vpop.f32.mrf.mxu3 }
0x146d PF: > { %s4496_s23 = sld [smem:[#allocation7_spill]] }
0x146e   : > { %s4497_s29 = sld [smem:[#allocation5_spill]] }
0x1473   : > { %p3049_p4 = scmp.ge.s32.totalorder %s4496_s23, 2 }
0x1474   : > { %s2848_s26 = sand.u32 1, %s4497_s29  }
0x1475   : > { %p3046_p7 = pnand %p3049_p4, %p3564_p6  ;;  %s2849_s4 = scalar_lea.sflag [#allocation3], %s2848_s26 }
0x1477   : > { %p3047_p8 = pneg %p3046_p7 }
0x1479   : > { %3378 = dma.done.wait (%p3047_p8), %s2849_s4, 16  }
0x147a   : > { %3380 = vsyncadd (%p3047_p8), %s2849_s4, 4294967280  ;;  %s4499_s27 = sld [smem:[#allocation8_spill]]  ;;  %s4502_s2 = smov %s3387_s25 }
0x147b   : > { %s4500_s6 = sld [smem:[#allocation6_spill]] }
0x147c   : > { %s4501_s26 = sld [smem:[#allocation9_spill]] }
0x1480   : > { %p31_p5 = scmp.ge.s32.totalorder %s4499_s27, 4  }
0x1481   : > { %s4503_s25 = smov %s4500_s6 }
0x1482   :  { %33 = sbr.rel (!%p31_p5) target bundleno = 12 (0xc), region = 154 }
0x1487   :  { %2854 = vsyncpa [#allocation3], 1 }
0x1488   :  { %2856 = vsyncpa [#allocation3 + $0x1], 1 }

</bundles_post_ra>
